<compile_context>
chip_gen: v7x
topology: tpu7x:2x2x1
jax: 0.10.0
libtpu: 0.0.40
codegen_flags: <defaults>
</compile_context>

<pallas_src>
import jax
import jax.numpy as jnp
from jax import lax
from jax.experimental import pallas as pl
from jax.experimental.pallas import tpu as pltpu

# Hyperparameters from modelTrain_1.py (vocab_size made nonzero for the
# synthetic run; the original script derives it from an empty corpus).
EMBEDDING_SIZE = 3
N_HIDDEN = 5
NUM_CLASSES = 2
VOCAB_SIZE = 16

LANE = 128  # lane stride per gate (one vreg column block)
HP = lax.Precision.HIGHEST


def init_params(key):
    H, E, C, V = N_HIDDEN, EMBEDDING_SIZE, NUM_CLASSES, VOCAB_SIZE
    ks = jax.random.split(key, 11)
    s = 1.0 / (H ** 0.5)
    u = lambda k, shape: jax.random.uniform(k, shape, jnp.float32, -s, s)
    return {
        "emb": jax.random.normal(ks[0], (V, E), jnp.float32),       # nn.Embedding
        "w_ih_f": u(ks[1], (4 * H, E)), "w_hh_f": u(ks[2], (4 * H, H)),
        "b_ih_f": u(ks[3], (4 * H,)),   "b_hh_f": u(ks[4], (4 * H,)),
        "w_ih_b": u(ks[5], (4 * H, E)), "w_hh_b": u(ks[6], (4 * H, H)),
        "b_ih_b": u(ks[7], (4 * H,)),   "b_hh_b": u(ks[8], (4 * H,)),
        "w_fc": u(ks[9], (C, 2 * H)),   "b_fc": u(ks[10], (C,)),
    }


def _round_up(x, m):
    return (x + m - 1) // m * m


def _lane_stride_gates(m):
    """(..., 4H) -> (..., 4*LANE): gate k occupies lanes [k*LANE, k*LANE+H)."""
    H, G = N_HIDDEN, LANE
    lead = m.shape[:-1]
    r = m.reshape(lead + (4, H))
    r = jnp.pad(r, [(0, 0)] * len(lead) + [(0, 0), (0, G - H)])
    return r.reshape(lead + (4 * G,))


def _pack_slab(params):
    """Single (8,128)-aligned f32 weight slab.  Row layout:
         [0, V)            folded input projection emb @ W_ih^T (fwd gates in
                           lanes [0,4G), bwd gates in [4G,8G), 128-lane/gate)
         V                 combined LSTM bias (b_ih + b_hh), same lane layout
         V+1               FC bias in lanes [0, C)
         [R_WHH, R_WHH+H)  W_hh^T (lane-strided gates), fwd | bwd along lanes
         [R_WFC, R_WFC+H)  FC weights: fwd half lanes [0,C), bwd half [G, G+C)
    """
    H, C, V, G = N_HIDDEN, NUM_CLASSES, VOCAB_SIZE, LANE
    r_bias = V
    r_bfc = V + 1
    r_whh = _round_up(V + 2, 8)
    r_wfc = _round_up(r_whh + H, 8)
    rows = _round_up(r_wfc + H, 8)

    hdot = lambda a, b: jnp.dot(a, b, precision=HP)
    slab = jnp.zeros((rows, 8 * G), jnp.float32)
    # Folded embedding + input projection (per direction), lane-strided gates.
    w_in = jnp.concatenate(
        [_lane_stride_gates(hdot(params["emb"], params["w_ih_f"].T)),
         _lane_stride_gates(hdot(params["emb"], params["w_ih_b"].T))], axis=1)
    slab = slab.at[0:V, :].set(w_in)
    # Combined LSTM biases (b_ih + b_hh) per direction.
    b_gates = jnp.concatenate(
        [_lane_stride_gates(params["b_ih_f"] + params["b_hh_f"]),
         _lane_stride_gates(params["b_ih_b"] + params["b_hh_b"])], axis=0)
    slab = slab.at[r_bias, :].set(b_gates)
    # FC bias.
    slab = slab.at[r_bfc, 0:C].set(params["b_fc"])
    # Recurrence weights W_hh^T, lane-strided gates, fwd | bwd along lanes.
    slab = slab.at[r_whh:r_whh + H, 0:4 * G].set(_lane_stride_gates(params["w_hh_f"].T))
    slab = slab.at[r_whh:r_whh + H, 4 * G:8 * G].set(_lane_stride_gates(params["w_hh_b"].T))
    # FC weights split per direction (avoids the lane-concat in the epilogue).
    slab = slab.at[r_wfc:r_wfc + H, 0:C].set(params["w_fc"][:, 0:H].T)
    slab = slab.at[r_wfc:r_wfc + H, LANE:LANE + C].set(params["w_fc"][:, H:2 * H].T)
    return slab, (r_bias, r_bfc, r_whh, r_wfc)


def bilstm_forward(tokens, params):
    """tokens: (B, T) int32 word indices -> (B, NUM_CLASSES) float32 logits."""
    B, T = tokens.shape
    H, C, V, G = N_HIDDEN, NUM_CLASSES, VOCAB_SIZE, LANE
    BP = _round_up(max(B, 1), 8)          # pad batch to one sublane tile

    slab, (r_bias, r_bfc, r_whh, r_wfc) = _pack_slab(params)

    # Time-major flattened token ids; padded batch rows use token 0 (discarded).
    tok_p = jnp.zeros((BP, T), jnp.int32).at[:B, :].set(tokens.astype(jnp.int32))
    idx = tok_p.T.reshape(T * BP, 1)

    def kernel(idx_ref, slab_ref, out_ref, pre_ref):
        # ---- prologue: embedding folded into the input projection -----------
        ids = idx_ref[...]                                        # (T*BP, 1)
        lanes = lax.broadcasted_iota(jnp.int32, (T * BP, V), 1)
        onehot = (lanes == ids).astype(jnp.float32)               # (T*BP, V)
        pre_ref[...] = (
            jnp.dot(onehot, slab_ref[0:V, :],
                    preferred_element_type=jnp.float32, precision=HP)
            + slab_ref[r_bias:r_bias + 1, :])                     # (T*BP, 8G)

        whh_f = slab_ref[r_whh:r_whh + H, 0:4 * G]                # (H, 4G)
        whh_b = slab_ref[r_whh:r_whh + H, 4 * G:8 * G]            # (H, 4G)

        def cell(pre, h, c, whh):
            # One fused 4-gate matmul; gate slices start at lanes 0/128/256/384
            # (128-aligned -> no lane rotation on the critical chain).
            g = pre + jnp.dot(h, whh, preferred_element_type=jnp.float32,
                              precision=HP)                       # (BP, 4G)
            i_g = jax.nn.sigmoid(g[:, 0 * G:0 * G + H])
            f_g = jax.nn.sigmoid(g[:, 1 * G:1 * G + H])
            g_g = jnp.tanh(g[:, 2 * G:2 * G + H])
            o_g = jax.nn.sigmoid(g[:, 3 * G:3 * G + H])
            c_new = f_g * c + i_g * g_g
            h_new = o_g * jnp.tanh(c_new)
            return h_new, c_new

        h_f = jnp.zeros((BP, H), jnp.float32)
        c_f = jnp.zeros((BP, H), jnp.float32)
        h_b = jnp.zeros((BP, H), jnp.float32)
        c_b = jnp.zeros((BP, H), jnp.float32)

        # Fully-unrolled loop (T static); fwd/bwd chains are independent so the
        # scheduler interleaves their MXU/EUP latencies.  Row offsets t*BP are
        # 8-aligned (BP = 8) -> whole-tile slices, no sublane repacking.
        for t in range(T):
            s = T - 1 - t
            pre_f = pre_ref[t * BP:(t + 1) * BP, 0:4 * G]         # (BP, 4G)
            pre_b = pre_ref[s * BP:(s + 1) * BP, 4 * G:8 * G]     # (BP, 4G)
            h_f, c_f = cell(pre_f, h_f, c_f, whh_f)
            h_b, c_b = cell(pre_b, h_b, c_b, whh_b)

        # ---- FC epilogue: fc(cat([h_n[0], h_n[1]], 1)) without the concat ----
        out_ref[...] = (
            jnp.dot(h_f, slab_ref[r_wfc:r_wfc + H, 0:C],
                    preferred_element_type=jnp.float32, precision=HP)
            + jnp.dot(h_b, slab_ref[r_wfc:r_wfc + H, G:G + C],
                      preferred_element_type=jnp.float32, precision=HP)
            + slab_ref[r_bfc:r_bfc + 1, 0:C])

    vmem = pl.BlockSpec(memory_space=pltpu.MemorySpace.VMEM)
    out = pl.pallas_call(
        kernel,
        out_shape=jax.ShapeDtypeStruct((BP, C), jnp.float32),
        in_specs=[vmem, vmem],
        out_specs=vmem,
        scratch_shapes=[pltpu.VMEM((T * BP, 8 * G), jnp.float32)],
    )(idx, slab)
    return out[:B, :]


def bilstm_reference(tokens, params):
    """Pure-JAX reference of the PyTorch forward (f32, HIGHEST matmul precision)."""
    H = N_HIDDEN
    hdot = lambda a, b: jnp.dot(a, b, precision=HP)
    x = jnp.transpose(params["emb"][tokens], (1, 0, 2))            # (T, B, E)

    def run(x_seq, w_ih, w_hh, b_ih, b_hh):
        B = x_seq.shape[1]

        def step(carry, x_t):
            h, c = carry
            gates = hdot(x_t, w_ih.T) + hdot(h, w_hh.T) + b_ih + b_hh
            i, f, g, o = jnp.split(gates, 4, axis=1)
            c = jax.nn.sigmoid(f) * c + jax.nn.sigmoid(i) * jnp.tanh(g)
            h = jax.nn.sigmoid(o) * jnp.tanh(c)
            return (h, c), None

        (h, _), _ = lax.scan(step, (jnp.zeros((B, H), jnp.float32),
                                    jnp.zeros((B, H), jnp.float32)), x_seq)
        return h

    h_f = run(x, params["w_ih_f"], params["w_hh_f"],
              params["b_ih_f"], params["b_hh_f"])                  # h_n[0]
    h_b = run(x[::-1], params["w_ih_b"], params["w_hh_b"],
              params["b_ih_b"], params["b_hh_b"])                  # h_n[1]
    enc = jnp.concatenate([h_f, h_b], axis=1)
    return hdot(enc, params["w_fc"].T) + params["b_fc"]


if __name__ == "__main__":
    key = jax.random.PRNGKey(0)
    k_tok, k_par = jax.random.split(key)

    batch, seq_len = 2, 8
    tokens = jax.random.randint(k_tok, (batch, seq_len), 0, VOCAB_SIZE,
                                dtype=jnp.int32)
    params = init_params(k_par)

    logits = bilstm_forward(tokens, params)
    jax.block_until_ready(logits)
    assert logits.shape == (batch, NUM_CLASSES)
    assert logits.dtype == jnp.float32

    ref = bilstm_reference(tokens, params)
    assert jnp.allclose(logits, ref, atol=1e-3, rtol=1e-3), (logits, ref)
    print("KERNEL_OK")
</pallas_src>

<mosaic_0001>
module attributes {stable_mosaic.version = 11 : i64} {
  func.func @kernel(%arg0: memref<64x1xi32, #tpu.memory_space<vmem>>, %arg1: memref<40x1024xf32, #tpu.memory_space<vmem>>, %arg2: memref<8x2xf32, #tpu.memory_space<vmem>>, %arg3: memref<64x1024xf32, #tpu.memory_space<vmem>>) attributes {dimension_semantics = [], scalar_prefetch = 0 : i64, scratch_operands = 1 : i64, tpu.core_type = #tpu.core_type<tc>} {
    %c0 = arith.constant 0 : index
    %c0_0 = arith.constant 0 : index
    %0 = vector.load %arg0[%c0, %c0_0] : memref<64x1xi32, #tpu.memory_space<vmem>>, vector<64x1xi32>
    %1 = tpu.iota {dimensions = array<i32: 1>} : vector<64x16xi32>
    %2 = vector.broadcast %0 : vector<64x1xi32> to vector<64x16xi32>
    %3 = arith.cmpi eq, %1, %2 : vector<64x16xi32>
    %4 = arith.extui %3 : vector<64x16xi1> to vector<64x16xi32>
    %5 = arith.sitofp %4 : vector<64x16xi32> to vector<64x16xf32>
    %c0_1 = arith.constant 0 : index
    %c0_2 = arith.constant 0 : index
    %6 = vector.load %arg1[%c0_1, %c0_2] : memref<40x1024xf32, #tpu.memory_space<vmem>>, vector<16x1024xf32>
    %cst = arith.constant dense<0.000000e+00> : vector<64x1024xf32>
    %7 = tpu.matmul %5, %6, %cst {dimension_numbers = #tpu.dot_dimension_numbers<[1], [0], [0], [1], [0, 0, 1, 1], [], []>, precision = #tpu.contract_precision<fp32>} : vector<64x16xf32>, vector<16x1024xf32>, vector<64x1024xf32> -> vector<64x1024xf32>
    %c16 = arith.constant 16 : index
    %c0_3 = arith.constant 0 : index
    %8 = vector.load %arg1[%c16, %c0_3] : memref<40x1024xf32, #tpu.memory_space<vmem>>, vector<1x1024xf32>
    %9 = vector.broadcast %8 : vector<1x1024xf32> to vector<64x1024xf32>
    %10 = arith.addf %7, %9 : vector<64x1024xf32>
    %c0_4 = arith.constant 0 : index
    %c0_5 = arith.constant 0 : index
    %11 = vector.load %arg3[%c0_4, %c0_5] : memref<64x1024xf32, #tpu.memory_space<vmem>>, vector<64x1024xf32>
    tpu.vector_store %arg3[%c0_4, %c0_5], %10 {strides = array<i32>} : memref<64x1024xf32, #tpu.memory_space<vmem>>, vector<64x1024xf32>,
    %c24 = arith.constant 24 : index
    %c0_6 = arith.constant 0 : index
    %12 = vector.load %arg1[%c24, %c0_6] : memref<40x1024xf32, #tpu.memory_space<vmem>>, vector<5x512xf32>
    %c24_7 = arith.constant 24 : index
    %c512 = arith.constant 512 : index
    %13 = vector.load %arg1[%c24_7, %c512] : memref<40x1024xf32, #tpu.memory_space<vmem>>, vector<5x512xf32>
    %cst_8 = arith.constant 0.000000e+00 : f32
    %14 = vector.broadcast %cst_8 : f32 to vector<8x5xf32>
    %cst_9 = arith.constant 0.000000e+00 : f32
    %15 = vector.broadcast %cst_9 : f32 to vector<8x5xf32>
    %cst_10 = arith.constant 0.000000e+00 : f32
    %16 = vector.broadcast %cst_10 : f32 to vector<8x5xf32>
    %cst_11 = arith.constant 0.000000e+00 : f32
    %17 = vector.broadcast %cst_11 : f32 to vector<8x5xf32>
    %c0_12 = arith.constant 0 : index
    %c0_13 = arith.constant 0 : index
    %18 = vector.load %arg3[%c0_12, %c0_13] : memref<64x1024xf32, #tpu.memory_space<vmem>>, vector<8x512xf32>
    %c56 = arith.constant 56 : index
    %c512_14 = arith.constant 512 : index
    %19 = vector.load %arg3[%c56, %c512_14] : memref<64x1024xf32, #tpu.memory_space<vmem>>, vector<8x512xf32>
    %cst_15 = arith.constant dense<0.000000e+00> : vector<8x512xf32>
    %20 = tpu.matmul %14, %12, %cst_15 {dimension_numbers = #tpu.dot_dimension_numbers<[1], [0], [0], [1], [0, 0, 1, 1], [], []>, precision = #tpu.contract_precision<fp32>} : vector<8x5xf32>, vector<5x512xf32>, vector<8x512xf32> -> vector<8x512xf32>
    %21 = arith.addf %18, %20 : vector<8x512xf32>
    %22 = vector.extract_strided_slice %21 {offsets = [0, 0], sizes = [8, 5], strides = [1, 1]} : vector<8x512xf32> to vector<8x5xf32>
    %23 = arith.negf %22 : vector<8x5xf32>
    %24 = math.exp %23 : vector<8x5xf32>
    %cst_16 = arith.constant 1.000000e+00 : f32
    %25 = vector.broadcast %cst_16 : f32 to vector<8x5xf32>
    %26 = arith.addf %25, %24 : vector<8x5xf32>
    %27 = arith.divf %25, %26 : vector<8x5xf32>
    %28 = vector.extract_strided_slice %21 {offsets = [0, 128], sizes = [8, 5], strides = [1, 1]} : vector<8x512xf32> to vector<8x5xf32>
    %29 = arith.negf %28 : vector<8x5xf32>
    %30 = math.exp %29 : vector<8x5xf32>
    %cst_17 = arith.constant 1.000000e+00 : f32
    %31 = vector.broadcast %cst_17 : f32 to vector<8x5xf32>
    %32 = arith.addf %31, %30 : vector<8x5xf32>
    %33 = arith.divf %31, %32 : vector<8x5xf32>
    %34 = vector.extract_strided_slice %21 {offsets = [0, 256], sizes = [8, 5], strides = [1, 1]} : vector<8x512xf32> to vector<8x5xf32>
    %35 = math.tanh %34 : vector<8x5xf32>
    %36 = vector.extract_strided_slice %21 {offsets = [0, 384], sizes = [8, 5], strides = [1, 1]} : vector<8x512xf32> to vector<8x5xf32>
    %37 = arith.negf %36 : vector<8x5xf32>
    %38 = math.exp %37 : vector<8x5xf32>
    %cst_18 = arith.constant 1.000000e+00 : f32
    %39 = vector.broadcast %cst_18 : f32 to vector<8x5xf32>
    %40 = arith.addf %39, %38 : vector<8x5xf32>
    %41 = arith.divf %39, %40 : vector<8x5xf32>
    %42 = arith.mulf %33, %15 : vector<8x5xf32>
    %43 = arith.mulf %27, %35 : vector<8x5xf32>
    %44 = arith.addf %42, %43 : vector<8x5xf32>
    %45 = math.tanh %44 : vector<8x5xf32>
    %46 = arith.mulf %41, %45 : vector<8x5xf32>
    %cst_19 = arith.constant dense<0.000000e+00> : vector<8x512xf32>
    %47 = tpu.matmul %16, %13, %cst_19 {dimension_numbers = #tpu.dot_dimension_numbers<[1], [0], [0], [1], [0, 0, 1, 1], [], []>, precision = #tpu.contract_precision<fp32>} : vector<8x5xf32>, vector<5x512xf32>, vector<8x512xf32> -> vector<8x512xf32>
    %48 = arith.addf %19, %47 : vector<8x512xf32>
    %49 = vector.extract_strided_slice %48 {offsets = [0, 0], sizes = [8, 5], strides = [1, 1]} : vector<8x512xf32> to vector<8x5xf32>
    %50 = arith.negf %49 : vector<8x5xf32>
    %51 = math.exp %50 : vector<8x5xf32>
    %cst_20 = arith.constant 1.000000e+00 : f32
    %52 = vector.broadcast %cst_20 : f32 to vector<8x5xf32>
    %53 = arith.addf %52, %51 : vector<8x5xf32>
    %54 = arith.divf %52, %53 : vector<8x5xf32>
    %55 = vector.extract_strided_slice %48 {offsets = [0, 128], sizes = [8, 5], strides = [1, 1]} : vector<8x512xf32> to vector<8x5xf32>
    %56 = arith.negf %55 : vector<8x5xf32>
    %57 = math.exp %56 : vector<8x5xf32>
    %cst_21 = arith.constant 1.000000e+00 : f32
    %58 = vector.broadcast %cst_21 : f32 to vector<8x5xf32>
    %59 = arith.addf %58, %57 : vector<8x5xf32>
    %60 = arith.divf %58, %59 : vector<8x5xf32>
    %61 = vector.extract_strided_slice %48 {offsets = [0, 256], sizes = [8, 5], strides = [1, 1]} : vector<8x512xf32> to vector<8x5xf32>
    %62 = math.tanh %61 : vector<8x5xf32>
    %63 = vector.extract_strided_slice %48 {offsets = [0, 384], sizes = [8, 5], strides = [1, 1]} : vector<8x512xf32> to vector<8x5xf32>
    %64 = arith.negf %63 : vector<8x5xf32>
    %65 = math.exp %64 : vector<8x5xf32>
    %cst_22 = arith.constant 1.000000e+00 : f32
    %66 = vector.broadcast %cst_22 : f32 to vector<8x5xf32>
    %67 = arith.addf %66, %65 : vector<8x5xf32>
    %68 = arith.divf %66, %67 : vector<8x5xf32>
    %69 = arith.mulf %60, %17 : vector<8x5xf32>
    %70 = arith.mulf %54, %62 : vector<8x5xf32>
    %71 = arith.addf %69, %70 : vector<8x5xf32>
    %72 = math.tanh %71 : vector<8x5xf32>
    %73 = arith.mulf %68, %72 : vector<8x5xf32>
    %c8 = arith.constant 8 : index
    %c0_23 = arith.constant 0 : index
    %74 = vector.load %arg3[%c8, %c0_23] : memref<64x1024xf32, #tpu.memory_space<vmem>>, vector<8x512xf32>
    %c48 = arith.constant 48 : index
    %c512_24 = arith.constant 512 : index
    %75 = vector.load %arg3[%c48, %c512_24] : memref<64x1024xf32, #tpu.memory_space<vmem>>, vector<8x512xf32>
    %cst_25 = arith.constant dense<0.000000e+00> : vector<8x512xf32>
    %76 = tpu.matmul %46, %12, %cst_25 {dimension_numbers = #tpu.dot_dimension_numbers<[1], [0], [0], [1], [0, 0, 1, 1], [], []>, precision = #tpu.contract_precision<fp32>} : vector<8x5xf32>, vector<5x512xf32>, vector<8x512xf32> -> vector<8x512xf32>
    %77 = arith.addf %74, %76 : vector<8x512xf32>
    %78 = vector.extract_strided_slice %77 {offsets = [0, 0], sizes = [8, 5], strides = [1, 1]} : vector<8x512xf32> to vector<8x5xf32>
    %79 = arith.negf %78 : vector<8x5xf32>
    %80 = math.exp %79 : vector<8x5xf32>
    %cst_26 = arith.constant 1.000000e+00 : f32
    %81 = vector.broadcast %cst_26 : f32 to vector<8x5xf32>
    %82 = arith.addf %81, %80 : vector<8x5xf32>
    %83 = arith.divf %81, %82 : vector<8x5xf32>
    %84 = vector.extract_strided_slice %77 {offsets = [0, 128], sizes = [8, 5], strides = [1, 1]} : vector<8x512xf32> to vector<8x5xf32>
    %85 = arith.negf %84 : vector<8x5xf32>
    %86 = math.exp %85 : vector<8x5xf32>
    %cst_27 = arith.constant 1.000000e+00 : f32
    %87 = vector.broadcast %cst_27 : f32 to vector<8x5xf32>
    %88 = arith.addf %87, %86 : vector<8x5xf32>
    %89 = arith.divf %87, %88 : vector<8x5xf32>
    %90 = vector.extract_strided_slice %77 {offsets = [0, 256], sizes = [8, 5], strides = [1, 1]} : vector<8x512xf32> to vector<8x5xf32>
    %91 = math.tanh %90 : vector<8x5xf32>
    %92 = vector.extract_strided_slice %77 {offsets = [0, 384], sizes = [8, 5], strides = [1, 1]} : vector<8x512xf32> to vector<8x5xf32>
    %93 = arith.negf %92 : vector<8x5xf32>
    %94 = math.exp %93 : vector<8x5xf32>
    %cst_28 = arith.constant 1.000000e+00 : f32
    %95 = vector.broadcast %cst_28 : f32 to vector<8x5xf32>
    %96 = arith.addf %95, %94 : vector<8x5xf32>
    %97 = arith.divf %95, %96 : vector<8x5xf32>
    %98 = arith.mulf %89, %44 : vector<8x5xf32>
    %99 = arith.mulf %83, %91 : vector<8x5xf32>
    %100 = arith.addf %98, %99 : vector<8x5xf32>
    %101 = math.tanh %100 : vector<8x5xf32>
    %102 = arith.mulf %97, %101 : vector<8x5xf32>
    %cst_29 = arith.constant dense<0.000000e+00> : vector<8x512xf32>
    %103 = tpu.matmul %73, %13, %cst_29 {dimension_numbers = #tpu.dot_dimension_numbers<[1], [0], [0], [1], [0, 0, 1, 1], [], []>, precision = #tpu.contract_precision<fp32>} : vector<8x5xf32>, vector<5x512xf32>, vector<8x512xf32> -> vector<8x512xf32>
    %104 = arith.addf %75, %103 : vector<8x512xf32>
    %105 = vector.extract_strided_slice %104 {offsets = [0, 0], sizes = [8, 5], strides = [1, 1]} : vector<8x512xf32> to vector<8x5xf32>
    %106 = arith.negf %105 : vector<8x5xf32>
    %107 = math.exp %106 : vector<8x5xf32>
    %cst_30 = arith.constant 1.000000e+00 : f32
    %108 = vector.broadcast %cst_30 : f32 to vector<8x5xf32>
    %109 = arith.addf %108, %107 : vector<8x5xf32>
    %110 = arith.divf %108, %109 : vector<8x5xf32>
    %111 = vector.extract_strided_slice %104 {offsets = [0, 128], sizes = [8, 5], strides = [1, 1]} : vector<8x512xf32> to vector<8x5xf32>
    %112 = arith.negf %111 : vector<8x5xf32>
    %113 = math.exp %112 : vector<8x5xf32>
    %cst_31 = arith.constant 1.000000e+00 : f32
    %114 = vector.broadcast %cst_31 : f32 to vector<8x5xf32>
    %115 = arith.addf %114, %113 : vector<8x5xf32>
    %116 = arith.divf %114, %115 : vector<8x5xf32>
    %117 = vector.extract_strided_slice %104 {offsets = [0, 256], sizes = [8, 5], strides = [1, 1]} : vector<8x512xf32> to vector<8x5xf32>
    %118 = math.tanh %117 : vector<8x5xf32>
    %119 = vector.extract_strided_slice %104 {offsets = [0, 384], sizes = [8, 5], strides = [1, 1]} : vector<8x512xf32> to vector<8x5xf32>
    %120 = arith.negf %119 : vector<8x5xf32>
    %121 = math.exp %120 : vector<8x5xf32>
    %cst_32 = arith.constant 1.000000e+00 : f32
    %122 = vector.broadcast %cst_32 : f32 to vector<8x5xf32>
    %123 = arith.addf %122, %121 : vector<8x5xf32>
    %124 = arith.divf %122, %123 : vector<8x5xf32>
    %125 = arith.mulf %116, %71 : vector<8x5xf32>
    %126 = arith.mulf %110, %118 : vector<8x5xf32>
    %127 = arith.addf %125, %126 : vector<8x5xf32>
    %128 = math.tanh %127 : vector<8x5xf32>
    %129 = arith.mulf %124, %128 : vector<8x5xf32>
    %c16_33 = arith.constant 16 : index
    %c0_34 = arith.constant 0 : index
    %130 = vector.load %arg3[%c16_33, %c0_34] : memref<64x1024xf32, #tpu.memory_space<vmem>>, vector<8x512xf32>
    %c40 = arith.constant 40 : index
    %c512_35 = arith.constant 512 : index
    %131 = vector.load %arg3[%c40, %c512_35] : memref<64x1024xf32, #tpu.memory_space<vmem>>, vector<8x512xf32>
    %cst_36 = arith.constant dense<0.000000e+00> : vector<8x512xf32>
    %132 = tpu.matmul %102, %12, %cst_36 {dimension_numbers = #tpu.dot_dimension_numbers<[1], [0], [0], [1], [0, 0, 1, 1], [], []>, precision = #tpu.contract_precision<fp32>} : vector<8x5xf32>, vector<5x512xf32>, vector<8x512xf32> -> vector<8x512xf32>
    %133 = arith.addf %130, %132 : vector<8x512xf32>
    %134 = vector.extract_strided_slice %133 {offsets = [0, 0], sizes = [8, 5], strides = [1, 1]} : vector<8x512xf32> to vector<8x5xf32>
    %135 = arith.negf %134 : vector<8x5xf32>
    %136 = math.exp %135 : vector<8x5xf32>
    %cst_37 = arith.constant 1.000000e+00 : f32
    %137 = vector.broadcast %cst_37 : f32 to vector<8x5xf32>
    %138 = arith.addf %137, %136 : vector<8x5xf32>
    %139 = arith.divf %137, %138 : vector<8x5xf32>
    %140 = vector.extract_strided_slice %133 {offsets = [0, 128], sizes = [8, 5], strides = [1, 1]} : vector<8x512xf32> to vector<8x5xf32>
    %141 = arith.negf %140 : vector<8x5xf32>
    %142 = math.exp %141 : vector<8x5xf32>
    %cst_38 = arith.constant 1.000000e+00 : f32
    %143 = vector.broadcast %cst_38 : f32 to vector<8x5xf32>
    %144 = arith.addf %143, %142 : vector<8x5xf32>
    %145 = arith.divf %143, %144 : vector<8x5xf32>
    %146 = vector.extract_strided_slice %133 {offsets = [0, 256], sizes = [8, 5], strides = [1, 1]} : vector<8x512xf32> to vector<8x5xf32>
    %147 = math.tanh %146 : vector<8x5xf32>
    %148 = vector.extract_strided_slice %133 {offsets = [0, 384], sizes = [8, 5], strides = [1, 1]} : vector<8x512xf32> to vector<8x5xf32>
    %149 = arith.negf %148 : vector<8x5xf32>
    %150 = math.exp %149 : vector<8x5xf32>
    %cst_39 = arith.constant 1.000000e+00 : f32
    %151 = vector.broadcast %cst_39 : f32 to vector<8x5xf32>
    %152 = arith.addf %151, %150 : vector<8x5xf32>
    %153 = arith.divf %151, %152 : vector<8x5xf32>
    %154 = arith.mulf %145, %100 : vector<8x5xf32>
    %155 = arith.mulf %139, %147 : vector<8x5xf32>
    %156 = arith.addf %154, %155 : vector<8x5xf32>
    %157 = math.tanh %156 : vector<8x5xf32>
    %158 = arith.mulf %153, %157 : vector<8x5xf32>
    %cst_40 = arith.constant dense<0.000000e+00> : vector<8x512xf32>
    %159 = tpu.matmul %129, %13, %cst_40 {dimension_numbers = #tpu.dot_dimension_numbers<[1], [0], [0], [1], [0, 0, 1, 1], [], []>, precision = #tpu.contract_precision<fp32>} : vector<8x5xf32>, vector<5x512xf32>, vector<8x512xf32> -> vector<8x512xf32>
    %160 = arith.addf %131, %159 : vector<8x512xf32>
    %161 = vector.extract_strided_slice %160 {offsets = [0, 0], sizes = [8, 5], strides = [1, 1]} : vector<8x512xf32> to vector<8x5xf32>
    %162 = arith.negf %161 : vector<8x5xf32>
    %163 = math.exp %162 : vector<8x5xf32>
    %cst_41 = arith.constant 1.000000e+00 : f32
    %164 = vector.broadcast %cst_41 : f32 to vector<8x5xf32>
    %165 = arith.addf %164, %163 : vector<8x5xf32>
    %166 = arith.divf %164, %165 : vector<8x5xf32>
    %167 = vector.extract_strided_slice %160 {offsets = [0, 128], sizes = [8, 5], strides = [1, 1]} : vector<8x512xf32> to vector<8x5xf32>
    %168 = arith.negf %167 : vector<8x5xf32>
    %169 = math.exp %168 : vector<8x5xf32>
    %cst_42 = arith.constant 1.000000e+00 : f32
    %170 = vector.broadcast %cst_42 : f32 to vector<8x5xf32>
    %171 = arith.addf %170, %169 : vector<8x5xf32>
    %172 = arith.divf %170, %171 : vector<8x5xf32>
    %173 = vector.extract_strided_slice %160 {offsets = [0, 256], sizes = [8, 5], strides = [1, 1]} : vector<8x512xf32> to vector<8x5xf32>
    %174 = math.tanh %173 : vector<8x5xf32>
    %175 = vector.extract_strided_slice %160 {offsets = [0, 384], sizes = [8, 5], strides = [1, 1]} : vector<8x512xf32> to vector<8x5xf32>
    %176 = arith.negf %175 : vector<8x5xf32>
    %177 = math.exp %176 : vector<8x5xf32>
    %cst_43 = arith.constant 1.000000e+00 : f32
    %178 = vector.broadcast %cst_43 : f32 to vector<8x5xf32>
    %179 = arith.addf %178, %177 : vector<8x5xf32>
    %180 = arith.divf %178, %179 : vector<8x5xf32>
    %181 = arith.mulf %172, %127 : vector<8x5xf32>
    %182 = arith.mulf %166, %174 : vector<8x5xf32>
    %183 = arith.addf %181, %182 : vector<8x5xf32>
    %184 = math.tanh %183 : vector<8x5xf32>
    %185 = arith.mulf %180, %184 : vector<8x5xf32>
    %c24_44 = arith.constant 24 : index
    %c0_45 = arith.constant 0 : index
    %186 = vector.load %arg3[%c24_44, %c0_45] : memref<64x1024xf32, #tpu.memory_space<vmem>>, vector<8x512xf32>
    %c32 = arith.constant 32 : index
    %c512_46 = arith.constant 512 : index
    %187 = vector.load %arg3[%c32, %c512_46] : memref<64x1024xf32, #tpu.memory_space<vmem>>, vector<8x512xf32>
    %cst_47 = arith.constant dense<0.000000e+00> : vector<8x512xf32>
    %188 = tpu.matmul %158, %12, %cst_47 {dimension_numbers = #tpu.dot_dimension_numbers<[1], [0], [0], [1], [0, 0, 1, 1], [], []>, precision = #tpu.contract_precision<fp32>} : vector<8x5xf32>, vector<5x512xf32>, vector<8x512xf32> -> vector<8x512xf32>
    %189 = arith.addf %186, %188 : vector<8x512xf32>
    %190 = vector.extract_strided_slice %189 {offsets = [0, 0], sizes = [8, 5], strides = [1, 1]} : vector<8x512xf32> to vector<8x5xf32>
    %191 = arith.negf %190 : vector<8x5xf32>
    %192 = math.exp %191 : vector<8x5xf32>
    %cst_48 = arith.constant 1.000000e+00 : f32
    %193 = vector.broadcast %cst_48 : f32 to vector<8x5xf32>
    %194 = arith.addf %193, %192 : vector<8x5xf32>
    %195 = arith.divf %193, %194 : vector<8x5xf32>
    %196 = vector.extract_strided_slice %189 {offsets = [0, 128], sizes = [8, 5], strides = [1, 1]} : vector<8x512xf32> to vector<8x5xf32>
    %197 = arith.negf %196 : vector<8x5xf32>
    %198 = math.exp %197 : vector<8x5xf32>
    %cst_49 = arith.constant 1.000000e+00 : f32
    %199 = vector.broadcast %cst_49 : f32 to vector<8x5xf32>
    %200 = arith.addf %199, %198 : vector<8x5xf32>
    %201 = arith.divf %199, %200 : vector<8x5xf32>
    %202 = vector.extract_strided_slice %189 {offsets = [0, 256], sizes = [8, 5], strides = [1, 1]} : vector<8x512xf32> to vector<8x5xf32>
    %203 = math.tanh %202 : vector<8x5xf32>
    %204 = vector.extract_strided_slice %189 {offsets = [0, 384], sizes = [8, 5], strides = [1, 1]} : vector<8x512xf32> to vector<8x5xf32>
    %205 = arith.negf %204 : vector<8x5xf32>
    %206 = math.exp %205 : vector<8x5xf32>
    %cst_50 = arith.constant 1.000000e+00 : f32
    %207 = vector.broadcast %cst_50 : f32 to vector<8x5xf32>
    %208 = arith.addf %207, %206 : vector<8x5xf32>
    %209 = arith.divf %207, %208 : vector<8x5xf32>
    %210 = arith.mulf %201, %156 : vector<8x5xf32>
    %211 = arith.mulf %195, %203 : vector<8x5xf32>
    %212 = arith.addf %210, %211 : vector<8x5xf32>
    %213 = math.tanh %212 : vector<8x5xf32>
    %214 = arith.mulf %209, %213 : vector<8x5xf32>
    %cst_51 = arith.constant dense<0.000000e+00> : vector<8x512xf32>
    %215 = tpu.matmul %185, %13, %cst_51 {dimension_numbers = #tpu.dot_dimension_numbers<[1], [0], [0], [1], [0, 0, 1, 1], [], []>, precision = #tpu.contract_precision<fp32>} : vector<8x5xf32>, vector<5x512xf32>, vector<8x512xf32> -> vector<8x512xf32>
    %216 = arith.addf %187, %215 : vector<8x512xf32>
    %217 = vector.extract_strided_slice %216 {offsets = [0, 0], sizes = [8, 5], strides = [1, 1]} : vector<8x512xf32> to vector<8x5xf32>
    %218 = arith.negf %217 : vector<8x5xf32>
    %219 = math.exp %218 : vector<8x5xf32>
    %cst_52 = arith.constant 1.000000e+00 : f32
    %220 = vector.broadcast %cst_52 : f32 to vector<8x5xf32>
    %221 = arith.addf %220, %219 : vector<8x5xf32>
    %222 = arith.divf %220, %221 : vector<8x5xf32>
    %223 = vector.extract_strided_slice %216 {offsets = [0, 128], sizes = [8, 5], strides = [1, 1]} : vector<8x512xf32> to vector<8x5xf32>
    %224 = arith.negf %223 : vector<8x5xf32>
    %225 = math.exp %224 : vector<8x5xf32>
    %cst_53 = arith.constant 1.000000e+00 : f32
    %226 = vector.broadcast %cst_53 : f32 to vector<8x5xf32>
    %227 = arith.addf %226, %225 : vector<8x5xf32>
    %228 = arith.divf %226, %227 : vector<8x5xf32>
    %229 = vector.extract_strided_slice %216 {offsets = [0, 256], sizes = [8, 5], strides = [1, 1]} : vector<8x512xf32> to vector<8x5xf32>
    %230 = math.tanh %229 : vector<8x5xf32>
    %231 = vector.extract_strided_slice %216 {offsets = [0, 384], sizes = [8, 5], strides = [1, 1]} : vector<8x512xf32> to vector<8x5xf32>
    %232 = arith.negf %231 : vector<8x5xf32>
    %233 = math.exp %232 : vector<8x5xf32>
    %cst_54 = arith.constant 1.000000e+00 : f32
    %234 = vector.broadcast %cst_54 : f32 to vector<8x5xf32>
    %235 = arith.addf %234, %233 : vector<8x5xf32>
    %236 = arith.divf %234, %235 : vector<8x5xf32>
    %237 = arith.mulf %228, %183 : vector<8x5xf32>
    %238 = arith.mulf %222, %230 : vector<8x5xf32>
    %239 = arith.addf %237, %238 : vector<8x5xf32>
    %240 = math.tanh %239 : vector<8x5xf32>
    %241 = arith.mulf %236, %240 : vector<8x5xf32>
    %c32_55 = arith.constant 32 : index
    %c0_56 = arith.constant 0 : index
    %242 = vector.load %arg3[%c32_55, %c0_56] : memref<64x1024xf32, #tpu.memory_space<vmem>>, vector<8x512xf32>
    %c24_57 = arith.constant 24 : index
    %c512_58 = arith.constant 512 : index
    %243 = vector.load %arg3[%c24_57, %c512_58] : memref<64x1024xf32, #tpu.memory_space<vmem>>, vector<8x512xf32>
    %cst_59 = arith.constant dense<0.000000e+00> : vector<8x512xf32>
    %244 = tpu.matmul %214, %12, %cst_59 {dimension_numbers = #tpu.dot_dimension_numbers<[1], [0], [0], [1], [0, 0, 1, 1], [], []>, precision = #tpu.contract_precision<fp32>} : vector<8x5xf32>, vector<5x512xf32>, vector<8x512xf32> -> vector<8x512xf32>
    %245 = arith.addf %242, %244 : vector<8x512xf32>
    %246 = vector.extract_strided_slice %245 {offsets = [0, 0], sizes = [8, 5], strides = [1, 1]} : vector<8x512xf32> to vector<8x5xf32>
    %247 = arith.negf %246 : vector<8x5xf32>
    %248 = math.exp %247 : vector<8x5xf32>
    %cst_60 = arith.constant 1.000000e+00 : f32
    %249 = vector.broadcast %cst_60 : f32 to vector<8x5xf32>
    %250 = arith.addf %249, %248 : vector<8x5xf32>
    %251 = arith.divf %249, %250 : vector<8x5xf32>
    %252 = vector.extract_strided_slice %245 {offsets = [0, 128], sizes = [8, 5], strides = [1, 1]} : vector<8x512xf32> to vector<8x5xf32>
    %253 = arith.negf %252 : vector<8x5xf32>
    %254 = math.exp %253 : vector<8x5xf32>
    %cst_61 = arith.constant 1.000000e+00 : f32
    %255 = vector.broadcast %cst_61 : f32 to vector<8x5xf32>
    %256 = arith.addf %255, %254 : vector<8x5xf32>
    %257 = arith.divf %255, %256 : vector<8x5xf32>
    %258 = vector.extract_strided_slice %245 {offsets = [0, 256], sizes = [8, 5], strides = [1, 1]} : vector<8x512xf32> to vector<8x5xf32>
    %259 = math.tanh %258 : vector<8x5xf32>
    %260 = vector.extract_strided_slice %245 {offsets = [0, 384], sizes = [8, 5], strides = [1, 1]} : vector<8x512xf32> to vector<8x5xf32>
    %261 = arith.negf %260 : vector<8x5xf32>
    %262 = math.exp %261 : vector<8x5xf32>
    %cst_62 = arith.constant 1.000000e+00 : f32
    %263 = vector.broadcast %cst_62 : f32 to vector<8x5xf32>
    %264 = arith.addf %263, %262 : vector<8x5xf32>
    %265 = arith.divf %263, %264 : vector<8x5xf32>
    %266 = arith.mulf %257, %212 : vector<8x5xf32>
    %267 = arith.mulf %251, %259 : vector<8x5xf32>
    %268 = arith.addf %266, %267 : vector<8x5xf32>
    %269 = math.tanh %268 : vector<8x5xf32>
    %270 = arith.mulf %265, %269 : vector<8x5xf32>
    %cst_63 = arith.constant dense<0.000000e+00> : vector<8x512xf32>
    %271 = tpu.matmul %241, %13, %cst_63 {dimension_numbers = #tpu.dot_dimension_numbers<[1], [0], [0], [1], [0, 0, 1, 1], [], []>, precision = #tpu.contract_precision<fp32>} : vector<8x5xf32>, vector<5x512xf32>, vector<8x512xf32> -> vector<8x512xf32>
    %272 = arith.addf %243, %271 : vector<8x512xf32>
    %273 = vector.extract_strided_slice %272 {offsets = [0, 0], sizes = [8, 5], strides = [1, 1]} : vector<8x512xf32> to vector<8x5xf32>
    %274 = arith.negf %273 : vector<8x5xf32>
    %275 = math.exp %274 : vector<8x5xf32>
    %cst_64 = arith.constant 1.000000e+00 : f32
    %276 = vector.broadcast %cst_64 : f32 to vector<8x5xf32>
    %277 = arith.addf %276, %275 : vector<8x5xf32>
    %278 = arith.divf %276, %277 : vector<8x5xf32>
    %279 = vector.extract_strided_slice %272 {offsets = [0, 128], sizes = [8, 5], strides = [1, 1]} : vector<8x512xf32> to vector<8x5xf32>
    %280 = arith.negf %279 : vector<8x5xf32>
    %281 = math.exp %280 : vector<8x5xf32>
    %cst_65 = arith.constant 1.000000e+00 : f32
    %282 = vector.broadcast %cst_65 : f32 to vector<8x5xf32>
    %283 = arith.addf %282, %281 : vector<8x5xf32>
    %284 = arith.divf %282, %283 : vector<8x5xf32>
    %285 = vector.extract_strided_slice %272 {offsets = [0, 256], sizes = [8, 5], strides = [1, 1]} : vector<8x512xf32> to vector<8x5xf32>
    %286 = math.tanh %285 : vector<8x5xf32>
    %287 = vector.extract_strided_slice %272 {offsets = [0, 384], sizes = [8, 5], strides = [1, 1]} : vector<8x512xf32> to vector<8x5xf32>
    %288 = arith.negf %287 : vector<8x5xf32>
    %289 = math.exp %288 : vector<8x5xf32>
    %cst_66 = arith.constant 1.000000e+00 : f32
    %290 = vector.broadcast %cst_66 : f32 to vector<8x5xf32>
    %291 = arith.addf %290, %289 : vector<8x5xf32>
    %292 = arith.divf %290, %291 : vector<8x5xf32>
    %293 = arith.mulf %284, %239 : vector<8x5xf32>
    %294 = arith.mulf %278, %286 : vector<8x5xf32>
    %295 = arith.addf %293, %294 : vector<8x5xf32>
    %296 = math.tanh %295 : vector<8x5xf32>
    %297 = arith.mulf %292, %296 : vector<8x5xf32>
    %c40_67 = arith.constant 40 : index
    %c0_68 = arith.constant 0 : index
    %298 = vector.load %arg3[%c40_67, %c0_68] : memref<64x1024xf32, #tpu.memory_space<vmem>>, vector<8x512xf32>
    %c16_69 = arith.constant 16 : index
    %c512_70 = arith.constant 512 : index
    %299 = vector.load %arg3[%c16_69, %c512_70] : memref<64x1024xf32, #tpu.memory_space<vmem>>, vector<8x512xf32>
    %cst_71 = arith.constant dense<0.000000e+00> : vector<8x512xf32>
    %300 = tpu.matmul %270, %12, %cst_71 {dimension_numbers = #tpu.dot_dimension_numbers<[1], [0], [0], [1], [0, 0, 1, 1], [], []>, precision = #tpu.contract_precision<fp32>} : vector<8x5xf32>, vector<5x512xf32>, vector<8x512xf32> -> vector<8x512xf32>
    %301 = arith.addf %298, %300 : vector<8x512xf32>
    %302 = vector.extract_strided_slice %301 {offsets = [0, 0], sizes = [8, 5], strides = [1, 1]} : vector<8x512xf32> to vector<8x5xf32>
    %303 = arith.negf %302 : vector<8x5xf32>
    %304 = math.exp %303 : vector<8x5xf32>
    %cst_72 = arith.constant 1.000000e+00 : f32
    %305 = vector.broadcast %cst_72 : f32 to vector<8x5xf32>
    %306 = arith.addf %305, %304 : vector<8x5xf32>
    %307 = arith.divf %305, %306 : vector<8x5xf32>
    %308 = vector.extract_strided_slice %301 {offsets = [0, 128], sizes = [8, 5], strides = [1, 1]} : vector<8x512xf32> to vector<8x5xf32>
    %309 = arith.negf %308 : vector<8x5xf32>
    %310 = math.exp %309 : vector<8x5xf32>
    %cst_73 = arith.constant 1.000000e+00 : f32
    %311 = vector.broadcast %cst_73 : f32 to vector<8x5xf32>
    %312 = arith.addf %311, %310 : vector<8x5xf32>
    %313 = arith.divf %311, %312 : vector<8x5xf32>
    %314 = vector.extract_strided_slice %301 {offsets = [0, 256], sizes = [8, 5], strides = [1, 1]} : vector<8x512xf32> to vector<8x5xf32>
    %315 = math.tanh %314 : vector<8x5xf32>
    %316 = vector.extract_strided_slice %301 {offsets = [0, 384], sizes = [8, 5], strides = [1, 1]} : vector<8x512xf32> to vector<8x5xf32>
    %317 = arith.negf %316 : vector<8x5xf32>
    %318 = math.exp %317 : vector<8x5xf32>
    %cst_74 = arith.constant 1.000000e+00 : f32
    %319 = vector.broadcast %cst_74 : f32 to vector<8x5xf32>
    %320 = arith.addf %319, %318 : vector<8x5xf32>
    %321 = arith.divf %319, %320 : vector<8x5xf32>
    %322 = arith.mulf %313, %268 : vector<8x5xf32>
    %323 = arith.mulf %307, %315 : vector<8x5xf32>
    %324 = arith.addf %322, %323 : vector<8x5xf32>
    %325 = math.tanh %324 : vector<8x5xf32>
    %326 = arith.mulf %321, %325 : vector<8x5xf32>
    %cst_75 = arith.constant dense<0.000000e+00> : vector<8x512xf32>
    %327 = tpu.matmul %297, %13, %cst_75 {dimension_numbers = #tpu.dot_dimension_numbers<[1], [0], [0], [1], [0, 0, 1, 1], [], []>, precision = #tpu.contract_precision<fp32>} : vector<8x5xf32>, vector<5x512xf32>, vector<8x512xf32> -> vector<8x512xf32>
    %328 = arith.addf %299, %327 : vector<8x512xf32>
    %329 = vector.extract_strided_slice %328 {offsets = [0, 0], sizes = [8, 5], strides = [1, 1]} : vector<8x512xf32> to vector<8x5xf32>
    %330 = arith.negf %329 : vector<8x5xf32>
    %331 = math.exp %330 : vector<8x5xf32>
    %cst_76 = arith.constant 1.000000e+00 : f32
    %332 = vector.broadcast %cst_76 : f32 to vector<8x5xf32>
    %333 = arith.addf %332, %331 : vector<8x5xf32>
    %334 = arith.divf %332, %333 : vector<8x5xf32>
    %335 = vector.extract_strided_slice %328 {offsets = [0, 128], sizes = [8, 5], strides = [1, 1]} : vector<8x512xf32> to vector<8x5xf32>
    %336 = arith.negf %335 : vector<8x5xf32>
    %337 = math.exp %336 : vector<8x5xf32>
    %cst_77 = arith.constant 1.000000e+00 : f32
    %338 = vector.broadcast %cst_77 : f32 to vector<8x5xf32>
    %339 = arith.addf %338, %337 : vector<8x5xf32>
    %340 = arith.divf %338, %339 : vector<8x5xf32>
    %341 = vector.extract_strided_slice %328 {offsets = [0, 256], sizes = [8, 5], strides = [1, 1]} : vector<8x512xf32> to vector<8x5xf32>
    %342 = math.tanh %341 : vector<8x5xf32>
    %343 = vector.extract_strided_slice %328 {offsets = [0, 384], sizes = [8, 5], strides = [1, 1]} : vector<8x512xf32> to vector<8x5xf32>
    %344 = arith.negf %343 : vector<8x5xf32>
    %345 = math.exp %344 : vector<8x5xf32>
    %cst_78 = arith.constant 1.000000e+00 : f32
    %346 = vector.broadcast %cst_78 : f32 to vector<8x5xf32>
    %347 = arith.addf %346, %345 : vector<8x5xf32>
    %348 = arith.divf %346, %347 : vector<8x5xf32>
    %349 = arith.mulf %340, %295 : vector<8x5xf32>
    %350 = arith.mulf %334, %342 : vector<8x5xf32>
    %351 = arith.addf %349, %350 : vector<8x5xf32>
    %352 = math.tanh %351 : vector<8x5xf32>
    %353 = arith.mulf %348, %352 : vector<8x5xf32>
    %c48_79 = arith.constant 48 : index
    %c0_80 = arith.constant 0 : index
    %354 = vector.load %arg3[%c48_79, %c0_80] : memref<64x1024xf32, #tpu.memory_space<vmem>>, vector<8x512xf32>
    %c8_81 = arith.constant 8 : index
    %c512_82 = arith.constant 512 : index
    %355 = vector.load %arg3[%c8_81, %c512_82] : memref<64x1024xf32, #tpu.memory_space<vmem>>, vector<8x512xf32>
    %cst_83 = arith.constant dense<0.000000e+00> : vector<8x512xf32>
    %356 = tpu.matmul %326, %12, %cst_83 {dimension_numbers = #tpu.dot_dimension_numbers<[1], [0], [0], [1], [0, 0, 1, 1], [], []>, precision = #tpu.contract_precision<fp32>} : vector<8x5xf32>, vector<5x512xf32>, vector<8x512xf32> -> vector<8x512xf32>
    %357 = arith.addf %354, %356 : vector<8x512xf32>
    %358 = vector.extract_strided_slice %357 {offsets = [0, 0], sizes = [8, 5], strides = [1, 1]} : vector<8x512xf32> to vector<8x5xf32>
    %359 = arith.negf %358 : vector<8x5xf32>
    %360 = math.exp %359 : vector<8x5xf32>
    %cst_84 = arith.constant 1.000000e+00 : f32
    %361 = vector.broadcast %cst_84 : f32 to vector<8x5xf32>
    %362 = arith.addf %361, %360 : vector<8x5xf32>
    %363 = arith.divf %361, %362 : vector<8x5xf32>
    %364 = vector.extract_strided_slice %357 {offsets = [0, 128], sizes = [8, 5], strides = [1, 1]} : vector<8x512xf32> to vector<8x5xf32>
    %365 = arith.negf %364 : vector<8x5xf32>
    %366 = math.exp %365 : vector<8x5xf32>
    %cst_85 = arith.constant 1.000000e+00 : f32
    %367 = vector.broadcast %cst_85 : f32 to vector<8x5xf32>
    %368 = arith.addf %367, %366 : vector<8x5xf32>
    %369 = arith.divf %367, %368 : vector<8x5xf32>
    %370 = vector.extract_strided_slice %357 {offsets = [0, 256], sizes = [8, 5], strides = [1, 1]} : vector<8x512xf32> to vector<8x5xf32>
    %371 = math.tanh %370 : vector<8x5xf32>
    %372 = vector.extract_strided_slice %357 {offsets = [0, 384], sizes = [8, 5], strides = [1, 1]} : vector<8x512xf32> to vector<8x5xf32>
    %373 = arith.negf %372 : vector<8x5xf32>
    %374 = math.exp %373 : vector<8x5xf32>
    %cst_86 = arith.constant 1.000000e+00 : f32
    %375 = vector.broadcast %cst_86 : f32 to vector<8x5xf32>
    %376 = arith.addf %375, %374 : vector<8x5xf32>
    %377 = arith.divf %375, %376 : vector<8x5xf32>
    %378 = arith.mulf %369, %324 : vector<8x5xf32>
    %379 = arith.mulf %363, %371 : vector<8x5xf32>
    %380 = arith.addf %378, %379 : vector<8x5xf32>
    %381 = math.tanh %380 : vector<8x5xf32>
    %382 = arith.mulf %377, %381 : vector<8x5xf32>
    %cst_87 = arith.constant dense<0.000000e+00> : vector<8x512xf32>
    %383 = tpu.matmul %353, %13, %cst_87 {dimension_numbers = #tpu.dot_dimension_numbers<[1], [0], [0], [1], [0, 0, 1, 1], [], []>, precision = #tpu.contract_precision<fp32>} : vector<8x5xf32>, vector<5x512xf32>, vector<8x512xf32> -> vector<8x512xf32>
    %384 = arith.addf %355, %383 : vector<8x512xf32>
    %385 = vector.extract_strided_slice %384 {offsets = [0, 0], sizes = [8, 5], strides = [1, 1]} : vector<8x512xf32> to vector<8x5xf32>
    %386 = arith.negf %385 : vector<8x5xf32>
    %387 = math.exp %386 : vector<8x5xf32>
    %cst_88 = arith.constant 1.000000e+00 : f32
    %388 = vector.broadcast %cst_88 : f32 to vector<8x5xf32>
    %389 = arith.addf %388, %387 : vector<8x5xf32>
    %390 = arith.divf %388, %389 : vector<8x5xf32>
    %391 = vector.extract_strided_slice %384 {offsets = [0, 128], sizes = [8, 5], strides = [1, 1]} : vector<8x512xf32> to vector<8x5xf32>
    %392 = arith.negf %391 : vector<8x5xf32>
    %393 = math.exp %392 : vector<8x5xf32>
    %cst_89 = arith.constant 1.000000e+00 : f32
    %394 = vector.broadcast %cst_89 : f32 to vector<8x5xf32>
    %395 = arith.addf %394, %393 : vector<8x5xf32>
    %396 = arith.divf %394, %395 : vector<8x5xf32>
    %397 = vector.extract_strided_slice %384 {offsets = [0, 256], sizes = [8, 5], strides = [1, 1]} : vector<8x512xf32> to vector<8x5xf32>
    %398 = math.tanh %397 : vector<8x5xf32>
    %399 = vector.extract_strided_slice %384 {offsets = [0, 384], sizes = [8, 5], strides = [1, 1]} : vector<8x512xf32> to vector<8x5xf32>
    %400 = arith.negf %399 : vector<8x5xf32>
    %401 = math.exp %400 : vector<8x5xf32>
    %cst_90 = arith.constant 1.000000e+00 : f32
    %402 = vector.broadcast %cst_90 : f32 to vector<8x5xf32>
    %403 = arith.addf %402, %401 : vector<8x5xf32>
    %404 = arith.divf %402, %403 : vector<8x5xf32>
    %405 = arith.mulf %396, %351 : vector<8x5xf32>
    %406 = arith.mulf %390, %398 : vector<8x5xf32>
    %407 = arith.addf %405, %406 : vector<8x5xf32>
    %408 = math.tanh %407 : vector<8x5xf32>
    %409 = arith.mulf %404, %408 : vector<8x5xf32>
    %c56_91 = arith.constant 56 : index
    %c0_92 = arith.constant 0 : index
    %410 = vector.load %arg3[%c56_91, %c0_92] : memref<64x1024xf32, #tpu.memory_space<vmem>>, vector<8x512xf32>
    %c0_93 = arith.constant 0 : index
    %c512_94 = arith.constant 512 : index
    %411 = vector.load %arg3[%c0_93, %c512_94] : memref<64x1024xf32, #tpu.memory_space<vmem>>, vector<8x512xf32>
    %cst_95 = arith.constant dense<0.000000e+00> : vector<8x512xf32>
    %412 = tpu.matmul %382, %12, %cst_95 {dimension_numbers = #tpu.dot_dimension_numbers<[1], [0], [0], [1], [0, 0, 1, 1], [], []>, precision = #tpu.contract_precision<fp32>} : vector<8x5xf32>, vector<5x512xf32>, vector<8x512xf32> -> vector<8x512xf32>
    %413 = arith.addf %410, %412 : vector<8x512xf32>
    %414 = vector.extract_strided_slice %413 {offsets = [0, 0], sizes = [8, 5], strides = [1, 1]} : vector<8x512xf32> to vector<8x5xf32>
    %415 = arith.negf %414 : vector<8x5xf32>
    %416 = math.exp %415 : vector<8x5xf32>
    %cst_96 = arith.constant 1.000000e+00 : f32
    %417 = vector.broadcast %cst_96 : f32 to vector<8x5xf32>
    %418 = arith.addf %417, %416 : vector<8x5xf32>
    %419 = arith.divf %417, %418 : vector<8x5xf32>
    %420 = vector.extract_strided_slice %413 {offsets = [0, 128], sizes = [8, 5], strides = [1, 1]} : vector<8x512xf32> to vector<8x5xf32>
    %421 = arith.negf %420 : vector<8x5xf32>
    %422 = math.exp %421 : vector<8x5xf32>
    %cst_97 = arith.constant 1.000000e+00 : f32
    %423 = vector.broadcast %cst_97 : f32 to vector<8x5xf32>
    %424 = arith.addf %423, %422 : vector<8x5xf32>
    %425 = arith.divf %423, %424 : vector<8x5xf32>
    %426 = vector.extract_strided_slice %413 {offsets = [0, 256], sizes = [8, 5], strides = [1, 1]} : vector<8x512xf32> to vector<8x5xf32>
    %427 = math.tanh %426 : vector<8x5xf32>
    %428 = vector.extract_strided_slice %413 {offsets = [0, 384], sizes = [8, 5], strides = [1, 1]} : vector<8x512xf32> to vector<8x5xf32>
    %429 = arith.negf %428 : vector<8x5xf32>
    %430 = math.exp %429 : vector<8x5xf32>
    %cst_98 = arith.constant 1.000000e+00 : f32
    %431 = vector.broadcast %cst_98 : f32 to vector<8x5xf32>
    %432 = arith.addf %431, %430 : vector<8x5xf32>
    %433 = arith.divf %431, %432 : vector<8x5xf32>
    %434 = arith.mulf %425, %380 : vector<8x5xf32>
    %435 = arith.mulf %419, %427 : vector<8x5xf32>
    %436 = arith.addf %434, %435 : vector<8x5xf32>
    %437 = math.tanh %436 : vector<8x5xf32>
    %438 = arith.mulf %433, %437 : vector<8x5xf32>
    %cst_99 = arith.constant dense<0.000000e+00> : vector<8x512xf32>
    %439 = tpu.matmul %409, %13, %cst_99 {dimension_numbers = #tpu.dot_dimension_numbers<[1], [0], [0], [1], [0, 0, 1, 1], [], []>, precision = #tpu.contract_precision<fp32>} : vector<8x5xf32>, vector<5x512xf32>, vector<8x512xf32> -> vector<8x512xf32>
    %440 = arith.addf %411, %439 : vector<8x512xf32>
    %441 = vector.extract_strided_slice %440 {offsets = [0, 0], sizes = [8, 5], strides = [1, 1]} : vector<8x512xf32> to vector<8x5xf32>
    %442 = arith.negf %441 : vector<8x5xf32>
    %443 = math.exp %442 : vector<8x5xf32>
    %cst_100 = arith.constant 1.000000e+00 : f32
    %444 = vector.broadcast %cst_100 : f32 to vector<8x5xf32>
    %445 = arith.addf %444, %443 : vector<8x5xf32>
    %446 = arith.divf %444, %445 : vector<8x5xf32>
    %447 = vector.extract_strided_slice %440 {offsets = [0, 128], sizes = [8, 5], strides = [1, 1]} : vector<8x512xf32> to vector<8x5xf32>
    %448 = arith.negf %447 : vector<8x5xf32>
    %449 = math.exp %448 : vector<8x5xf32>
    %cst_101 = arith.constant 1.000000e+00 : f32
    %450 = vector.broadcast %cst_101 : f32 to vector<8x5xf32>
    %451 = arith.addf %450, %449 : vector<8x5xf32>
    %452 = arith.divf %450, %451 : vector<8x5xf32>
    %453 = vector.extract_strided_slice %440 {offsets = [0, 256], sizes = [8, 5], strides = [1, 1]} : vector<8x512xf32> to vector<8x5xf32>
    %454 = math.tanh %453 : vector<8x5xf32>
    %455 = vector.extract_strided_slice %440 {offsets = [0, 384], sizes = [8, 5], strides = [1, 1]} : vector<8x512xf32> to vector<8x5xf32>
    %456 = arith.negf %455 : vector<8x5xf32>
    %457 = math.exp %456 : vector<8x5xf32>
    %cst_102 = arith.constant 1.000000e+00 : f32
    %458 = vector.broadcast %cst_102 : f32 to vector<8x5xf32>
    %459 = arith.addf %458, %457 : vector<8x5xf32>
    %460 = arith.divf %458, %459 : vector<8x5xf32>
    %461 = arith.mulf %452, %407 : vector<8x5xf32>
    %462 = arith.mulf %446, %454 : vector<8x5xf32>
    %463 = arith.addf %461, %462 : vector<8x5xf32>
    %464 = math.tanh %463 : vector<8x5xf32>
    %465 = arith.mulf %460, %464 : vector<8x5xf32>
    %c32_103 = arith.constant 32 : index
    %c0_104 = arith.constant 0 : index
    %466 = vector.load %arg1[%c32_103, %c0_104] : memref<40x1024xf32, #tpu.memory_space<vmem>>, vector<5x2xf32>
    %cst_105 = arith.constant dense<0.000000e+00> : vector<8x2xf32>
    %467 = tpu.matmul %438, %466, %cst_105 {dimension_numbers = #tpu.dot_dimension_numbers<[1], [0], [0], [1], [0, 0, 1, 1], [], []>, precision = #tpu.contract_precision<fp32>} : vector<8x5xf32>, vector<5x2xf32>, vector<8x2xf32> -> vector<8x2xf32>
    %c32_106 = arith.constant 32 : index
    %c128 = arith.constant 128 : index
    %468 = vector.load %arg1[%c32_106, %c128] : memref<40x1024xf32, #tpu.memory_space<vmem>>, vector<5x2xf32>
    %cst_107 = arith.constant dense<0.000000e+00> : vector<8x2xf32>
    %469 = tpu.matmul %465, %468, %cst_107 {dimension_numbers = #tpu.dot_dimension_numbers<[1], [0], [0], [1], [0, 0, 1, 1], [], []>, precision = #tpu.contract_precision<fp32>} : vector<8x5xf32>, vector<5x2xf32>, vector<8x2xf32> -> vector<8x2xf32>
    %470 = arith.addf %467, %469 : vector<8x2xf32>
    %c17 = arith.constant 17 : index
    %c0_108 = arith.constant 0 : index
    %471 = vector.load %arg1[%c17, %c0_108] : memref<40x1024xf32, #tpu.memory_space<vmem>>, vector<1x2xf32>
    %472 = vector.broadcast %471 : vector<1x2xf32> to vector<8x2xf32>
    %473 = arith.addf %470, %472 : vector<8x2xf32>
    %c0_109 = arith.constant 0 : index
    %c0_110 = arith.constant 0 : index
    %474 = vector.load %arg2[%c0_109, %c0_110] : memref<8x2xf32, #tpu.memory_space<vmem>>, vector<8x2xf32>
    tpu.vector_store %arg2[%c0_109, %c0_110], %473 {strides = array<i32>} : memref<8x2xf32, #tpu.memory_space<vmem>>, vector<8x2xf32>,
    return
  }
}

</mosaic_0001>

<bundles_post_ra>
// kernel: tpu_custom_call.1
= control target key start
LH: loop header
LB: loop body
LE: loop exit
PB: predicated region body
PF: predicated region fallthrough
CT: control target
= control target key end

     0   :  { %7 = vsyncpa [#allocation4], 0  ;;  %s21343_s9 = smov [#allocation3]   ;;  %s23189_s0 = inlined_call_operand.vmem [shape: s32[64,1], index: 0, kind: input, shape index: {}]   ;;  %s23190_s1 = inlined_call_operand.hbm [shape: f32[40,1024], index: 1, kind: input, shape index: {}]   ;;  %s23191_s2 = inlined_call_operand.vmem [shape: f32[8,2], index: 2, kind: output, shape index: {}]  }
   0x1   :  { %s15_s10 = sshll.u32 %s21343_s9, 4  ;;  %s21319_s13 = scalar_lea.hbm %s23190_s1, 5120  ;;  %s16_s10 = int_to_ptr.vmem [resolvable:$true] %s15_s10 }
   0x2   :  { %p21320_p0 = scmp.ne.s32.totalorder %s23190_s1, %s21319_s13  ;;  %p21323_p1 = scmp.lt.u32.totalorder %s21319_s13, %s23190_s1 }
   0x4   :  { %p21325_p2 = pnand %p21323_p1, %p21320_p0 }
   0x6   :  { %21328 = shalt.err (!%p21325_p2)
}
   0x7   :  { %s21329_s18 = scalar_lea.vmem %s16_s10, 5120  ;;  %p21334_p4 = scmp.lt.s32.totalorder %s16_s10, %s16_s10 }
   0x8   :  { %p21330_p3 = scmp.ne.s32.totalorder %s16_s10, %s21329_s18  ;;  %p21335_p5 = scmp.lt.s32.totalorder %s21329_s18, %s21329_s18 }
   0xa   :  { %p21336_p6 = por %p21335_p5, %p21334_p4 }
   0xc   :  { %p21337_p7 = pnand %p21336_p6, %p21330_p3 }
   0xe   :  { %21340 = shalt.err (!%p21337_p7)
}
   0xf   :  { %s21344_s19 = smov 1024   ;;  %s21345_s20 = smov 64  }
  0x10   :  { %21 = dma.hbm_to_vmem [thread:$0]  %s23190_s1, 5120, %s16_s10, [#allocation4], %s21344_s19, %s21344_s19, %s21345_s20  }
  0x11   :  { %21341 = dma.done.wait [#allocation4], 5120  }
  0x12   :  { %21342 = vsyncadd [#allocation4], 4294962176  ;;  %v21346_v0 = vmov 0   ;;  %v21347_v1 = vmov 0.0   ;;  %v27_v2 = vld [vmem:[%s23189_s0 + $0x10] sm:$0xff]  ;;  %v25_v3 = vld [vmem:[%s23189_s0] sm:$0xff] }
  0x13   :  { %21062 = vset.pattern.permute.xlu1 %v21346_v0  ;;  %21061 = vset.pattern.permute.xlu0 %v21346_v0  ;;  %v28_v4 = vld [vmem:[%s23189_s0 + $0x18] sm:$0xff]  ;;  %v26_v5 = vld [vmem:[%s23189_s0 + $0x8] sm:$0xff]  ;;  %v83_v11 = vld [vmem:[#allocation3] sm:$0xff]  ;;  %vm144_vm0 = vcmask 130048   ;;  %vm3589_vm9 = vcmask 1044480   ;;  %vm3585_vm10 = vcmask 39936  }
  0x14   :  { %237 = vmatprep.mubr.f32.mxu0 %v21347_v1  ;;  %1071 = vmatprep.mubr.f32.mxu1 %v21347_v1  ;;  %v84_v6 = vld [vmem:[#allocation3 + $0x8] sm:$0xff]  ;;  %v86_v8 = vld [vmem:[#allocation3 + $0x18] sm:$0xff]  ;;  %v91_v12 = vld [vmem:[#allocation3 + $0x40] sm:$0xff]  ;;  %v171_v15 = vand.u32 4294901760, %v83_v11  ;;  %vm21348_vm11 = vmmov 0   ;;  %vm19948_vm12 = vcmask 15360  }
  0x15   :  { %42 = vperm.xlu1 %21062, %v27_v2   ;;  %36 = vperm.xlu0 %21061, %v25_v3   ;;  %v92_v7 = vld [vmem:[#allocation3 + $0x48] sm:$0xff]  ;;  %v169_v9 = vand.u32 4294901760, %v84_v6  ;;  %v94_v13 = vld [vmem:[#allocation3 + $0x58] sm:$0xff]  ;;  %v1003_v14 = vand.u32 4294901760, %v86_v8  ;;  %v175_v16 = vand.u32 4294901760, %v91_v12  ;;  %v85_v18 = vld [vmem:[#allocation3 + $0x10] sm:$0xff] }
  0x16   :  { %v173_v10 = vand.u32 4294901760, %v92_v7  ;;  %v1007_v17 = vand.u32 4294901760, %v94_v13  ;;  %v93_v19 = vld [vmem:[#allocation3 + $0x50] sm:$0xff]  ;;  %v30_v20 = vld [vmem:[%s23189_s0 + $0x28] sm:$0xff]  ;;  %v29_v21 = vld [vmem:[%s23189_s0 + $0x20] sm:$0xff]  ;;  %v21404_v26 = vsub.f32 %v83_v11, %v171_v15  ;;  %v1005_v29 = vand.u32 4294901760, %v85_v18 }
  0x17   :  { %v21398_v23 = vsub.f32 %v84_v6, %v169_v9  ;;  %v21402_v25 = vpack.c.bf16 %v175_v16, %v171_v15  ;;  %v21406_v27 = vsub.f32 %v91_v12, %v175_v16  ;;  %v1009_v30 = vand.u32 4294901760, %v93_v19  ;;  %v32_v31 = vld [vmem:[%s23189_s0 + $0x38] sm:$0xff]  ;;  %v31_v32 = vld [vmem:[%s23189_s0 + $0x30] sm:$0xff] }
  0x18   :  { %v21396_v22 = vpack.c.bf16 %v173_v10, %v169_v9  ;;  %v21400_v24 = vsub.f32 %v92_v7, %v173_v10  ;;  %v21408_v28 = vpack.c.bf16 %v1007_v17, %v1003_v14  ;;  %v21421_v34 = vsub.f32 %v85_v18, %v1005_v29 }
  0x19   :  { %45 = vperm.xlu1 %21062, %v28_v4   ;;  %39 = vperm.xlu0 %21061, %v26_v5   ;;  %v21419_v33 = vpack.c.bf16 %v1009_v30, %v1005_v29  ;;  %v21423_v35 = vsub.f32 %v93_v19, %v1009_v30  ;;  %v328_v36 = vand.u32 4294901760, %v21398_v23  ;;  %v334_v41 = vand.u32 4294901760, %v21404_v26 }
  0x1a   :  { %20192 = vmatprep.subr.bf16.mxu0 %v21396_v22  ;;  %20216 = vmatprep.subr.bf16.mxu1 %v21408_v28  ;;  %v340_v37 = vand.u32 4294901760, %v21400_v24  ;;  %v346_v42 = vand.u32 4294901760, %v21406_v27  ;;  %v21442_v49 = vsub.f32 %v86_v8, %v1003_v14  ;;  %v21444_v50 = vsub.f32 %v94_v13, %v1007_v17 }
  0x1b   :  { %20194 = vmatpush1.bf16.msra.mxu0 %v21402_v25  ;;  %20218 = vmatpush1.bf16.msra.mxu1 %v21419_v33  ;;  %v329_v38 = vsub.f32 %v21398_v23, %v328_v36  ;;  %v335_v44 = vsub.f32 %v21404_v26, %v334_v41  ;;  %v1168_v54 = vand.u32 4294901760, %v21421_v34  ;;  %v1180_v55 = vand.u32 4294901760, %v21423_v35 }
  0x1c   :  { %v341_v39 = vsub.f32 %v21400_v24, %v340_v37  ;;  %v347_v45 = vsub.f32 %v21406_v27, %v346_v42  ;;  %v1162_v52 = vand.u32 4294901760, %v21442_v49  ;;  %v1174_v53 = vand.u32 4294901760, %v21444_v50 }
  0x1d   :  { %51 = vperm.xlu1 %21062, %v30_v20   ;;  %48 = vperm.xlu0 %21061, %v29_v21   ;;  %v330_v40 = vand.u32 4294901760, %v329_v38  ;;  %v336_v47 = vand.u32 4294901760, %v335_v44  ;;  %v1169_v58 = vsub.f32 %v21421_v34, %v1168_v54  ;;  %v1181_v59 = vsub.f32 %v21423_v35, %v1180_v55 }
  0x1e   :  { %v342_v43 = vand.u32 4294901760, %v341_v39  ;;  %v348_v48 = vand.u32 4294901760, %v347_v45  ;;  %v1163_v56 = vsub.f32 %v21442_v49, %v1162_v52  ;;  %v1175_v57 = vsub.f32 %v21444_v50, %v1174_v53 }
  0x1f   :  { %v1170_v62 = vand.u32 4294901760, %v1169_v58  ;;  %v1182_v63 = vand.u32 4294901760, %v1181_v59  ;;  %v20199_v3 = vpack.c.bf16 %v21400_v24, %v21398_v23  ;;  %v20201_v4 = vpack.c.bf16 %v21406_v27, %v21404_v26  ;;  %v96_v26 = vld [vmem:[#allocation3 + $0x68] sm:$0xff]  ;;  %v90_v27 = vld [vmem:[#allocation3 + $0x38] sm:$0xff] }
  0x20   :  { %v20195_v46 = vpack.c.bf16 %v342_v43, %v330_v40  ;;  %v20197_v51 = vpack.c.bf16 %v348_v48, %v336_v47  ;;  %v1164_v60 = vand.u32 4294901760, %v1163_v56  ;;  %v1176_v61 = vand.u32 4294901760, %v1175_v57 }
  0x21   :  { %57 = vperm.xlu1 %21062, %v32_v31   ;;  %54 = vperm.xlu0 %21061, %v31_v32   ;;  %v20221_v2 = vpack.c.bf16 %v1182_v63, %v1170_v62  ;;  %v20223_v5 = vpack.c.bf16 %v21444_v50, %v21442_v49  ;;  %v20225_v6 = vpack.c.bf16 %v21423_v35, %v21421_v34  ;;  %v23192_v7 = vlaneseq }
  0x22   :  { %20196 = vmatprep.subr.bf16.mxu0 %v20195_v46  ;;  %v20219_v0 = vpack.c.bf16 %v1176_v61, %v1164_v60  ;;  %v20209_v23 = vpack.c.bf16 %v346_v42, %v334_v41  ;;  %v20233_v24 = vpack.c.bf16 %v1180_v55, %v1168_v54  ;;  %v1841_v35 = vand.u32 4294901760, %v96_v26 }
  0x23   :  { %v21471_v8 = vand.u32 127, %v23192_v7 }
  0x24   :  { %20220 = vmatprep.subr.bf16.mxu1 %v20219_v0 }
  0x94   :  { %v43_v9 = vpop.permute.xlu1 %42  ;;  %v37_v10 = vpop.permute.xlu0 %36 }
  0x95   :  { %vm61_vm1 = vcmp.eq.s32.totalorder %v21471_v8, %v43_v9  ;;  %vm59_vm2 = vcmp.eq.s32.totalorder %v21471_v8, %v37_v10 }
  0x96   :  { %v21476_v11 = vsel %vm61_vm1, 1.0, %v21347_v1  ;;  %v21479_v12 = vsel %vm59_vm2, 1.0, %v21347_v1 }
  0x97   :  { %v146_v13 = vsel %vm144_vm0, %v21479_v12, 0  ;;  %v152_v14 = vsel %vm144_vm0, %v21476_v11, 0 }
  0x98   :  { %v46_v15 = vpop.permute.xlu1 %45  ;;  %v40_v16 = vpop.permute.xlu0 %39  ;;  %v21485_v17 = vsub.f32 %v146_v13, %v146_v13  ;;  %v21489_v18 = vsub.f32 %v152_v14, %v152_v14 }
  0x99   :  { %vm62_vm3 = vcmp.eq.s32.totalorder %v21471_v8, %v46_v15  ;;  %vm60_vm4 = vcmp.eq.s32.totalorder %v21471_v8, %v40_v16 }
  0x9a   :  { %v21492_v19 = vsel %vm62_vm3, 1.0, %v21347_v1  ;;  %v21495_v20 = vsel %vm60_vm4, 1.0, %v21347_v1  ;;  %v21498_v21 = vand.u32 4294901760, %v21485_v17  ;;  %v21511_v40 = vand.u32 4294901760, %v21489_v18 }
  0x9b   :  { %v149_v29 = vsel %vm144_vm0, %v21495_v20, 0  ;;  %v155_v30 = vsel %vm144_vm0, %v21492_v19, 0 }
  0x9c   :  { %v52_v31 = vpop.permute.xlu1 %51  ;;  %v49_v32 = vpop.permute.xlu0 %48  ;;  %v241_v38 = vsub.f32 %v21485_v17, %v21498_v21  ;;  %v21506_v39 = vsub.f32 %v149_v29, %v149_v29  ;;  %v21521_v46 = vsub.f32 %v155_v30, %v155_v30  ;;  %v263_v60 = vsub.f32 %v21489_v18, %v21511_v40 }
  0x9d   :  { %vm64_vm5 = vcmp.eq.s32.totalorder %v21471_v8, %v52_v31  ;;  %vm63_vm6 = vcmp.eq.s32.totalorder %v21471_v8, %v49_v32 }
  0x9e   :  { %v21514_v43 = vsel %vm63_vm6, 1.0, %v21347_v1  ;;  %v21516_v44 = vand.u32 4294901760, %v241_v38  ;;  %v21519_v45 = vand.u32 4294901760, %v21506_v39  ;;  %v21526_v48 = vsel %vm64_vm5, 1.0, %v21347_v1 }
  0x9f   :  { %v158_v47 = vsel %vm144_vm0, %v21514_v43, 0  ;;  %v21540_v61 = vand.u32 4294901760, %v21521_v46  ;;  %v21554_v0 = vand.u32 4294901760, %v263_v60 }
  0xa0   :  { %243 = vmatmul.mubr.f32.vlgmr.msra.gmra.mrb[0].mxu0 %v21516_v44  ;;  %1077 = vmatmul.mubr.f32.vlgmr.msra.gmra.mrb[0].mxu1 %v21516_v44  ;;  %v55_v56 = vpop.permute.xlu0 %54  ;;  %v252_v57 = vsub.f32 %v21506_v39, %v21519_v45  ;;  %v58_v58 = vpop.permute.xlu1 %57  ;;  %v21542_v62 = vsub.f32 %v158_v47, %v158_v47 }
  0xa1   :  { %20198 = vmatpush1.bf16.msra.mxu0 %v20197_v51  ;;  %vm65_vm7 = vcmp.eq.s32.totalorder %v21471_v8, %v55_v56  ;;  %248 = vmatprep.mubr.f32.mxu0 %v21347_v1  ;;  %v161_v51 = vsel %vm144_vm0, %v21526_v48, 0  ;;  %vm66_vm8 = vcmp.eq.s32.totalorder %v21471_v8, %v58_v58 }
  0xa2   :  { %1082 = vmatprep.mubr.f32.mxu1 %v21347_v1  ;;  %v21535_v59 = vand.u32 4294901760, %v252_v57  ;;  %20222 = vmatpush1.bf16.msra.mxu1 %v20221_v2  ;;  %v21547_v63 = vsel %vm65_vm7, 1.0, %v21347_v1  ;;  %v274_v2 = vsub.f32 %v21521_v46, %v21540_v61  ;;  %v21566_v10 = vsel %vm66_vm8, 1.0, %v21347_v1 }
  0xa3   :  { %20200 = vmatprep.subr.bf16.mxu0 %v20199_v3  ;;  %20224 = vmatprep.subr.bf16.mxu1 %v20223_v5  ;;  %v21559_v3 = vand.u32 4294901760, %v21542_v62  ;;  %v21561_v5 = vsub.f32 %v161_v51, %v161_v51  ;;  %v164_v9 = vsel %vm144_vm0, %v21547_v63, 0  ;;  %v167_v16 = vsel %vm144_vm0, %v21566_v10, 0  ;;  %v87_v51 = vld [vmem:[#allocation3 + $0x20] sm:$0xff] }
  0xa4   :  { %254 = vmatmul.mubr.f32.gmra.mrb[2].mxu0 %v21535_v59  ;;  %1088 = vmatmul.mubr.f32.gmra.mrb[2].mxu1 %v21535_v59  ;;  %v21572_v8 = vand.u32 4294901760, %v274_v2  ;;  %v21579_v15 = vsub.f32 %v164_v9, %v164_v9  ;;  %v21594_v32 = vsub.f32 %v167_v16, %v167_v16  ;;  %v95_v2 = vld [vmem:[#allocation3 + $0x60] sm:$0xff]  ;;  %v89_v9 = vld [vmem:[#allocation3 + $0x30] sm:$0xff] }
  0xa5   :  { %259 = vmatprep.mubr.f32.mxu0 %v21347_v1  ;;  %1093 = vmatprep.mubr.f32.mxu1 %v21347_v1  ;;  %v285_v13 = vsub.f32 %v21542_v62, %v21559_v3  ;;  %v21577_v14 = vand.u32 4294901760, %v21561_v5 }
  0xa6   :  { %v21592_v31 = vand.u32 4294901760, %v21579_v15  ;;  %v21605_v56 = vand.u32 4294901760, %v21594_v32 }
  0xa7   :  { %v21587_v29 = vand.u32 4294901760, %v285_v13  ;;  %v296_v30 = vsub.f32 %v21561_v5, %v21577_v14  ;;  %v97_v13 = vld [vmem:[#allocation3 + $0x70] sm:$0xff] }
  0xa8   :  { %265 = vmatmul.mubr.f32.gmra.mrb[4].mxu0 %v21554_v0  ;;  %1099 = vmatmul.mubr.f32.gmra.mrb[4].mxu1 %v21554_v0  ;;  %v307_v47 = vsub.f32 %v21579_v15, %v21592_v31  ;;  %v318_v58 = vsub.f32 %v21594_v32, %v21605_v56 }
  0xa9   :  { %270 = vmatprep.mubr.f32.mxu0 %v21347_v1  ;;  %1104 = vmatprep.mubr.f32.mxu1 %v21347_v1  ;;  %v21600_v38 = vand.u32 4294901760, %v296_v30 }
  0xaa   :  { %v21611_v57 = vand.u32 4294901760, %v307_v47  ;;  %v21619_v60 = vand.u32 4294901760, %v318_v58 }
  0xac   :  { %276 = vmatmul.mubr.f32.gmra.mrb[6].mxu0 %v21572_v8  ;;  %1110 = vmatmul.mubr.f32.gmra.mrb[6].mxu1 %v21572_v8 }
  0xad   :  { %281 = vmatprep.mubr.f32.mxu0 %v21347_v1  ;;  %1115 = vmatprep.mubr.f32.mxu1 %v21347_v1 }
  0xb0   :  { %287 = vmatmul.mubr.f32.gmra.mrb[8].mxu0 %v21587_v29  ;;  %1121 = vmatmul.mubr.f32.gmra.mrb[8].mxu1 %v21587_v29 }
  0xb1   :  { %292 = vmatprep.mubr.f32.mxu0 %v21347_v1  ;;  %1126 = vmatprep.mubr.f32.mxu1 %v21347_v1 }
  0xb4   :  { %298 = vmatmul.mubr.f32.gmra.mrb[10].mxu0 %v21600_v38  ;;  %1132 = vmatmul.mubr.f32.gmra.mrb[10].mxu1 %v21600_v38 }
  0xb5   :  { %303 = vmatprep.mubr.f32.mxu0 %v21347_v1  ;;  %1137 = vmatprep.mubr.f32.mxu1 %v21347_v1 }
  0xb8   :  { %309 = vmatmul.mubr.f32.gmra.mrb[12].mxu0 %v21611_v57  ;;  %1143 = vmatmul.mubr.f32.gmra.mrb[12].mxu1 %v21611_v57 }
  0xb9   :  { %314 = vmatprep.mubr.f32.mxu0 %v21347_v1  ;;  %1148 = vmatprep.mubr.f32.mxu1 %v21347_v1 }
  0xbc   :  { %320 = vmatmul.mubr.f32.gmra.mrb[14].mxu0 %v21619_v60  ;;  %1154 = vmatmul.mubr.f32.gmra.mrb[14].mxu1 %v21619_v60 }
  0xbd   :  { %410 = vmatprep.mubr.f32.mxu0 %v21347_v1  ;;  %1244 = vmatprep.mubr.f32.mxu1 %v21347_v1 }
  0xc0   :  { %19963 = vmatmul.mubr.msk.f32.vlgmr.msra.gmra.mrb[0].mxu0 %vm144_vm0, %v21479_v12  ;;  %19987 = vmatmul.mubr.msk.f32.vlgmr.msra.gmra.mrb[0].mxu1 %vm144_vm0, %v21479_v12 }
  0xc1   :  { %20202 = vmatpush1.bf16.msra.mxu0 %v20201_v4  ;;  %417 = vmatprep.mubr.f32.mxu0 %v21347_v1  ;;  %v20207_v4 = vpack.c.bf16 %v340_v37, %v328_v36  ;;  %v2671_v36 = vand.u32 4294901760, %v90_v27 }
  0xc2   :  { %1251 = vmatprep.mubr.f32.mxu1 %v21347_v1  ;;  %20226 = vmatpush1.bf16.msra.mxu1 %v20225_v6  ;;  %v20231_v6 = vpack.c.bf16 %v1174_v53, %v1162_v52 }
  0xc3   :  { %20204 = vmatprep.subr.bf16.mxu0 %v21396_v22  ;;  %20228 = vmatprep.subr.bf16.mxu1 %v21408_v28  ;;  %v21801_v49 = vsub.f32 %v90_v27, %v2671_v36 }
  0xc4   :  { %19964 = vmatmul.mubr.msk.f32.gmra.mrb[2].mxu0 %vm144_vm0, %v21495_v20  ;;  %19988 = vmatmul.mubr.msk.f32.gmra.mrb[2].mxu1 %vm144_vm0, %v21495_v20 }
  0xc5   :  { %424 = vmatprep.mubr.f32.mxu0 %v21347_v1  ;;  %1258 = vmatprep.mubr.f32.mxu1 %v21347_v1  ;;  %v2830_v54 = vand.u32 4294901760, %v21801_v49 }
  0xc7   :  { %v2831_v47 = vsub.f32 %v21801_v49, %v2830_v54 }
  0xc8   :  { %19965 = vmatmul.mubr.msk.f32.gmra.mrb[4].mxu0 %vm144_vm0, %v21476_v11  ;;  %19989 = vmatmul.mubr.msk.f32.gmra.mrb[4].mxu1 %vm144_vm0, %v21476_v11 }
  0xc9   :  { %431 = vmatprep.mubr.f32.mxu0 %v21347_v1  ;;  %1265 = vmatprep.mubr.f32.mxu1 %v21347_v1  ;;  %v2832_v27 = vand.u32 4294901760, %v2831_v47 }
  0xcc   :  { %19966 = vmatmul.mubr.msk.f32.gmra.mrb[6].mxu0 %vm144_vm0, %v21492_v19  ;;  %19990 = vmatmul.mubr.msk.f32.gmra.mrb[6].mxu1 %vm144_vm0, %v21492_v19 }
  0xcd   :  { %438 = vmatprep.mubr.f32.mxu0 %v21347_v1  ;;  %1272 = vmatprep.mubr.f32.mxu1 %v21347_v1 }
  0xd0   :  { %19967 = vmatmul.mubr.msk.f32.gmra.mrb[8].mxu0 %vm144_vm0, %v21514_v43  ;;  %19991 = vmatmul.mubr.msk.f32.gmra.mrb[8].mxu1 %vm144_vm0, %v21514_v43 }
  0xd1   :  { %445 = vmatprep.mubr.f32.mxu0 %v21347_v1  ;;  %1279 = vmatprep.mubr.f32.mxu1 %v21347_v1 }
  0xd4   :  { %19968 = vmatmul.mubr.msk.f32.gmra.mrb[10].mxu0 %vm144_vm0, %v21526_v48  ;;  %19992 = vmatmul.mubr.msk.f32.gmra.mrb[10].mxu1 %vm144_vm0, %v21526_v48 }
  0xd5   :  { %452 = vmatprep.mubr.f32.mxu0 %v21347_v1  ;;  %1286 = vmatprep.mubr.f32.mxu1 %v21347_v1 }
  0xd8   :  { %19969 = vmatmul.mubr.msk.f32.gmra.mrb[12].mxu0 %vm144_vm0, %v21547_v63  ;;  %19993 = vmatmul.mubr.msk.f32.gmra.mrb[12].mxu1 %vm144_vm0, %v21547_v63 }
  0xd9   :  { %459 = vmatprep.mubr.f32.mxu0 %v21347_v1  ;;  %1293 = vmatprep.mubr.f32.mxu1 %v21347_v1 }
  0xdc   :  { %19970 = vmatmul.mubr.msk.f32.gmra.mrb[14].mxu0 %vm144_vm0, %v21566_v10  ;;  %19994 = vmatmul.mubr.msk.f32.gmra.mrb[14].mxu1 %vm144_vm0, %v21566_v10 }
  0xdd   :  { %539 = vmatprep.mubr.f32.mxu0 %v21347_v1  ;;  %1373 = vmatprep.mubr.f32.mxu1 %v21347_v1 }
  0xe0   :  { %542 = vmatmul.mubr.f32.vlgmr.msra.gmra.mrb[0].mxu0 %v21485_v17  ;;  %1376 = vmatmul.mubr.f32.vlgmr.msra.gmra.mrb[0].mxu1 %v21485_v17 }
  0xe1   :  { %20206 = vmatpush1.bf16.msra.mxu0 %v21402_v25  ;;  %547 = vmatprep.mubr.f32.mxu0 %v21347_v1 }
  0xe2   :  { %1381 = vmatprep.mubr.f32.mxu1 %v21347_v1  ;;  %20230 = vmatpush1.bf16.msra.mxu1 %v21419_v33 }
  0xe3   :  { %20208 = vmatprep.subr.bf16.mxu0 %v20207_v4  ;;  %20232 = vmatprep.subr.bf16.mxu1 %v20231_v6  ;;  %v1839_v4 = vand.u32 4294901760, %v87_v51  ;;  %v1843_v6 = vand.u32 4294901760, %v95_v2 }
  0xe4   :  { %550 = vmatmul.mubr.f32.gmra.mrb[2].mxu0 %v21506_v39  ;;  %1384 = vmatmul.mubr.f32.gmra.mrb[2].mxu1 %v21506_v39 }
  0xe5   :  { %555 = vmatprep.mubr.f32.mxu0 %v21347_v1  ;;  %1389 = vmatprep.mubr.f32.mxu1 %v21347_v1 }
  0xe8   :  { %558 = vmatmul.mubr.f32.gmra.mrb[4].mxu0 %v21489_v18  ;;  %1392 = vmatmul.mubr.f32.gmra.mrb[4].mxu1 %v21489_v18 }
  0xe9   :  { %563 = vmatprep.mubr.f32.mxu0 %v21347_v1  ;;  %1397 = vmatprep.mubr.f32.mxu1 %v21347_v1 }
  0xec   :  { %566 = vmatmul.mubr.f32.gmra.mrb[6].mxu0 %v21521_v46  ;;  %1400 = vmatmul.mubr.f32.gmra.mrb[6].mxu1 %v21521_v46 }
  0xed   :  { %571 = vmatprep.mubr.f32.mxu0 %v21347_v1  ;;  %1405 = vmatprep.mubr.f32.mxu1 %v21347_v1 }
  0xf0   :  { %574 = vmatmul.mubr.f32.gmra.mrb[8].mxu0 %v21542_v62  ;;  %1408 = vmatmul.mubr.f32.gmra.mrb[8].mxu1 %v21542_v62 }
  0xf1   :  { %579 = vmatprep.mubr.f32.mxu0 %v21347_v1  ;;  %1413 = vmatprep.mubr.f32.mxu1 %v21347_v1 }
  0xf4   :  { %582 = vmatmul.mubr.f32.gmra.mrb[10].mxu0 %v21561_v5  ;;  %1416 = vmatmul.mubr.f32.gmra.mrb[10].mxu1 %v21561_v5 }
  0xf5   :  { %587 = vmatprep.mubr.f32.mxu0 %v21347_v1  ;;  %1421 = vmatprep.mubr.f32.mxu1 %v21347_v1 }
  0xf8   :  { %590 = vmatmul.mubr.f32.gmra.mrb[12].mxu0 %v21579_v15  ;;  %1424 = vmatmul.mubr.f32.gmra.mrb[12].mxu1 %v21579_v15 }
  0xf9   :  { %595 = vmatprep.mubr.f32.mxu0 %v21347_v1  ;;  %1429 = vmatprep.mubr.f32.mxu1 %v21347_v1 }
  0xfc   :  { %598 = vmatmul.mubr.f32.gmra.mrb[14].mxu0 %v21594_v32  ;;  %1432 = vmatmul.mubr.f32.gmra.mrb[14].mxu1 %v21594_v32 }
  0xfd   :  { %672 = vmatprep.mubr.f32.mxu0 %v21347_v1  ;;  %1506 = vmatprep.mubr.f32.mxu1 %v21347_v1 }
 0x100   :  { %676 = vmatmul.mubr.f32.vlgmr.msra.gmra.mrb[0].mxu0 %v21498_v21  ;;  %1510 = vmatmul.mubr.f32.vlgmr.msra.gmra.mrb[0].mxu1 %v21498_v21 }
 0x101   :  { %20210 = vmatpush1.bf16.msra.mxu0 %v20209_v23  ;;  %681 = vmatprep.mubr.f32.mxu0 %v21347_v1  ;;  %v2673_v23 = vand.u32 4294901760, %v89_v9 }
 0x102   :  { %1515 = vmatprep.mubr.f32.mxu1 %v21347_v1  ;;  %20234 = vmatpush1.bf16.msra.mxu1 %v20233_v24  ;;  %v2677_v24 = vand.u32 4294901760, %v97_v13 }
 0x103   :  { %20212 = vmatprep.subr.bf16.mxu0 %v21396_v22  ;;  %20236 = vmatprep.subr.bf16.mxu1 %v21408_v28  ;;  %v88_v22 = vld [vmem:[#allocation3 + $0x28] sm:$0xff]  ;;  %v98_v28 = vld [vmem:[#allocation3 + $0x78] sm:$0xff]  ;;  %v21879_v47 = vsub.f32 %v89_v9, %v2673_v23 }
 0x104   :  { %685 = vmatmul.mubr.f32.gmra.mrb[2].mxu0 %v21519_v45  ;;  %1519 = vmatmul.mubr.f32.gmra.mrb[2].mxu1 %v21519_v45  ;;  %v1837_v34 = vand.u32 4294901760, %v88_v22  ;;  %v2675_v37 = vand.u32 4294901760, %v98_v28 }
 0x105   :  { %690 = vmatprep.mubr.f32.mxu0 %v21347_v1  ;;  %1524 = vmatprep.mubr.f32.mxu1 %v21347_v1 }
 0x106   :  { %v21765_v41 = vpack.c.bf16 %v1841_v35, %v1837_v34  ;;  %v21767_v42 = vpack.c.bf16 %v2675_v37, %v2671_v36  ;;  %v21803_v50 = vsub.f32 %v98_v28, %v2675_v37 }
 0x108   :  { %694 = vmatmul.mubr.f32.gmra.mrb[4].mxu0 %v21511_v40  ;;  %1528 = vmatmul.mubr.f32.gmra.mrb[4].mxu1 %v21511_v40  ;;  %v2842_v55 = vand.u32 4294901760, %v21803_v50 }
 0x109   :  { %699 = vmatprep.mubr.f32.mxu0 %v21347_v1  ;;  %1533 = vmatprep.mubr.f32.mxu1 %v21347_v1 }
 0x10a   :  { %v2843_v58 = vsub.f32 %v21803_v50, %v2842_v55 }
 0x10c   :  { %703 = vmatmul.mubr.f32.gmra.mrb[6].mxu0 %v21540_v61  ;;  %1537 = vmatmul.mubr.f32.gmra.mrb[6].mxu1 %v21540_v61  ;;  %v2844_v28 = vand.u32 4294901760, %v2843_v58  ;;  %v21881_v58 = vsub.f32 %v97_v13, %v2677_v24 }
 0x10d   :  { %708 = vmatprep.mubr.f32.mxu0 %v21347_v1  ;;  %1542 = vmatprep.mubr.f32.mxu1 %v21347_v1 }
 0x10e   :  { %v20267_v37 = vpack.c.bf16 %v2844_v28, %v2832_v27  ;;  %v2848_v9 = vand.u32 4294901760, %v21881_v58 }
 0x110   :  { %712 = vmatmul.mubr.f32.gmra.mrb[8].mxu0 %v21559_v3  ;;  %1546 = vmatmul.mubr.f32.gmra.mrb[8].mxu1 %v21559_v3 }
 0x111   :  { %717 = vmatprep.mubr.f32.mxu0 %v21347_v1  ;;  %1551 = vmatprep.mubr.f32.mxu1 %v21347_v1 }
 0x114   :  { %721 = vmatmul.mubr.f32.gmra.mrb[10].mxu0 %v21577_v14  ;;  %1555 = vmatmul.mubr.f32.gmra.mrb[10].mxu1 %v21577_v14 }
 0x115   :  { %726 = vmatprep.mubr.f32.mxu0 %v21347_v1  ;;  %1560 = vmatprep.mubr.f32.mxu1 %v21347_v1 }
 0x118   :  { %730 = vmatmul.mubr.f32.gmra.mrb[12].mxu0 %v21592_v31  ;;  %1564 = vmatmul.mubr.f32.gmra.mrb[12].mxu1 %v21592_v31 }
 0x119   :  { %735 = vmatprep.mubr.f32.mxu0 %v21347_v1  ;;  %1569 = vmatprep.mubr.f32.mxu1 %v21347_v1 }
 0x11c   :  { %739 = vmatmul.mubr.f32.gmra.mrb[14].mxu0 %v21605_v56  ;;  %1573 = vmatmul.mubr.f32.gmra.mrb[14].mxu1 %v21605_v56 }
 0x11d   :  { %821 = vmatprep.mubr.f32.mxu0 %v21347_v1  ;;  %1655 = vmatprep.mubr.f32.mxu1 %v21347_v1 }
 0x120   :  { %19971 = vmatmul.mubr.msk.f32.vlgmr.msra.gmra.mrb[0].mxu0 %vm144_vm0, %v21479_v12  ;;  %19995 = vmatmul.mubr.msk.f32.vlgmr.msra.gmra.mrb[0].mxu1 %vm144_vm0, %v21479_v12 }
 0x121   :  { %20214 = vmatpush1.bf16.msra.mxu0 %v21402_v25  ;;  %828 = vmatprep.mubr.f32.mxu0 %v21347_v1  ;;  %v21797_v25 = vsub.f32 %v88_v22, %v1837_v34  ;;  %v21845_v34 = vpack.c.bf16 %v1843_v6, %v1839_v4 }
 0x122   :  { %1662 = vmatprep.mubr.f32.mxu1 %v21347_v1  ;;  %20238 = vmatpush1.bf16.msra.mxu1 %v21419_v33  ;;  %v21799_v33 = vsub.f32 %v96_v26, %v1841_v35  ;;  %v21847_v35 = vpack.c.bf16 %v2677_v24, %v2673_v23  ;;  %v2849_v24 = vsub.f32 %v21881_v58, %v2848_v9 }
 0x123   :  { %20240 = vmatprep.subr.bf16.mxu0 %v21765_v41  ;;  %20264 = vmatprep.subr.bf16.mxu1 %v21767_v42  ;;  %v1996_v52 = vand.u32 4294901760, %v21797_v25 }
 0x124   :  { %19972 = vmatmul.mubr.msk.f32.gmra.mrb[2].mxu0 %vm144_vm0, %v21495_v20  ;;  %19996 = vmatmul.mubr.msk.f32.gmra.mrb[2].mxu1 %vm144_vm0, %v21495_v20  ;;  %v2008_v53 = vand.u32 4294901760, %v21799_v33  ;;  %v2850_v28 = vand.u32 4294901760, %v2849_v24  ;;  %v20247_v7 = vpack.c.bf16 %v21799_v33, %v21797_v25 }
 0x125   :  { %835 = vmatprep.mubr.f32.mxu0 %v21347_v1  ;;  %1669 = vmatprep.mubr.f32.mxu1 %v21347_v1  ;;  %v1997_v16 = vsub.f32 %v21797_v25, %v1996_v52  ;;  %v3576_v25 = vld [vmem:[#allocation3 + $0xf8] sm:$0x1f] }
 0x126   :  { %v2009_v30 = vsub.f32 %v21799_v33, %v2008_v53 }
 0x127   :  { %v1998_v22 = vand.u32 4294901760, %v1997_v16  ;;  %v21873_v16 = vsub.f32 %v87_v51, %v1839_v4  ;;  %v2836_v4 = vand.u32 4294901760, %v21879_v47 }
 0x128   :  { %19973 = vmatmul.mubr.msk.f32.gmra.mrb[4].mxu0 %vm144_vm0, %v21476_v11  ;;  %19997 = vmatmul.mubr.msk.f32.gmra.mrb[4].mxu1 %vm144_vm0, %v21476_v11  ;;  %v2010_v26 = vand.u32 4294901760, %v2009_v30  ;;  %v21875_v30 = vsub.f32 %v95_v2, %v1843_v6 }
 0x129   :  { %842 = vmatprep.mubr.f32.mxu0 %v21347_v1  ;;  %1676 = vmatprep.mubr.f32.mxu1 %v21347_v1  ;;  %v2002_v51 = vand.u32 4294901760, %v21873_v16  ;;  %v2837_v23 = vsub.f32 %v21879_v47, %v2836_v4 }
 0x12a   :  { %v20243_v36 = vpack.c.bf16 %v2010_v26, %v1998_v22  ;;  %v2014_v2 = vand.u32 4294901760, %v21875_v30 }
 0x12b   :  { %v2003_v13 = vsub.f32 %v21873_v16, %v2002_v51  ;;  %v2838_v27 = vand.u32 4294901760, %v2837_v23 }
 0x12c   :  { %19974 = vmatmul.mubr.msk.f32.gmra.mrb[6].mxu0 %vm144_vm0, %v21492_v19  ;;  %19998 = vmatmul.mubr.msk.f32.gmra.mrb[6].mxu1 %vm144_vm0, %v21492_v19  ;;  %v2015_v6 = vsub.f32 %v21875_v30, %v2014_v2 }
 0x12d   :  { %849 = vmatprep.mubr.f32.mxu0 %v21347_v1  ;;  %1683 = vmatprep.mubr.f32.mxu1 %v21347_v1  ;;  %v2004_v22 = vand.u32 4294901760, %v2003_v13  ;;  %v20271_v13 = vpack.c.bf16 %v21803_v50, %v21801_v49  ;;  %v3573_v49 = vld [vmem:[#allocation3 + $0xe0] sm:$0x1f]  ;;  %v4570_v50 = vsel %vm3589_vm9, %v3576_v25, 0 }
 0x12e   :  { %v2016_v26 = vand.u32 4294901760, %v2015_v6 }
 0x130   :  { %19975 = vmatmul.mubr.msk.f32.gmra.mrb[8].mxu0 %vm144_vm0, %v21514_v43  ;;  %19999 = vmatmul.mubr.msk.f32.gmra.mrb[8].mxu1 %vm144_vm0, %v21514_v43 }
 0x131   :  { %856 = vmatprep.mubr.f32.mxu0 %v21347_v1  ;;  %1690 = vmatprep.mubr.f32.mxu1 %v21347_v1 }
 0x134   :  { %19976 = vmatmul.mubr.msk.f32.gmra.mrb[10].mxu0 %vm144_vm0, %v21526_v48  ;;  %20000 = vmatmul.mubr.msk.f32.gmra.mrb[10].mxu1 %vm144_vm0, %v21526_v48 }
 0x135   :  { %863 = vmatprep.mubr.f32.mxu0 %v21347_v1  ;;  %1697 = vmatprep.mubr.f32.mxu1 %v21347_v1 }
 0x138   :  { %19977 = vmatmul.mubr.msk.f32.gmra.mrb[12].mxu0 %vm144_vm0, %v21547_v63  ;;  %20001 = vmatmul.mubr.msk.f32.gmra.mrb[12].mxu1 %vm144_vm0, %v21547_v63 }
 0x139   :  { %870 = vmatprep.mubr.f32.mxu0 %v21347_v1  ;;  %1704 = vmatprep.mubr.f32.mxu1 %v21347_v1 }
 0x13c   :  { %19978 = vmatmul.mubr.msk.f32.gmra.mrb[14].mxu0 %vm144_vm0, %v21566_v10  ;;  %20002 = vmatmul.mubr.msk.f32.gmra.mrb[14].mxu1 %vm144_vm0, %v21566_v10 }
 0x13d   :  { %946 = vmatprep.mubr.f32.mxu0 %v21347_v1  ;;  %1780 = vmatprep.mubr.f32.mxu1 %v21347_v1 }
 0x140   :  { %19979 = vmatmul.mubr.msk.f32.vlgmr.msra.gmra.mrb[0].mxu0 %vm144_vm0, %v21479_v12  ;;  %20003 = vmatmul.mubr.msk.f32.vlgmr.msra.gmra.mrb[0].mxu1 %vm144_vm0, %v21479_v12 }
 0x141   :  { %20242 = vmatpush1.bf16.msra.mxu0 %v21845_v34  ;;  %953 = vmatprep.mubr.f32.mxu0 %v21347_v1 }
 0x142   :  { %1787 = vmatprep.mubr.f32.mxu1 %v21347_v1  ;;  %20266 = vmatpush1.bf16.msra.mxu1 %v21847_v35 }
 0x143   :  { %20244 = vmatprep.subr.bf16.mxu0 %v20243_v36  ;;  %20268 = vmatprep.subr.bf16.mxu1 %v20267_v37  ;;  %v20245_v36 = vpack.c.bf16 %v2016_v26, %v2004_v22  ;;  %v20269_v37 = vpack.c.bf16 %v2850_v28, %v2838_v27 }
 0x144   :  { %19980 = vmatmul.mubr.msk.f32.gmra.mrb[2].mxu0 %vm144_vm0, %v21495_v20  ;;  %20004 = vmatmul.mubr.msk.f32.gmra.mrb[2].mxu1 %vm144_vm0, %v21495_v20 }
 0x145   :  { %960 = vmatprep.mubr.f32.mxu0 %v21347_v1  ;;  %1794 = vmatprep.mubr.f32.mxu1 %v21347_v1 }
 0x148   :  { %19981 = vmatmul.mubr.msk.f32.gmra.mrb[4].mxu0 %vm144_vm0, %v21476_v11  ;;  %20005 = vmatmul.mubr.msk.f32.gmra.mrb[4].mxu1 %vm144_vm0, %v21476_v11 }
 0x149   :  { %967 = vmatprep.mubr.f32.mxu0 %v21347_v1  ;;  %1801 = vmatprep.mubr.f32.mxu1 %v21347_v1 }
 0x14c   :  { %19982 = vmatmul.mubr.msk.f32.gmra.mrb[6].mxu0 %vm144_vm0, %v21492_v19  ;;  %20006 = vmatmul.mubr.msk.f32.gmra.mrb[6].mxu1 %vm144_vm0, %v21492_v19 }
 0x14d   :  { %974 = vmatprep.mubr.f32.mxu0 %v21347_v1  ;;  %1808 = vmatprep.mubr.f32.mxu1 %v21347_v1 }
 0x150   :  { %19983 = vmatmul.mubr.msk.f32.gmra.mrb[8].mxu0 %vm144_vm0, %v21514_v43  ;;  %20007 = vmatmul.mubr.msk.f32.gmra.mrb[8].mxu1 %vm144_vm0, %v21514_v43 }
 0x151   :  { %981 = vmatprep.mubr.f32.mxu0 %v21347_v1  ;;  %1815 = vmatprep.mubr.f32.mxu1 %v21347_v1 }
 0x154   :  { %19984 = vmatmul.mubr.msk.f32.gmra.mrb[10].mxu0 %vm144_vm0, %v21526_v48  ;;  %20008 = vmatmul.mubr.msk.f32.gmra.mrb[10].mxu1 %vm144_vm0, %v21526_v48 }
 0x155   :  { %988 = vmatprep.mubr.f32.mxu0 %v21347_v1  ;;  %1822 = vmatprep.mubr.f32.mxu1 %v21347_v1 }
 0x158   :  { %19985 = vmatmul.mubr.msk.f32.gmra.mrb[12].mxu0 %vm144_vm0, %v21547_v63  ;;  %20009 = vmatmul.mubr.msk.f32.gmra.mrb[12].mxu1 %vm144_vm0, %v21547_v63 }
 0x159   :  { %995 = vmatprep.mubr.f32.mxu0 %v21347_v1  ;;  %1829 = vmatprep.mubr.f32.mxu1 %v21347_v1 }
 0x15c   :  { %19986 = vmatmul.mubr.msk.f32.gmra.mrb[14].mxu0 %vm144_vm0, %v21566_v10  ;;  %20010 = vmatmul.mubr.msk.f32.gmra.mrb[14].mxu1 %vm144_vm0, %v21566_v10 }
 0x15d   :  { %1905 = vmatprep.mubr.f32.mxu0 %v21347_v1  ;;  %2739 = vmatprep.mubr.f32.mxu1 %v21347_v1 }
 0x160   :  { %1911 = vmatmul.mubr.f32.vlgmr.msra.gmra.mrb[16].mxu0 %v21516_v44  ;;  %2745 = vmatmul.mubr.f32.vlgmr.msra.gmra.mrb[16].mxu1 %v21516_v44  ;;  %v20273_v44 = vpack.c.bf16 %v21881_v58, %v21879_v47 }
 0x161   :  { %20246 = vmatpush1.bf16.msra.mxu0 %v20245_v36  ;;  %1916 = vmatprep.mubr.f32.mxu0 %v21347_v1 }
 0x162   :  { %2750 = vmatprep.mubr.f32.mxu1 %v21347_v1  ;;  %20270 = vmatpush1.bf16.msra.mxu1 %v20269_v37 }
 0x163   :  { %20248 = vmatprep.subr.bf16.mxu0 %v20247_v7  ;;  %20272 = vmatprep.subr.bf16.mxu1 %v20271_v13  ;;  %v20249_v7 = vpack.c.bf16 %v21875_v30, %v21873_v16  ;;  %v23193_v13 = vlaneseq }
 0x164   :  { %1922 = vmatmul.mubr.f32.gmra.mrb[18].mxu0 %v21535_v59  ;;  %2756 = vmatmul.mubr.f32.gmra.mrb[18].mxu1 %v21535_v59  ;;  %v20255_v59 = vpack.c.bf16 %v2008_v53, %v1996_v52  ;;  %v3575_v52 = vld [vmem:[#allocation3 + $0xf0] sm:$0x1f] }
 0x165   :  { %1927 = vmatprep.mubr.f32.mxu0 %v21347_v1  ;;  %2761 = vmatprep.mubr.f32.mxu1 %v21347_v1 }
 0x168   :  { %1933 = vmatmul.mubr.f32.gmra.mrb[20].mxu0 %v21554_v0  ;;  %2767 = vmatmul.mubr.f32.gmra.mrb[20].mxu1 %v21554_v0  ;;  %v20279_v0 = vpack.c.bf16 %v2842_v55, %v2830_v54  ;;  %v4561_v54 = vsel %vm3589_vm9, %v3573_v49, 0  ;;  %v22282_v55 = vand.u32 4294901760, %v4570_v50 }
 0x169   :  { %1938 = vmatprep.mubr.f32.mxu0 %v21347_v1  ;;  %2772 = vmatprep.mubr.f32.mxu1 %v21347_v1 }
 0x16a   :  { %v22301_v47 = vsub.f32 %v4570_v50, %v22282_v55 }
 0x16c   :  { %1944 = vmatmul.mubr.f32.gmra.mrb[22].mxu0 %v21572_v8  ;;  %2778 = vmatmul.mubr.f32.gmra.mrb[22].mxu1 %v21572_v8 }
 0x16d   :  { %1949 = vmatprep.mubr.f32.mxu0 %v21347_v1  ;;  %2783 = vmatprep.mubr.f32.mxu1 %v21347_v1 }
 0x170   :  { %1955 = vmatmul.mubr.f32.gmra.mrb[24].mxu0 %v21587_v29  ;;  %2789 = vmatmul.mubr.f32.gmra.mrb[24].mxu1 %v21587_v29 }
 0x171   :  { %1960 = vmatprep.mubr.f32.mxu0 %v21347_v1  ;;  %2794 = vmatprep.mubr.f32.mxu1 %v21347_v1 }
 0x174   :  { %1966 = vmatmul.mubr.f32.gmra.mrb[26].mxu0 %v21600_v38  ;;  %2800 = vmatmul.mubr.f32.gmra.mrb[26].mxu1 %v21600_v38 }
 0x175   :  { %1971 = vmatprep.mubr.f32.mxu0 %v21347_v1  ;;  %2805 = vmatprep.mubr.f32.mxu1 %v21347_v1 }
 0x178   :  { %1977 = vmatmul.mubr.f32.gmra.mrb[28].mxu0 %v21611_v57  ;;  %2811 = vmatmul.mubr.f32.gmra.mrb[28].mxu1 %v21611_v57 }
 0x179   :  { %1982 = vmatprep.mubr.f32.mxu0 %v21347_v1  ;;  %2816 = vmatprep.mubr.f32.mxu1 %v21347_v1 }
 0x17c   :  { %1988 = vmatmul.mubr.f32.gmra.mrb[30].mxu0 %v21619_v60  ;;  %2822 = vmatmul.mubr.f32.gmra.mrb[30].mxu1 %v21619_v60 }
 0x17d   :  { %2078 = vmatprep.mubr.f32.mxu0 %v21347_v1  ;;  %2912 = vmatprep.mubr.f32.mxu1 %v21347_v1 }
 0x180   :  { %20011 = vmatmul.mubr.msk.f32.vlgmr.msra.gmra.mrb[16].mxu0 %vm144_vm0, %v21479_v12  ;;  %20035 = vmatmul.mubr.msk.f32.vlgmr.msra.gmra.mrb[16].mxu1 %vm144_vm0, %v21479_v12 }
 0x181   :  { %20250 = vmatpush1.bf16.msra.mxu0 %v20249_v7  ;;  %2085 = vmatprep.mubr.f32.mxu0 %v21347_v1  ;;  %v22402_v7 = vshrl.u32 %v23193_v13, 7 }
 0x182   :  { %2919 = vmatprep.mubr.f32.mxu1 %v21347_v1  ;;  %20274 = vmatpush1.bf16.msra.mxu1 %v20273_v44  ;;  %v100_v44 = vld [vmem:[#allocation3 + $0x80] ss:$8 sm:$0xf] }
 0x183   :  { %20252 = vmatprep.subr.bf16.mxu0 %v21765_v41  ;;  %20276 = vmatprep.subr.bf16.mxu1 %v21767_v42 }
 0x184   :  { %20012 = vmatmul.mubr.msk.f32.gmra.mrb[18].mxu0 %vm144_vm0, %v21495_v20  ;;  %20036 = vmatmul.mubr.msk.f32.gmra.mrb[18].mxu1 %vm144_vm0, %v21495_v20 }
 0x185   :  { %2092 = vmatprep.mubr.f32.mxu0 %v21347_v1  ;;  %2926 = vmatprep.mubr.f32.mxu1 %v21347_v1 }
 0x188   :  { %20013 = vmatmul.mubr.msk.f32.gmra.mrb[20].mxu0 %vm144_vm0, %v21476_v11  ;;  %20037 = vmatmul.mubr.msk.f32.gmra.mrb[20].mxu1 %vm144_vm0, %v21476_v11 }
 0x189   :  { %2099 = vmatprep.mubr.f32.mxu0 %v21347_v1  ;;  %2933 = vmatprep.mubr.f32.mxu1 %v21347_v1 }
 0x18c   :  { %20014 = vmatmul.mubr.msk.f32.gmra.mrb[22].mxu0 %vm144_vm0, %v21492_v19  ;;  %20038 = vmatmul.mubr.msk.f32.gmra.mrb[22].mxu1 %vm144_vm0, %v21492_v19 }
 0x18d   :  { %2106 = vmatprep.mubr.f32.mxu0 %v21347_v1  ;;  %2940 = vmatprep.mubr.f32.mxu1 %v21347_v1 }
 0x190   :  { %20015 = vmatmul.mubr.msk.f32.gmra.mrb[24].mxu0 %vm144_vm0, %v21514_v43  ;;  %20039 = vmatmul.mubr.msk.f32.gmra.mrb[24].mxu1 %vm144_vm0, %v21514_v43 }
 0x191   :  { %2113 = vmatprep.mubr.f32.mxu0 %v21347_v1  ;;  %2947 = vmatprep.mubr.f32.mxu1 %v21347_v1 }
 0x194   :  { %20016 = vmatmul.mubr.msk.f32.gmra.mrb[26].mxu0 %vm144_vm0, %v21526_v48  ;;  %20040 = vmatmul.mubr.msk.f32.gmra.mrb[26].mxu1 %vm144_vm0, %v21526_v48 }
 0x195   :  { %2120 = vmatprep.mubr.f32.mxu0 %v21347_v1  ;;  %2954 = vmatprep.mubr.f32.mxu1 %v21347_v1 }
 0x198   :  { %20017 = vmatmul.mubr.msk.f32.gmra.mrb[28].mxu0 %vm144_vm0, %v21547_v63  ;;  %20041 = vmatmul.mubr.msk.f32.gmra.mrb[28].mxu1 %vm144_vm0, %v21547_v63 }
 0x199   :  { %2127 = vmatprep.mubr.f32.mxu0 %v21347_v1  ;;  %2961 = vmatprep.mubr.f32.mxu1 %v21347_v1 }
 0x19c   :  { %20018 = vmatmul.mubr.msk.f32.gmra.mrb[30].mxu0 %vm144_vm0, %v21566_v10  ;;  %20042 = vmatmul.mubr.msk.f32.gmra.mrb[30].mxu1 %vm144_vm0, %v21566_v10 }
 0x19d   :  { %2207 = vmatprep.mubr.f32.mxu0 %v21347_v1  ;;  %3041 = vmatprep.mubr.f32.mxu1 %v21347_v1 }
 0x1a0   :  { %2210 = vmatmul.mubr.f32.vlgmr.msra.gmra.mrb[16].mxu0 %v21485_v17  ;;  %3044 = vmatmul.mubr.f32.vlgmr.msra.gmra.mrb[16].mxu1 %v21485_v17  ;;  %v20257_v17 = vpack.c.bf16 %v2014_v2, %v2002_v51 }
 0x1a1   :  { %20254 = vmatpush1.bf16.msra.mxu0 %v21845_v34  ;;  %2215 = vmatprep.mubr.f32.mxu0 %v21347_v1 }
 0x1a2   :  { %3049 = vmatprep.mubr.f32.mxu1 %v21347_v1  ;;  %20278 = vmatpush1.bf16.msra.mxu1 %v21847_v35 }
 0x1a3   :  { %20256 = vmatprep.subr.bf16.mxu0 %v20255_v59  ;;  %20280 = vmatprep.subr.bf16.mxu1 %v20279_v0  ;;  %v101_v59 = vld [vmem:[#allocation3 + $0x80] ss:$8 sm:$0xf0] }
 0x1a4   :  { %2218 = vmatmul.mubr.f32.gmra.mrb[18].mxu0 %v21506_v39  ;;  %3052 = vmatmul.mubr.f32.gmra.mrb[18].mxu1 %v21506_v39  ;;  %v3572_v39 = vld [vmem:[#allocation3 + $0xd8] sm:$0x1f]  ;;  %v22404_v0 = vor.u32 %v101_v59, %v100_v44 }
 0x1a5   :  { %2223 = vmatprep.mubr.f32.mxu0 %v21347_v1  ;;  %3057 = vmatprep.mubr.f32.mxu1 %v21347_v1 }
 0x1a8   :  { %2226 = vmatmul.mubr.f32.gmra.mrb[20].mxu0 %v21489_v18  ;;  %3060 = vmatmul.mubr.f32.gmra.mrb[20].mxu1 %v21489_v18  ;;  %v20281_v18 = vpack.c.bf16 %v2848_v9, %v2836_v4  ;;  %v22313_v4 = vand.u32 4294901760, %v22301_v47 }
 0x1a9   :  { %2231 = vmatprep.mubr.f32.mxu0 %v21347_v1  ;;  %3065 = vmatprep.mubr.f32.mxu1 %v21347_v1 }
 0x1aa   :  { %v5118_v24 = vsub.f32 %v22301_v47, %v22313_v4 }
 0x1ac   :  { %2234 = vmatmul.mubr.f32.gmra.mrb[22].mxu0 %v21521_v46  ;;  %3068 = vmatmul.mubr.f32.gmra.mrb[22].mxu1 %v21521_v46  ;;  %v22339_v28 = vand.u32 4294901760, %v5118_v24 }
 0x1ad   :  { %2239 = vmatprep.mubr.f32.mxu0 %v21347_v1  ;;  %3073 = vmatprep.mubr.f32.mxu1 %v21347_v1 }
 0x1b0   :  { %2242 = vmatmul.mubr.f32.gmra.mrb[24].mxu0 %v21542_v62  ;;  %3076 = vmatmul.mubr.f32.gmra.mrb[24].mxu1 %v21542_v62 }
 0x1b1   :  { %2247 = vmatprep.mubr.f32.mxu0 %v21347_v1  ;;  %3081 = vmatprep.mubr.f32.mxu1 %v21347_v1 }
 0x1b4   :  { %2250 = vmatmul.mubr.f32.gmra.mrb[26].mxu0 %v21561_v5  ;;  %3084 = vmatmul.mubr.f32.gmra.mrb[26].mxu1 %v21561_v5  ;;  %v3569_v5 = vld [vmem:[#allocation3 + $0xc0] sm:$0x1f] }
 0x1b5   :  { %2255 = vmatprep.mubr.f32.mxu0 %v21347_v1  ;;  %3089 = vmatprep.mubr.f32.mxu1 %v21347_v1  ;;  %v3591_v29 = vsel %vm3589_vm9, %v3569_v5, 0  ;;  %v118_v5 = vsub.s32 3, %v22402_v7 }
 0x1b8   :  { %2258 = vmatmul.mubr.f32.gmra.mrb[28].mxu0 %v21579_v15  ;;  %3092 = vmatmul.mubr.f32.gmra.mrb[28].mxu1 %v21579_v15  ;;  %v3571_v15 = vld [vmem:[#allocation3 + $0xd0] sm:$0x1f] }
 0x1b9   :  { %2263 = vmatprep.mubr.f32.mxu0 %v21347_v1  ;;  %3097 = vmatprep.mubr.f32.mxu1 %v21347_v1 }
 0x1bc   :  { %2266 = vmatmul.mubr.f32.gmra.mrb[30].mxu0 %v21594_v32  ;;  %3100 = vmatmul.mubr.f32.gmra.mrb[30].mxu1 %v21594_v32 }
 0x1bd   :  { %2340 = vmatprep.mubr.f32.mxu0 %v21347_v1  ;;  %3174 = vmatprep.mubr.f32.mxu1 %v21347_v1 }
 0x1c0   :  { %2344 = vmatmul.mubr.f32.vlgmr.msra.gmra.mrb[16].mxu0 %v21498_v21  ;;  %3178 = vmatmul.mubr.f32.vlgmr.msra.gmra.mrb[16].mxu1 %v21498_v21  ;;  %v3570_v21 = vld [vmem:[#allocation3 + $0xc8] sm:$0x1f] }
 0x1c1   :  { %20258 = vmatpush1.bf16.msra.mxu0 %v20257_v17  ;;  %2349 = vmatprep.mubr.f32.mxu0 %v21347_v1  ;;  %v106_v17 = vsub.s32 0, %v22402_v7 }
 0x1c2   :  { %3183 = vmatprep.mubr.f32.mxu1 %v21347_v1  ;;  %20282 = vmatpush1.bf16.msra.mxu1 %v20281_v18  ;;  %v110_v18 = vsub.s32 1, %v22402_v7 }
 0x1c3   :  { %20260 = vmatprep.subr.bf16.mxu0 %v21765_v41  ;;  %20284 = vmatprep.subr.bf16.mxu1 %v21767_v42 }
 0x1c4   :  { %2353 = vmatmul.mubr.f32.gmra.mrb[18].mxu0 %v21519_v45  ;;  %3187 = vmatmul.mubr.f32.gmra.mrb[18].mxu1 %v21519_v45  ;;  %v3600_v45 = vsel %vm3589_vm9, %v3572_v39, 0  ;;  %v22412_v39 = vrot.slane %v22404_v0, %v110_v18 }
 0x1c5   :  { %2358 = vmatprep.mubr.f32.mxu0 %v21347_v1  ;;  %3192 = vmatprep.mubr.f32.mxu1 %v21347_v1 }
 0x1c8   :  { %2362 = vmatmul.mubr.f32.gmra.mrb[20].mxu0 %v21511_v40  ;;  %3196 = vmatmul.mubr.f32.gmra.mrb[20].mxu1 %v21511_v40  ;;  %v3594_v40 = vsel %vm3589_vm9, %v3570_v21, 0  ;;  %v22409_v21 = vrot.slane %v22404_v0, %v106_v17 }
 0x1c9   :  { %2367 = vmatprep.mubr.f32.mxu0 %v21347_v1  ;;  %3201 = vmatprep.mubr.f32.mxu1 %v21347_v1  ;;  %v22099_v46 = vand.u32 4294901760, %v3594_v40 }
 0x1cb   :  { %v22138_v62 = vsub.f32 %v3594_v40, %v22099_v46 }
 0x1cc   :  { %2371 = vmatmul.mubr.f32.gmra.mrb[22].mxu0 %v21540_v61  ;;  %3205 = vmatmul.mubr.f32.gmra.mrb[22].mxu1 %v21540_v61  ;;  %v22101_v61 = vand.u32 4294901760, %v3600_v45 }
 0x1cd   :  { %2376 = vmatprep.mubr.f32.mxu0 %v21347_v1  ;;  %3210 = vmatprep.mubr.f32.mxu1 %v21347_v1  ;;  %v22150_v8 = vand.u32 4294901760, %v22138_v62 }
 0x1cf   :  { %v3683_v32 = vsub.f32 %v22138_v62, %v22150_v8 }
 0x1d0   :  { %2380 = vmatmul.mubr.f32.gmra.mrb[24].mxu0 %v21559_v3  ;;  %3214 = vmatmul.mubr.f32.gmra.mrb[24].mxu1 %v21559_v3  ;;  %v22141_v3 = vsub.f32 %v3600_v45, %v22101_v61 }
 0x1d1   :  { %2385 = vmatprep.mubr.f32.mxu0 %v21347_v1  ;;  %3219 = vmatprep.mubr.f32.mxu1 %v21347_v1  ;;  %v22177_v60 = vand.u32 4294901760, %v3683_v32 }
 0x1d4   :  { %2389 = vmatmul.mubr.f32.gmra.mrb[26].mxu0 %v21577_v14  ;;  %3223 = vmatmul.mubr.f32.gmra.mrb[26].mxu1 %v21577_v14  ;;  %v22153_v14 = vand.u32 4294901760, %v22141_v3 }
 0x1d5   :  { %2394 = vmatprep.mubr.f32.mxu0 %v21347_v1  ;;  %3228 = vmatprep.mubr.f32.mxu1 %v21347_v1 }
 0x1d6   :  { %v4148_v38 = vsub.f32 %v22141_v3, %v22153_v14 }
 0x1d8   :  { %2398 = vmatmul.mubr.f32.gmra.mrb[28].mxu0 %v21592_v31  ;;  %3232 = vmatmul.mubr.f32.gmra.mrb[28].mxu1 %v21592_v31  ;;  %v3597_v31 = vsel %vm3589_vm9, %v3571_v15, 0  ;;  %v22179_v41 = vand.u32 4294901760, %v4148_v38 }
 0x1d9   :  { %2403 = vmatprep.mubr.f32.mxu0 %v21347_v1  ;;  %3237 = vmatprep.mubr.f32.mxu1 %v21347_v1  ;;  %v22175_v57 = vand.u32 4294901760, %v3597_v31 }
 0x1dc   :  { %2407 = vmatmul.mubr.f32.gmra.mrb[30].mxu0 %v21605_v56  ;;  %3241 = vmatmul.mubr.f32.gmra.mrb[30].mxu1 %v21605_v56  ;;  %v22173_v56 = vand.u32 4294901760, %v3591_v29 }
 0x1dd   :  { %2489 = vmatprep.mubr.f32.mxu0 %v21347_v1  ;;  %3323 = vmatprep.mubr.f32.mxu1 %v21347_v1 }
 0x1e0   :  { %20019 = vmatmul.mubr.msk.f32.vlgmr.msra.gmra.mrb[16].mxu0 %vm144_vm0, %v21479_v12  ;;  %20043 = vmatmul.mubr.msk.f32.vlgmr.msra.gmra.mrb[16].mxu1 %vm144_vm0, %v21479_v12 }
 0x1e1   :  { %20262 = vmatpush1.bf16.msra.mxu0 %v21845_v34  ;;  %2496 = vmatprep.mubr.f32.mxu0 %v21347_v1  ;;  %v4567_v34 = vsel %vm3589_vm9, %v3575_v52, 0 }
 0x1e2   :  { %3330 = vmatprep.mubr.f32.mxu1 %v21347_v1  ;;  %20286 = vmatpush1.bf16.msra.mxu1 %v21847_v35  ;;  %v22289_v35 = vand.u32 4294901760, %v4561_v54  ;;  %v22296_v30 = vand.u32 4294901760, %v4567_v34 }
 0x1e3   :  { %3603 = vmatprep.subr.mxu0 %v22099_v46  ;;  %4068 = vmatprep.subr.mxu1 %v22101_v61 }
 0x1e4   :  { %20020 = vmatmul.mubr.msk.f32.gmra.mrb[18].mxu0 %vm144_vm0, %v21495_v20  ;;  %20044 = vmatmul.mubr.msk.f32.gmra.mrb[18].mxu1 %vm144_vm0, %v21495_v20  ;;  %v22304_v58 = vsub.f32 %v4561_v54, %v22289_v35  ;;  %v22310_v2 = vsub.f32 %v4567_v34, %v22296_v30 }
 0x1e5   :  { %2503 = vmatprep.mubr.f32.mxu0 %v21347_v1  ;;  %3337 = vmatprep.mubr.f32.mxu1 %v21347_v1 }
 0x1e6   :  { %v22320_v9 = vand.u32 4294901760, %v22304_v58  ;;  %v22327_v23 = vand.u32 4294901760, %v22310_v2 }
 0x1e8   :  { %20021 = vmatmul.mubr.msk.f32.gmra.mrb[20].mxu0 %vm144_vm0, %v21476_v11  ;;  %20045 = vmatmul.mubr.msk.f32.gmra.mrb[20].mxu1 %vm144_vm0, %v21476_v11  ;;  %v4659_v22 = vsub.f32 %v22304_v58, %v22320_v9  ;;  %v5124_v27 = vsub.f32 %v22310_v2, %v22327_v23 }
 0x1e9   :  { %2510 = vmatprep.mubr.f32.mxu0 %v21347_v1  ;;  %3344 = vmatprep.mubr.f32.mxu1 %v21347_v1 }
 0x1ea   :  { %v22345_v36 = vand.u32 4294901760, %v4659_v22  ;;  %v22349_v37 = vand.u32 4294901760, %v5124_v27 }
 0x1ec   :  { %20022 = vmatmul.mubr.msk.f32.gmra.mrb[22].mxu0 %vm144_vm0, %v21492_v19  ;;  %20046 = vmatmul.mubr.msk.f32.gmra.mrb[22].mxu1 %vm144_vm0, %v21492_v19 }
 0x1ed   :  { %2517 = vmatprep.mubr.f32.mxu0 %v21347_v1  ;;  %3351 = vmatprep.mubr.f32.mxu1 %v21347_v1 }
 0x1f0   :  { %20023 = vmatmul.mubr.msk.f32.gmra.mrb[24].mxu0 %vm144_vm0, %v21514_v43  ;;  %20047 = vmatmul.mubr.msk.f32.gmra.mrb[24].mxu1 %vm144_vm0, %v21514_v43 }
 0x1f1   :  { %2524 = vmatprep.mubr.f32.mxu0 %v21347_v1  ;;  %3358 = vmatprep.mubr.f32.mxu1 %v21347_v1 }
 0x1f4   :  { %20024 = vmatmul.mubr.msk.f32.gmra.mrb[26].mxu0 %vm144_vm0, %v21526_v48  ;;  %20048 = vmatmul.mubr.msk.f32.gmra.mrb[26].mxu1 %vm144_vm0, %v21526_v48 }
 0x1f5   :  { %2531 = vmatprep.mubr.f32.mxu0 %v21347_v1  ;;  %3365 = vmatprep.mubr.f32.mxu1 %v21347_v1 }
 0x1f8   :  { %20025 = vmatmul.mubr.msk.f32.gmra.mrb[28].mxu0 %vm144_vm0, %v21547_v63  ;;  %20049 = vmatmul.mubr.msk.f32.gmra.mrb[28].mxu1 %vm144_vm0, %v21547_v63 }
 0x1f9   :  { %2538 = vmatprep.mubr.f32.mxu0 %v21347_v1  ;;  %3372 = vmatprep.mubr.f32.mxu1 %v21347_v1 }
 0x1fc   :  { %20026 = vmatmul.mubr.msk.f32.gmra.mrb[30].mxu0 %vm144_vm0, %v21566_v10  ;;  %20050 = vmatmul.mubr.msk.f32.gmra.mrb[30].mxu1 %vm144_vm0, %v21566_v10 }
 0x1fd   :  { %2614 = vmatprep.mubr.f32.mxu0 %v21347_v1  ;;  %3448 = vmatprep.mubr.f32.mxu1 %v21347_v1 }
 0x200   :  { %20027 = vmatmul.mubr.msk.f32.vlgmr.msra.gmra.mrb[16].mxu0 %vm144_vm0, %v21479_v12  ;;  %20051 = vmatmul.mubr.msk.f32.vlgmr.msra.gmra.mrb[16].mxu1 %vm144_vm0, %v21479_v12  ;;  %v22219_v12 = vsub.f32 %v3597_v31, %v22175_v57 }
 0x201   :  { %3605 = vmatpush1.msra.mxu0 %v22173_v56  ;;  %2621 = vmatprep.mubr.f32.mxu0 %v21347_v1 }
 0x202   :  { %3455 = vmatprep.mubr.f32.mxu1 %v21347_v1  ;;  %4070 = vmatpush1.msra.mxu1 %v22175_v57 }
 0x203   :  { %3685 = vmatprep.subr.mxu0 %v22177_v60  ;;  %4150 = vmatprep.subr.mxu1 %v22179_v41 }
 0x204   :  { %20028 = vmatmul.mubr.msk.f32.gmra.mrb[18].mxu0 %vm144_vm0, %v21495_v20  ;;  %20052 = vmatmul.mubr.msk.f32.gmra.mrb[18].mxu1 %vm144_vm0, %v21495_v20  ;;  %v22231_v20 = vand.u32 4294901760, %v22219_v12 }
 0x205   :  { %2628 = vmatprep.mubr.f32.mxu0 %v21347_v1  ;;  %3462 = vmatprep.mubr.f32.mxu1 %v21347_v1 }
 0x208   :  { %20029 = vmatmul.mubr.msk.f32.gmra.mrb[20].mxu0 %vm144_vm0, %v21476_v11  ;;  %20053 = vmatmul.mubr.msk.f32.gmra.mrb[20].mxu1 %vm144_vm0, %v21476_v11  ;;  %v22216_v11 = vsub.f32 %v3591_v29, %v22173_v56 }
 0x209   :  { %2635 = vmatprep.mubr.f32.mxu0 %v21347_v1  ;;  %3469 = vmatprep.mubr.f32.mxu1 %v21347_v1 }
 0x20c   :  { %20030 = vmatmul.mubr.msk.f32.gmra.mrb[22].mxu0 %vm144_vm0, %v21492_v19  ;;  %20054 = vmatmul.mubr.msk.f32.gmra.mrb[22].mxu1 %vm144_vm0, %v21492_v19  ;;  %v22228_v19 = vand.u32 4294901760, %v22216_v11 }
 0x20d   :  { %2642 = vmatprep.mubr.f32.mxu0 %v21347_v1  ;;  %3476 = vmatprep.mubr.f32.mxu1 %v21347_v1 }
 0x210   :  { %20031 = vmatmul.mubr.msk.f32.gmra.mrb[24].mxu0 %vm144_vm0, %v21514_v43  ;;  %20055 = vmatmul.mubr.msk.f32.gmra.mrb[24].mxu1 %vm144_vm0, %v21514_v43  ;;  %v3689_v43 = vsub.f32 %v22216_v11, %v22228_v19 }
 0x211   :  { %2649 = vmatprep.mubr.f32.mxu0 %v21347_v1  ;;  %3483 = vmatprep.mubr.f32.mxu1 %v21347_v1 }
 0x214   :  { %20032 = vmatmul.mubr.msk.f32.gmra.mrb[26].mxu0 %vm144_vm0, %v21526_v48  ;;  %20056 = vmatmul.mubr.msk.f32.gmra.mrb[26].mxu1 %vm144_vm0, %v21526_v48  ;;  %v4154_v48 = vsub.f32 %v22219_v12, %v22231_v20 }
 0x215   :  { %2656 = vmatprep.mubr.f32.mxu0 %v21347_v1  ;;  %3490 = vmatprep.mubr.f32.mxu1 %v21347_v1 }
 0x216   :  { %v22251_v42 = vand.u32 4294901760, %v4154_v48  ;;  %v22418_v48 = vrot.slane %v22404_v0, %v118_v5 }
 0x218   :  { %20033 = vmatmul.mubr.msk.f32.gmra.mrb[28].mxu0 %vm144_vm0, %v21547_v63  ;;  %20057 = vmatmul.mubr.msk.f32.gmra.mrb[28].mxu1 %vm144_vm0, %v21547_v63  ;;  %v22249_v63 = vand.u32 4294901760, %v3689_v43 }
 0x219   :  { %2663 = vmatprep.mubr.f32.mxu0 %v21347_v1  ;;  %3497 = vmatprep.mubr.f32.mxu1 %v21347_v1 }
 0x21c   :  { %20034 = vmatmul.mubr.msk.f32.gmra.mrb[30].mxu0 %vm144_vm0, %v21566_v10  ;;  %20058 = vmatmul.mubr.msk.f32.gmra.mrb[30].mxu1 %vm144_vm0, %v21566_v10  ;;  %v3574_v10 = vld [vmem:[#allocation3 + $0xe8] sm:$0x1f] }
 0x21d   :  { %3668 = vmatprep.mubr.f32.mxu0 %v21347_v1  ;;  %4133 = vmatprep.mubr.f32.mxu1 %v21347_v1  ;;  %v4564_v33 = vsel %vm3589_vm9, %v3574_v10, 0  ;;  %v114_v10 = vsub.s32 2, %v22402_v7 }
 0x21e   :  { %v22279_v53 = vand.u32 4294901760, %v4564_v33 }
 0x220   :  { %3674 = vmatmul.mubr.f32.vlgmr.msra.gmra.mrb[0].mxu0 %v21347_v1  ;;  %4139 = vmatmul.mubr.f32.vlgmr.msra.gmra.mrb[0].mxu1 %v21347_v1  ;;  %v22294_v16 = vsub.f32 %v4564_v33, %v22279_v53  ;;  %v22423_v33 = vrot.slane %v22404_v0, %v114_v10 }
 0x221   :  { %3691 = vmatpush1.msra.mxu0 %v22249_v63  ;;  %3754 = vmatprep.mubr.f32.mxu0 %v21347_v1 }
 0x222   :  { %3764 = vmatprep.subr.mxu0 %v22138_v62  ;;  %4156 = vmatpush1.msra.mxu1 %v22251_v42  ;;  %v22307_v51 = vand.u32 4294901760, %v22294_v16 }
 0x223   :  { %4219 = vmatprep.mubr.f32.mxu1 %v21347_v1  ;;  %4229 = vmatprep.subr.mxu1 %v22141_v3 }
 0x224   :  { %v4653_v6 = vsub.f32 %v22294_v16, %v22307_v51 }
 0x226   :  { %v22335_v26 = vand.u32 4294901760, %v4653_v6 }
 0x228   :  { %3756 = vmatmul.mubr.f32.vlgmr.msra.gmra.mrb[0].mxu0 %v21347_v1  ;;  %4221 = vmatmul.mubr.f32.vlgmr.msra.gmra.mrb[0].mxu1 %v21347_v1 }
 0x229   :  { %3767 = vmatpush1.msra.mxu0 %v22216_v11  ;;  %3830 = vmatprep.mubr.f32.mxu0 %v21347_v1 }
 0x22a   :  { %3840 = vmatprep.subr.mxu0 %v22099_v46  ;;  %4232 = vmatpush1.msra.mxu1 %v22219_v12 }
 0x22b   :  { %4295 = vmatprep.mubr.f32.mxu1 %v21347_v1  ;;  %4305 = vmatprep.subr.mxu1 %v22101_v61 }
 0x230   :  { %3833 = vmatmul.mubr.f32.vlgmr.msra.gmra.mrb[0].mxu0 %v21347_v1  ;;  %4298 = vmatmul.mubr.f32.vlgmr.msra.gmra.mrb[0].mxu1 %v21347_v1 }
 0x231   :  { %3842 = vmatpush1.msra.mxu0 %v22173_v56  ;;  %3905 = vmatprep.mubr.f32.mxu0 %v21347_v1 }
 0x232   :  { %3918 = vmatprep.subr.mxu0 %v22150_v8  ;;  %4307 = vmatpush1.msra.mxu1 %v22175_v57 }
 0x233   :  { %4370 = vmatprep.mubr.f32.mxu1 %v21347_v1  ;;  %4383 = vmatprep.subr.mxu1 %v22153_v14 }
 0x238   :  { %3909 = vmatmul.mubr.f32.vlgmr.msra.gmra.mrb[0].mxu0 %v21347_v1  ;;  %4374 = vmatmul.mubr.f32.vlgmr.msra.gmra.mrb[0].mxu1 %v21347_v1 }
 0x239   :  { %3922 = vmatpush1.msra.mxu0 %v22228_v19  ;;  %3985 = vmatprep.mubr.f32.mxu0 %v21347_v1 }
 0x23a   :  { %3994 = vmatprep.subr.mxu0 %v22099_v46  ;;  %4387 = vmatpush1.msra.mxu1 %v22231_v20 }
 0x23b   :  { %4450 = vmatprep.mubr.f32.mxu1 %v21347_v1  ;;  %4459 = vmatprep.subr.mxu1 %v22101_v61 }
 0x240   :  { %3987 = vmatmul.mubr.f32.vlgmr.msra.gmra.mrb[0].mxu0 %v21347_v1  ;;  %4452 = vmatmul.mubr.f32.vlgmr.msra.gmra.mrb[0].mxu1 %v21347_v1 }
 0x241   :  { %3996 = vmatpush1.msra.mxu0 %v22173_v56  ;;  %4059 = vmatprep.mubr.f32.mxu0 %v21347_v1 }
 0x242   :  { %4461 = vmatpush1.msra.mxu1 %v22175_v57  ;;  %4524 = vmatprep.mubr.f32.mxu1 %v21347_v1 }
 0x243   :  { %4573 = vmatprep.subr.mxu0 %v22279_v53  ;;  %5038 = vmatprep.subr.mxu1 %v22282_v55 }
 0x248   :  { %4061 = vmatmul.mubr.f32.vlgmr.msra.gmra.mrb[0].mxu0 %v21347_v1  ;;  %4526 = vmatmul.mubr.f32.vlgmr.msra.gmra.mrb[0].mxu1 %v21347_v1 }
 0x249   :  { %4575 = vmatpush1.msra.mxu0 %v22289_v35  ;;  %4638 = vmatprep.mubr.f32.mxu0 %v21347_v1 }
 0x24a   :  { %4655 = vmatprep.subr.mxu0 %v22335_v26  ;;  %5040 = vmatpush1.msra.mxu1 %v22296_v30 }
 0x24b   :  { %5103 = vmatprep.mubr.f32.mxu1 %v21347_v1  ;;  %5120 = vmatprep.subr.mxu1 %v22339_v28 }
 0x24c   :  { %4644 = vmatmul.mubr.f32.vlgmr.msra.gmra.mrb[30].mxu0 %v21347_v1  ;;  %5109 = vmatmul.mubr.f32.vlgmr.msra.gmra.mrb[30].mxu1 %v21347_v1 }
 0x24d   :  { %4661 = vmatpush1.msra.mxu0 %v22345_v36  ;;  %4724 = vmatprep.mubr.f32.mxu0 %v21347_v1 }
 0x24e   :  { %4734 = vmatprep.subr.mxu0 %v22294_v16  ;;  %5126 = vmatpush1.msra.mxu1 %v22349_v37 }
 0x24f   :  { %5189 = vmatprep.mubr.f32.mxu1 %v21347_v1  ;;  %5199 = vmatprep.subr.mxu1 %v22301_v47 }
 0x254   :  { %4726 = vmatmul.mubr.f32.vlgmr.msra.gmra.mrb[30].mxu0 %v21347_v1  ;;  %5191 = vmatmul.mubr.f32.vlgmr.msra.gmra.mrb[30].mxu1 %v21347_v1 }
 0x255   :  { %4737 = vmatpush1.msra.mxu0 %v22304_v58  ;;  %4800 = vmatprep.mubr.f32.mxu0 %v21347_v1 }
 0x256   :  { %4810 = vmatprep.subr.mxu0 %v22279_v53  ;;  %5202 = vmatpush1.msra.mxu1 %v22310_v2 }
 0x257   :  { %5265 = vmatprep.mubr.f32.mxu1 %v21347_v1  ;;  %5275 = vmatprep.subr.mxu1 %v22282_v55 }
 0x25c   :  { %4803 = vmatmul.mubr.f32.vlgmr.msra.gmra.mrb[30].mxu0 %v21347_v1  ;;  %5268 = vmatmul.mubr.f32.vlgmr.msra.gmra.mrb[30].mxu1 %v21347_v1 }
 0x25d   :  { %4812 = vmatpush1.msra.mxu0 %v22289_v35  ;;  %4875 = vmatprep.mubr.f32.mxu0 %v21347_v1 }
 0x25e   :  { %4888 = vmatprep.subr.mxu0 %v22307_v51  ;;  %5277 = vmatpush1.msra.mxu1 %v22296_v30 }
 0x25f   :  { %5340 = vmatprep.mubr.f32.mxu1 %v21347_v1  ;;  %5353 = vmatprep.subr.mxu1 %v22313_v4 }
 0x264   :  { %4879 = vmatmul.mubr.f32.vlgmr.msra.gmra.mrb[30].mxu0 %v21347_v1  ;;  %5344 = vmatmul.mubr.f32.vlgmr.msra.gmra.mrb[30].mxu1 %v21347_v1 }
 0x265   :  { %4892 = vmatpush1.msra.mxu0 %v22320_v9  ;;  %4955 = vmatprep.mubr.f32.mxu0 %v21347_v1 }
 0x266   :  { %4964 = vmatprep.subr.mxu0 %v22279_v53  ;;  %5357 = vmatpush1.msra.mxu1 %v22327_v23 }
 0x267   :  { %5420 = vmatprep.mubr.f32.mxu1 %v21347_v1  ;;  %5429 = vmatprep.subr.mxu1 %v22282_v55 }
 0x26c   :  { %4957 = vmatmul.mubr.f32.vlgmr.msra.gmra.mrb[30].mxu0 %v21347_v1  ;;  %5422 = vmatmul.mubr.f32.vlgmr.msra.gmra.mrb[30].mxu1 %v21347_v1 }
 0x26d   :  { %4966 = vmatpush1.msra.mxu0 %v22289_v35  ;;  %5029 = vmatprep.mubr.f32.mxu0 %v21347_v1 }
 0x26e   :  { %5431 = vmatpush1.msra.mxu1 %v22296_v30  ;;  %5494 = vmatprep.mubr.f32.mxu1 %v21347_v1 }
 0x26f   :  { %5542 = vmatprep.subr.mxu0 %v22099_v46  ;;  %6007 = vmatprep.subr.mxu1 %v22101_v61 }
 0x274   :  { %5031 = vmatmul.mubr.f32.vlgmr.msra.gmra.mrb[30].mxu0 %v21347_v1  ;;  %5496 = vmatmul.mubr.f32.vlgmr.msra.gmra.mrb[30].mxu1 %v21347_v1 }
 0x275   :  { %5544 = vmatpush1.msra.mxu0 %v22173_v56  ;;  %5607 = vmatprep.mubr.f32.mxu0 %v21347_v1 }
 0x276   :  { %5624 = vmatprep.subr.mxu0 %v22177_v60  ;;  %6009 = vmatpush1.msra.mxu1 %v22175_v57 }
 0x277   :  { %6072 = vmatprep.mubr.f32.mxu1 %v21347_v1  ;;  %6089 = vmatprep.subr.mxu1 %v22179_v41 }
 0x31b   :  { %v4062_v40 = vpop.f32.mrb[0].mxu0  ;;  %v4527_v45 = vpop.f32.mrb[0].mxu1 }
 0x31c   :  { %v20287_v15 = vadd.f32 %v4062_v40, %v22409_v21  ;;  %v4064_v29 = vpop.f32.mrb[1].mxu0  ;;  %v4529_v31 = vpop.f32.mrb[1].mxu1  ;;  %v20303_v50 = vadd.f32 %v4527_v45, %v22423_v33  ;;  %v122_v40 = vsub.s32 4, %v22402_v7  ;;  %v126_v45 = vsub.s32 5, %v22402_v7 }
 0x31d   :  { %v20288_v32 = vadd.f32 %v4064_v29, %v22412_v39  ;;  %v20304_v25 = vadd.f32 %v4529_v31, %v22418_v48 }
 0x31e   :  { %v20059_v38 = vmul.f32 -1.442695, %v20287_v15  ;;  %v22432_v5 = vrot.slane %v22404_v0, %v122_v40  ;;  %v22435_v15 = vrot.slane %v22404_v0, %v126_v45 }
 0x31f   :  { %v20060_v43 = vmul.f32 -1.442695, %v20288_v32  ;;  %v20061_v49 = vmul.f32 -1.442695, %v20304_v25 }
 0x320   :  { %21063 = vpow2.f32 %v20059_v38 }
 0x321   :  { %21065 = vpow2.f32 %v20060_v43  ;;  %v134_v43 = vsub.s32 7, %v22402_v7 }
 0x322   :  { %21067 = vpow2.f32 %v20061_v49 }
 0x323   :  { %21069 = vtanh.f32 %v20303_v50 }
 0x32a   :  { %v21064_v52 = vpop.eup %21063 }
 0x32b   :  { %v21066_v54 = vpop.eup %21065  ;;  %v4539_v34 = vadd.f32 1.0, %v21064_v52 }
 0x32c   :  { %v4545_v6 = vadd.f32 1.0, %v21066_v54  ;;  %v21068_v24 = vpop.eup %21067 }
 0x32d   :  { %21071 = vrcp.f32 %v4539_v34  ;;  %v21070_v22 = vpop.eup %21069  ;;  %v4552_v59 = vadd.f32 1.0, %v21068_v24  ;;  %v22442_v24 = vrot.slane %v22404_v0, %v134_v43 }
 0x32e   :  { %21073 = vrcp.f32 %v4545_v6 }
 0x32f   :  { %21075 = vrcp.f32 %v4552_v59 }
 0x337   :  { %v21072_v27 = vpop.eup %21071 }
 0x338   :  { %v21074_v13 = vpop.eup %21073  ;;  %v4556_v44 = vmul.f32 %v21072_v27, %v21070_v22  ;;  %v130_v27 = vsub.s32 6, %v22402_v7 }
 0x339   :  { %v4555_v17 = vmul.f32 0.0, %v21074_v13  ;;  %v21076_v29 = vpop.eup %21075 }
 0x33b   :  { %v22426_v18 = vadd.f32 %v4556_v44, %v4555_v17  ;;  %v22450_v17 = vrot.slane %v22404_v0, %v130_v27 }
 0x33d   :  { %21077 = vtanh.f32 %v22426_v18 }
 0x347   :  { %v21078_v31 = vpop.eup %21077  ;;  %v5032_v32 = vpop.f32.mrb[30].mxu0 }
 0x348   :  { %v5497_v38 = vpop.f32.mrb[30].mxu1  ;;  %v4559_v10 = vmul.f32 %v21078_v31, %v21076_v29  ;;  %v20333_v25 = vadd.f32 %v5032_v32, %v22432_v5  ;;  %v5034_v49 = vpop.f32.mrb[31].mxu0 }
 0x349   :  { %v5499_v50 = vpop.f32.mrb[31].mxu1  ;;  %v20334_v52 = vadd.f32 %v5034_v49, %v22435_v15  ;;  %v20349_v31 = vadd.f32 %v5497_v38, %v22450_v17 }
 0x34a   :  { %v20062_v54 = vmul.f32 -1.442695, %v20333_v25  ;;  %v5539_v34 = vsel %vm3585_vm10, %v4559_v10, 0  ;;  %v20350_v44 = vadd.f32 %v5499_v50, %v22442_v24 }
 0x34b   :  { %v20063_v6 = vmul.f32 -1.442695, %v20334_v52  ;;  %v22444_v22 = vand.u32 4294901760, %v5539_v34 }
 0x34c   :  { %21079 = vpow2.f32 %v20062_v54  ;;  %v20064_v45 = vmul.f32 -1.442695, %v20350_v44 }
 0x34d   :  { %21081 = vpow2.f32 %v20063_v6  ;;  %v5609_v13 = vsub.f32 %v5539_v34, %v22444_v22 }
 0x34e   :  { %21083 = vpow2.f32 %v20064_v45 }
 0x34f   :  { %v5610_v59 = vand.u32 4294901760, %v5609_v13  ;;  %21085 = vtanh.f32 %v20349_v31 }
 0x351   :  { %v5611_v40 = vsub.f32 %v5609_v13, %v5610_v59 }
 0x353   :  { %v5612_v29 = vand.u32 4294901760, %v5611_v40 }
 0x355   :  { %5613 = vmatmul.mubr.f32.vlgmr.msra.gmra.mrb[2].mxu0 %v5612_v29  ;;  %6078 = vmatmul.mubr.f32.vlgmr.msra.gmra.mrb[2].mxu1 %v5612_v29 }
 0x356   :  { %v21080_v32 = vpop.eup %21079  ;;  %5630 = vmatpush1.msra.mxu0 %v22249_v63  ;;  %5693 = vmatprep.mubr.f32.mxu0 %v21347_v1 }
 0x357   :  { %v21082_v7 = vpop.eup %21081  ;;  %v5509_v43 = vadd.f32 1.0, %v21080_v32  ;;  %5703 = vmatprep.subr.mxu0 %v22138_v62  ;;  %6095 = vmatpush1.msra.mxu1 %v22251_v42 }
 0x358   :  { %v5515_v0 = vadd.f32 1.0, %v21082_v7  ;;  %6158 = vmatprep.mubr.f32.mxu1 %v21347_v1  ;;  %6168 = vmatprep.subr.mxu1 %v22141_v3  ;;  %v21084_v38 = vpop.eup %21083 }
 0x359   :  { %21087 = vrcp.f32 %v5509_v43  ;;  %v21086_v10 = vpop.eup %21085  ;;  %v5522_v52 = vadd.f32 1.0, %v21084_v38 }
 0x35a   :  { %21089 = vrcp.f32 %v5515_v0 }
 0x35b   :  { %21091 = vrcp.f32 %v5522_v52 }
 0x35d   :  { %5695 = vmatmul.mubr.f32.vlgmr.msra.gmra.mrb[2].mxu0 %v22444_v22  ;;  %6160 = vmatmul.mubr.f32.vlgmr.msra.gmra.mrb[2].mxu1 %v22444_v22 }
 0x35e   :  { %5706 = vmatpush1.msra.mxu0 %v22216_v11  ;;  %5769 = vmatprep.mubr.f32.mxu0 %v21347_v1 }
 0x35f   :  { %5779 = vmatprep.subr.mxu0 %v22099_v46  ;;  %6171 = vmatpush1.msra.mxu1 %v22219_v12 }
 0x360   :  { %6234 = vmatprep.mubr.f32.mxu1 %v21347_v1  ;;  %6244 = vmatprep.subr.mxu1 %v22101_v61 }
 0x363   :  { %v21088_v25 = vpop.eup %21087 }
 0x364   :  { %v21090_v49 = vpop.eup %21089  ;;  %v5526_v50 = vmul.f32 %v21088_v25, %v21086_v10 }
 0x365   :  { %v5525_v54 = vmul.f32 0.0, %v21090_v49  ;;  %5772 = vmatmul.mubr.f32.vlgmr.msra.gmra.mrb[2].mxu0 %v5609_v13  ;;  %6237 = vmatmul.mubr.f32.vlgmr.msra.gmra.mrb[2].mxu1 %v5609_v13  ;;  %v21092_v6 = vpop.eup %21091 }
 0x366   :  { %5781 = vmatpush1.msra.mxu0 %v22173_v56  ;;  %5844 = vmatprep.mubr.f32.mxu0 %v21347_v1 }
 0x367   :  { %v22469_v34 = vadd.f32 %v5526_v50, %v5525_v54  ;;  %5857 = vmatprep.subr.mxu0 %v22150_v8  ;;  %6246 = vmatpush1.msra.mxu1 %v22175_v57 }
 0x368   :  { %6309 = vmatprep.mubr.f32.mxu1 %v21347_v1  ;;  %6322 = vmatprep.subr.mxu1 %v22153_v14 }
 0x369   :  { %21093 = vtanh.f32 %v22469_v34 }
 0x36d   :  { %5848 = vmatmul.mubr.f32.vlgmr.msra.gmra.mrb[2].mxu0 %v5610_v59  ;;  %6313 = vmatmul.mubr.f32.vlgmr.msra.gmra.mrb[2].mxu1 %v5610_v59 }
 0x36e   :  { %5861 = vmatpush1.msra.mxu0 %v22228_v19  ;;  %5924 = vmatprep.mubr.f32.mxu0 %v21347_v1 }
 0x36f   :  { %5933 = vmatprep.subr.mxu0 %v22099_v46  ;;  %6326 = vmatpush1.msra.mxu1 %v22231_v20 }
 0x370   :  { %6389 = vmatprep.mubr.f32.mxu1 %v21347_v1  ;;  %6398 = vmatprep.subr.mxu1 %v22101_v61 }
 0x373   :  { %v21094_v27 = vpop.eup %21093 }
 0x374   :  { %v5529_v13 = vmul.f32 %v21094_v27, %v21092_v6 }
 0x375   :  { %5926 = vmatmul.mubr.f32.vlgmr.msra.gmra.mrb[2].mxu0 %v22444_v22  ;;  %6391 = vmatmul.mubr.f32.vlgmr.msra.gmra.mrb[2].mxu1 %v22444_v22 }
 0x376   :  { %5935 = vmatpush1.msra.mxu0 %v22173_v56  ;;  %5998 = vmatprep.mubr.f32.mxu0 %v21347_v1  ;;  %v6500_v44 = vsel %vm3585_vm10, %v5529_v13, 0 }
 0x377   :  { %6400 = vmatpush1.msra.mxu1 %v22175_v57  ;;  %6463 = vmatprep.mubr.f32.mxu1 %v21347_v1  ;;  %v6569_v59 = vand.u32 4294901760, %v6500_v44 }
 0x378   :  { %6503 = vmatprep.subr.mxu0 %v22279_v53  ;;  %6968 = vmatprep.subr.mxu1 %v22282_v55 }
 0x379   :  { %v6570_v40 = vsub.f32 %v6500_v44, %v6569_v59 }
 0x37b   :  { %v6571_v45 = vand.u32 4294901760, %v6570_v40 }
 0x37d   :  { %6000 = vmatmul.mubr.f32.vlgmr.msra.gmra.mrb[2].mxu0 %v22444_v22  ;;  %6465 = vmatmul.mubr.f32.vlgmr.msra.gmra.mrb[2].mxu1 %v22444_v22  ;;  %v6572_v29 = vsub.f32 %v6570_v40, %v6571_v45 }
 0x37e   :  { %6505 = vmatpush1.msra.mxu0 %v22289_v35  ;;  %6568 = vmatprep.mubr.f32.mxu0 %v21347_v1 }
 0x37f   :  { %6585 = vmatprep.subr.mxu0 %v22335_v26  ;;  %6970 = vmatpush1.msra.mxu1 %v22296_v30  ;;  %v6573_v31 = vand.u32 4294901760, %v6572_v29 }
 0x380   :  { %7033 = vmatprep.mubr.f32.mxu1 %v21347_v1  ;;  %7050 = vmatprep.subr.mxu1 %v22339_v28 }
 0x381   :  { %6574 = vmatmul.mubr.f32.vlgmr.msra.gmra.mrb[28].mxu0 %v6573_v31  ;;  %7039 = vmatmul.mubr.f32.vlgmr.msra.gmra.mrb[28].mxu1 %v6573_v31 }
 0x382   :  { %6591 = vmatpush1.msra.mxu0 %v22345_v36  ;;  %6654 = vmatprep.mubr.f32.mxu0 %v21347_v1 }
 0x383   :  { %6664 = vmatprep.subr.mxu0 %v22294_v16  ;;  %7056 = vmatpush1.msra.mxu1 %v22349_v37 }
 0x384   :  { %7119 = vmatprep.mubr.f32.mxu1 %v21347_v1  ;;  %7129 = vmatprep.subr.mxu1 %v22301_v47 }
 0x389   :  { %6656 = vmatmul.mubr.f32.vlgmr.msra.gmra.mrb[28].mxu0 %v6569_v59  ;;  %7121 = vmatmul.mubr.f32.vlgmr.msra.gmra.mrb[28].mxu1 %v6569_v59 }
 0x38a   :  { %6667 = vmatpush1.msra.mxu0 %v22304_v58  ;;  %6730 = vmatprep.mubr.f32.mxu0 %v21347_v1 }
 0x38b   :  { %6740 = vmatprep.subr.mxu0 %v22279_v53  ;;  %7132 = vmatpush1.msra.mxu1 %v22310_v2 }
 0x38c   :  { %7195 = vmatprep.mubr.f32.mxu1 %v21347_v1  ;;  %7205 = vmatprep.subr.mxu1 %v22282_v55 }
 0x391   :  { %6733 = vmatmul.mubr.f32.vlgmr.msra.gmra.mrb[28].mxu0 %v6570_v40  ;;  %7198 = vmatmul.mubr.f32.vlgmr.msra.gmra.mrb[28].mxu1 %v6570_v40 }
 0x392   :  { %6742 = vmatpush1.msra.mxu0 %v22289_v35  ;;  %6805 = vmatprep.mubr.f32.mxu0 %v21347_v1 }
 0x393   :  { %6818 = vmatprep.subr.mxu0 %v22307_v51  ;;  %7207 = vmatpush1.msra.mxu1 %v22296_v30 }
 0x394   :  { %7270 = vmatprep.mubr.f32.mxu1 %v21347_v1  ;;  %7283 = vmatprep.subr.mxu1 %v22313_v4 }
 0x399   :  { %6809 = vmatmul.mubr.f32.vlgmr.msra.gmra.mrb[28].mxu0 %v6571_v45  ;;  %7274 = vmatmul.mubr.f32.vlgmr.msra.gmra.mrb[28].mxu1 %v6571_v45 }
 0x39a   :  { %6822 = vmatpush1.msra.mxu0 %v22320_v9  ;;  %6885 = vmatprep.mubr.f32.mxu0 %v21347_v1 }
 0x39b   :  { %6894 = vmatprep.subr.mxu0 %v22279_v53  ;;  %7287 = vmatpush1.msra.mxu1 %v22327_v23 }
 0x39c   :  { %7350 = vmatprep.mubr.f32.mxu1 %v21347_v1  ;;  %7359 = vmatprep.subr.mxu1 %v22282_v55 }
 0x3a1   :  { %6887 = vmatmul.mubr.f32.vlgmr.msra.gmra.mrb[28].mxu0 %v6569_v59  ;;  %7352 = vmatmul.mubr.f32.vlgmr.msra.gmra.mrb[28].mxu1 %v6569_v59 }
 0x3a2   :  { %6896 = vmatpush1.msra.mxu0 %v22289_v35  ;;  %6959 = vmatprep.mubr.f32.mxu0 %v21347_v1 }
 0x3a3   :  { %7361 = vmatpush1.msra.mxu1 %v22296_v30  ;;  %7424 = vmatprep.mubr.f32.mxu1 %v21347_v1 }
 0x3a4   :  { %7472 = vmatprep.subr.mxu0 %v22099_v46  ;;  %7937 = vmatprep.subr.mxu1 %v22101_v61 }
 0x3a9   :  { %6961 = vmatmul.mubr.f32.vlgmr.msra.gmra.mrb[28].mxu0 %v6569_v59  ;;  %7426 = vmatmul.mubr.f32.vlgmr.msra.gmra.mrb[28].mxu1 %v6569_v59 }
 0x3aa   :  { %7474 = vmatpush1.msra.mxu0 %v22173_v56  ;;  %7537 = vmatprep.mubr.f32.mxu0 %v21347_v1 }
 0x3ab   :  { %7554 = vmatprep.subr.mxu0 %v22177_v60  ;;  %7939 = vmatpush1.msra.mxu1 %v22175_v57 }
 0x3ac   :  { %8002 = vmatprep.mubr.f32.mxu1 %v21347_v1  ;;  %8019 = vmatprep.subr.mxu1 %v22179_v41 }
 0x450   :  { %v6001_v22 = vpop.f32.mrb[2].mxu0  ;;  %v6466_v32 = vpop.f32.mrb[2].mxu1 }
 0x451   :  { %v20289_v7 = vadd.f32 %v6001_v22, %v22409_v21  ;;  %v6003_v43 = vpop.f32.mrb[3].mxu0  ;;  %v6468_v0 = vpop.f32.mrb[3].mxu1  ;;  %v20305_v52 = vadd.f32 %v6466_v32, %v22423_v33 }
 0x452   :  { %v20290_v38 = vadd.f32 %v6003_v43, %v22412_v39  ;;  %v20306_v49 = vadd.f32 %v6468_v0, %v22418_v48 }
 0x453   :  { %v20065_v10 = vmul.f32 -1.442695, %v20289_v7 }
 0x454   :  { %v20066_v25 = vmul.f32 -1.442695, %v20290_v38  ;;  %v20067_v50 = vmul.f32 -1.442695, %v20306_v49 }
 0x455   :  { %21095 = vpow2.f32 %v20065_v10 }
 0x456   :  { %21097 = vpow2.f32 %v20066_v25 }
 0x457   :  { %21099 = vpow2.f32 %v20067_v50 }
 0x458   :  { %21101 = vtanh.f32 %v20305_v52 }
 0x45f   :  { %v21096_v54 = vpop.eup %21095 }
 0x460   :  { %v21098_v6 = vpop.eup %21097  ;;  %v6478_v27 = vadd.f32 1.0, %v21096_v54 }
 0x461   :  { %v6484_v13 = vadd.f32 1.0, %v21098_v6  ;;  %v21100_v44 = vpop.eup %21099 }
 0x462   :  { %21103 = vrcp.f32 %v6478_v27  ;;  %v21102_v59 = vpop.eup %21101  ;;  %v6491_v31 = vadd.f32 1.0, %v21100_v44 }
 0x463   :  { %21105 = vrcp.f32 %v6484_v13 }
 0x464   :  { %21107 = vrcp.f32 %v6491_v31 }
 0x46c   :  { %v21104_v40 = vpop.eup %21103 }
 0x46d   :  { %v21106_v45 = vpop.eup %21105  ;;  %v6495_v29 = vmul.f32 %v21104_v40, %v21102_v59 }
 0x46e   :  { %v6494_v22 = vmul.f32 %v21106_v45, %v22426_v18  ;;  %v21108_v32 = vpop.eup %21107 }
 0x470   :  { %v22540_v7 = vadd.f32 %v6495_v29, %v6494_v22 }
 0x472   :  { %21109 = vtanh.f32 %v22540_v7 }
 0x47c   :  { %v21110_v43 = vpop.eup %21109  ;;  %v6962_v0 = vpop.f32.mrb[28].mxu0 }
 0x47d   :  { %v7427_v38 = vpop.f32.mrb[28].mxu1  ;;  %v6498_v10 = vmul.f32 %v21110_v43, %v21108_v32  ;;  %v20331_v25 = vadd.f32 %v6962_v0, %v22432_v5  ;;  %v6964_v49 = vpop.f32.mrb[29].mxu0 }
 0x47e   :  { %v7429_v50 = vpop.f32.mrb[29].mxu1  ;;  %v20332_v52 = vadd.f32 %v6964_v49, %v22435_v15  ;;  %v20347_v31 = vadd.f32 %v7427_v38, %v22450_v17 }
 0x47f   :  { %v20068_v54 = vmul.f32 -1.442695, %v20331_v25  ;;  %v7469_v6 = vsel %vm3585_vm10, %v6498_v10, 0  ;;  %v20348_v44 = vadd.f32 %v7429_v50, %v22442_v24 }
 0x480   :  { %v20069_v18 = vmul.f32 -1.442695, %v20332_v52  ;;  %v22546_v27 = vand.u32 4294901760, %v7469_v6 }
 0x481   :  { %21111 = vpow2.f32 %v20068_v54  ;;  %v20070_v45 = vmul.f32 -1.442695, %v20348_v44 }
 0x482   :  { %21113 = vpow2.f32 %v20069_v18  ;;  %v7539_v13 = vsub.f32 %v7469_v6, %v22546_v27 }
 0x483   :  { %21115 = vpow2.f32 %v20070_v45 }
 0x484   :  { %v7540_v59 = vand.u32 4294901760, %v7539_v13  ;;  %21117 = vtanh.f32 %v20347_v31 }
 0x486   :  { %v7541_v40 = vsub.f32 %v7539_v13, %v7540_v59 }
 0x488   :  { %v7542_v29 = vand.u32 4294901760, %v7541_v40 }
 0x48a   :  { %7543 = vmatmul.mubr.f32.vlgmr.msra.gmra.mrb[4].mxu0 %v7542_v29  ;;  %8008 = vmatmul.mubr.f32.vlgmr.msra.gmra.mrb[4].mxu1 %v7542_v29 }
 0x48b   :  { %v21112_v22 = vpop.eup %21111  ;;  %7560 = vmatpush1.msra.mxu0 %v22249_v63  ;;  %7623 = vmatprep.mubr.f32.mxu0 %v21347_v1 }
 0x48c   :  { %v21114_v32 = vpop.eup %21113  ;;  %v7439_v43 = vadd.f32 1.0, %v21112_v22  ;;  %7633 = vmatprep.subr.mxu0 %v22138_v62  ;;  %8025 = vmatpush1.msra.mxu1 %v22251_v42 }
 0x48d   :  { %v7445_v0 = vadd.f32 1.0, %v21114_v32  ;;  %8088 = vmatprep.mubr.f32.mxu1 %v21347_v1  ;;  %8098 = vmatprep.subr.mxu1 %v22141_v3  ;;  %v21116_v38 = vpop.eup %21115 }
 0x48e   :  { %21119 = vrcp.f32 %v7439_v43  ;;  %v21118_v10 = vpop.eup %21117  ;;  %v7452_v52 = vadd.f32 1.0, %v21116_v38 }
 0x48f   :  { %21121 = vrcp.f32 %v7445_v0 }
 0x490   :  { %21123 = vrcp.f32 %v7452_v52 }
 0x492   :  { %7625 = vmatmul.mubr.f32.vlgmr.msra.gmra.mrb[4].mxu0 %v22546_v27  ;;  %8090 = vmatmul.mubr.f32.vlgmr.msra.gmra.mrb[4].mxu1 %v22546_v27 }
 0x493   :  { %7636 = vmatpush1.msra.mxu0 %v22216_v11  ;;  %7699 = vmatprep.mubr.f32.mxu0 %v21347_v1 }
 0x494   :  { %7709 = vmatprep.subr.mxu0 %v22099_v46  ;;  %8101 = vmatpush1.msra.mxu1 %v22219_v12 }
 0x495   :  { %8164 = vmatprep.mubr.f32.mxu1 %v21347_v1  ;;  %8174 = vmatprep.subr.mxu1 %v22101_v61 }
 0x498   :  { %v21120_v25 = vpop.eup %21119 }
 0x499   :  { %v21122_v49 = vpop.eup %21121  ;;  %v7456_v50 = vmul.f32 %v21120_v25, %v21118_v10 }
 0x49a   :  { %v7455_v54 = vmul.f32 %v21122_v49, %v22469_v34  ;;  %7702 = vmatmul.mubr.f32.vlgmr.msra.gmra.mrb[4].mxu0 %v7539_v13  ;;  %8167 = vmatmul.mubr.f32.vlgmr.msra.gmra.mrb[4].mxu1 %v7539_v13  ;;  %v21124_v34 = vpop.eup %21123 }
 0x49b   :  { %7711 = vmatpush1.msra.mxu0 %v22173_v56  ;;  %7774 = vmatprep.mubr.f32.mxu0 %v21347_v1 }
 0x49c   :  { %v22568_v6 = vadd.f32 %v7456_v50, %v7455_v54  ;;  %7787 = vmatprep.subr.mxu0 %v22150_v8  ;;  %8176 = vmatpush1.msra.mxu1 %v22175_v57 }
 0x49d   :  { %8239 = vmatprep.mubr.f32.mxu1 %v21347_v1  ;;  %8252 = vmatprep.subr.mxu1 %v22153_v14 }
 0x49e   :  { %21125 = vtanh.f32 %v22568_v6 }
 0x4a2   :  { %7778 = vmatmul.mubr.f32.vlgmr.msra.gmra.mrb[4].mxu0 %v7540_v59  ;;  %8243 = vmatmul.mubr.f32.vlgmr.msra.gmra.mrb[4].mxu1 %v7540_v59 }
 0x4a3   :  { %7791 = vmatpush1.msra.mxu0 %v22228_v19  ;;  %7854 = vmatprep.mubr.f32.mxu0 %v21347_v1 }
 0x4a4   :  { %7863 = vmatprep.subr.mxu0 %v22099_v46  ;;  %8256 = vmatpush1.msra.mxu1 %v22231_v20 }
 0x4a5   :  { %8319 = vmatprep.mubr.f32.mxu1 %v21347_v1  ;;  %8328 = vmatprep.subr.mxu1 %v22101_v61 }
 0x4a8   :  { %v21126_v18 = vpop.eup %21125 }
 0x4a9   :  { %v7459_v13 = vmul.f32 %v21126_v18, %v21124_v34 }
 0x4aa   :  { %7856 = vmatmul.mubr.f32.vlgmr.msra.gmra.mrb[4].mxu0 %v22546_v27  ;;  %8321 = vmatmul.mubr.f32.vlgmr.msra.gmra.mrb[4].mxu1 %v22546_v27 }
 0x4ab   :  { %7865 = vmatpush1.msra.mxu0 %v22173_v56  ;;  %7928 = vmatprep.mubr.f32.mxu0 %v21347_v1  ;;  %v8430_v44 = vsel %vm3585_vm10, %v7459_v13, 0 }
 0x4ac   :  { %8330 = vmatpush1.msra.mxu1 %v22175_v57  ;;  %8393 = vmatprep.mubr.f32.mxu1 %v21347_v1  ;;  %v8499_v59 = vand.u32 4294901760, %v8430_v44 }
 0x4ad   :  { %8433 = vmatprep.subr.mxu0 %v22279_v53  ;;  %8898 = vmatprep.subr.mxu1 %v22282_v55 }
 0x4ae   :  { %v8500_v40 = vsub.f32 %v8430_v44, %v8499_v59 }
 0x4b0   :  { %v8501_v45 = vand.u32 4294901760, %v8500_v40 }
 0x4b2   :  { %7930 = vmatmul.mubr.f32.vlgmr.msra.gmra.mrb[4].mxu0 %v22546_v27  ;;  %8395 = vmatmul.mubr.f32.vlgmr.msra.gmra.mrb[4].mxu1 %v22546_v27  ;;  %v8502_v29 = vsub.f32 %v8500_v40, %v8501_v45 }
 0x4b3   :  { %8435 = vmatpush1.msra.mxu0 %v22289_v35  ;;  %8498 = vmatprep.mubr.f32.mxu0 %v21347_v1 }
 0x4b4   :  { %8515 = vmatprep.subr.mxu0 %v22335_v26  ;;  %8900 = vmatpush1.msra.mxu1 %v22296_v30  ;;  %v8503_v31 = vand.u32 4294901760, %v8502_v29 }
 0x4b5   :  { %8963 = vmatprep.mubr.f32.mxu1 %v21347_v1  ;;  %8980 = vmatprep.subr.mxu1 %v22339_v28 }
 0x4b6   :  { %8504 = vmatmul.mubr.f32.vlgmr.msra.gmra.mrb[26].mxu0 %v8503_v31  ;;  %8969 = vmatmul.mubr.f32.vlgmr.msra.gmra.mrb[26].mxu1 %v8503_v31 }
 0x4b7   :  { %8521 = vmatpush1.msra.mxu0 %v22345_v36  ;;  %8584 = vmatprep.mubr.f32.mxu0 %v21347_v1 }
 0x4b8   :  { %8594 = vmatprep.subr.mxu0 %v22294_v16  ;;  %8986 = vmatpush1.msra.mxu1 %v22349_v37 }
 0x4b9   :  { %9049 = vmatprep.mubr.f32.mxu1 %v21347_v1  ;;  %9059 = vmatprep.subr.mxu1 %v22301_v47 }
 0x4be   :  { %8586 = vmatmul.mubr.f32.vlgmr.msra.gmra.mrb[26].mxu0 %v8499_v59  ;;  %9051 = vmatmul.mubr.f32.vlgmr.msra.gmra.mrb[26].mxu1 %v8499_v59 }
 0x4bf   :  { %8597 = vmatpush1.msra.mxu0 %v22304_v58  ;;  %8660 = vmatprep.mubr.f32.mxu0 %v21347_v1 }
 0x4c0   :  { %8670 = vmatprep.subr.mxu0 %v22279_v53  ;;  %9062 = vmatpush1.msra.mxu1 %v22310_v2 }
 0x4c1   :  { %9125 = vmatprep.mubr.f32.mxu1 %v21347_v1  ;;  %9135 = vmatprep.subr.mxu1 %v22282_v55 }
 0x4c6   :  { %8663 = vmatmul.mubr.f32.vlgmr.msra.gmra.mrb[26].mxu0 %v8500_v40  ;;  %9128 = vmatmul.mubr.f32.vlgmr.msra.gmra.mrb[26].mxu1 %v8500_v40 }
 0x4c7   :  { %8672 = vmatpush1.msra.mxu0 %v22289_v35  ;;  %8735 = vmatprep.mubr.f32.mxu0 %v21347_v1 }
 0x4c8   :  { %8748 = vmatprep.subr.mxu0 %v22307_v51  ;;  %9137 = vmatpush1.msra.mxu1 %v22296_v30 }
 0x4c9   :  { %9200 = vmatprep.mubr.f32.mxu1 %v21347_v1  ;;  %9213 = vmatprep.subr.mxu1 %v22313_v4 }
 0x4ce   :  { %8739 = vmatmul.mubr.f32.vlgmr.msra.gmra.mrb[26].mxu0 %v8501_v45  ;;  %9204 = vmatmul.mubr.f32.vlgmr.msra.gmra.mrb[26].mxu1 %v8501_v45 }
 0x4cf   :  { %8752 = vmatpush1.msra.mxu0 %v22320_v9  ;;  %8815 = vmatprep.mubr.f32.mxu0 %v21347_v1 }
 0x4d0   :  { %8824 = vmatprep.subr.mxu0 %v22279_v53  ;;  %9217 = vmatpush1.msra.mxu1 %v22327_v23 }
 0x4d1   :  { %9280 = vmatprep.mubr.f32.mxu1 %v21347_v1  ;;  %9289 = vmatprep.subr.mxu1 %v22282_v55 }
 0x4d6   :  { %8817 = vmatmul.mubr.f32.vlgmr.msra.gmra.mrb[26].mxu0 %v8499_v59  ;;  %9282 = vmatmul.mubr.f32.vlgmr.msra.gmra.mrb[26].mxu1 %v8499_v59 }
 0x4d7   :  { %8826 = vmatpush1.msra.mxu0 %v22289_v35  ;;  %8889 = vmatprep.mubr.f32.mxu0 %v21347_v1 }
 0x4d8   :  { %9291 = vmatpush1.msra.mxu1 %v22296_v30  ;;  %9354 = vmatprep.mubr.f32.mxu1 %v21347_v1 }
 0x4d9   :  { %9402 = vmatprep.subr.mxu0 %v22099_v46  ;;  %9867 = vmatprep.subr.mxu1 %v22101_v61 }
 0x4de   :  { %8891 = vmatmul.mubr.f32.vlgmr.msra.gmra.mrb[26].mxu0 %v8499_v59  ;;  %9356 = vmatmul.mubr.f32.vlgmr.msra.gmra.mrb[26].mxu1 %v8499_v59 }
 0x4df   :  { %9404 = vmatpush1.msra.mxu0 %v22173_v56  ;;  %9467 = vmatprep.mubr.f32.mxu0 %v21347_v1 }
 0x4e0   :  { %9484 = vmatprep.subr.mxu0 %v22177_v60  ;;  %9869 = vmatpush1.msra.mxu1 %v22175_v57 }
 0x4e1   :  { %9932 = vmatprep.mubr.f32.mxu1 %v21347_v1  ;;  %9949 = vmatprep.subr.mxu1 %v22179_v41 }
 0x585   :  { %v7931_v27 = vpop.f32.mrb[4].mxu0  ;;  %v8396_v22 = vpop.f32.mrb[4].mxu1 }
 0x586   :  { %v20291_v32 = vadd.f32 %v7931_v27, %v22409_v21  ;;  %v7933_v43 = vpop.f32.mrb[5].mxu0  ;;  %v8398_v0 = vpop.f32.mrb[5].mxu1  ;;  %v20307_v52 = vadd.f32 %v8396_v22, %v22423_v33 }
 0x587   :  { %v20292_v38 = vadd.f32 %v7933_v43, %v22412_v39  ;;  %v20308_v49 = vadd.f32 %v8398_v0, %v22418_v48 }
 0x588   :  { %v20071_v10 = vmul.f32 -1.442695, %v20291_v32 }
 0x589   :  { %v20072_v25 = vmul.f32 -1.442695, %v20292_v38  ;;  %v20073_v50 = vmul.f32 -1.442695, %v20308_v49 }
 0x58a   :  { %21127 = vpow2.f32 %v20071_v10 }
 0x58b   :  { %21129 = vpow2.f32 %v20072_v25 }
 0x58c   :  { %21131 = vpow2.f32 %v20073_v50 }
 0x58d   :  { %21133 = vtanh.f32 %v20307_v52 }
 0x594   :  { %v21128_v54 = vpop.eup %21127 }
 0x595   :  { %v21130_v34 = vpop.eup %21129  ;;  %v8408_v18 = vadd.f32 1.0, %v21128_v54 }
 0x596   :  { %v8414_v13 = vadd.f32 1.0, %v21130_v34  ;;  %v21132_v44 = vpop.eup %21131 }
 0x597   :  { %21135 = vrcp.f32 %v8408_v18  ;;  %v21134_v59 = vpop.eup %21133  ;;  %v8421_v31 = vadd.f32 1.0, %v21132_v44 }
 0x598   :  { %21137 = vrcp.f32 %v8414_v13 }
 0x599   :  { %21139 = vrcp.f32 %v8421_v31 }
 0x5a1   :  { %v21136_v40 = vpop.eup %21135 }
 0x5a2   :  { %v21138_v45 = vpop.eup %21137  ;;  %v8425_v29 = vmul.f32 %v21136_v40, %v21134_v59 }
 0x5a3   :  { %v8424_v27 = vmul.f32 %v21138_v45, %v22540_v7  ;;  %v21140_v22 = vpop.eup %21139 }
 0x5a5   :  { %v22639_v32 = vadd.f32 %v8425_v29, %v8424_v27 }
 0x5a7   :  { %21141 = vtanh.f32 %v22639_v32 }
 0x5b1   :  { %v21142_v43 = vpop.eup %21141  ;;  %v8892_v0 = vpop.f32.mrb[26].mxu0 }
 0x5b2   :  { %v9357_v38 = vpop.f32.mrb[26].mxu1  ;;  %v8428_v10 = vmul.f32 %v21142_v43, %v21140_v22  ;;  %v20329_v25 = vadd.f32 %v8892_v0, %v22432_v5  ;;  %v8894_v49 = vpop.f32.mrb[27].mxu0 }
 0x5b3   :  { %v9359_v50 = vpop.f32.mrb[27].mxu1  ;;  %v20330_v52 = vadd.f32 %v8894_v49, %v22435_v15  ;;  %v20345_v31 = vadd.f32 %v9357_v38, %v22450_v17 }
 0x5b4   :  { %v20074_v54 = vmul.f32 -1.442695, %v20329_v25  ;;  %v9399_v34 = vsel %vm3585_vm10, %v8428_v10, 0  ;;  %v20346_v44 = vadd.f32 %v9359_v50, %v22442_v24 }
 0x5b5   :  { %v20075_v7 = vmul.f32 -1.442695, %v20330_v52  ;;  %v22645_v18 = vand.u32 4294901760, %v9399_v34 }
 0x5b6   :  { %21143 = vpow2.f32 %v20074_v54  ;;  %v20076_v45 = vmul.f32 -1.442695, %v20346_v44 }
 0x5b7   :  { %21145 = vpow2.f32 %v20075_v7  ;;  %v9469_v13 = vsub.f32 %v9399_v34, %v22645_v18 }
 0x5b8   :  { %21147 = vpow2.f32 %v20076_v45 }
 0x5b9   :  { %v9470_v59 = vand.u32 4294901760, %v9469_v13  ;;  %21149 = vtanh.f32 %v20345_v31 }
 0x5bb   :  { %v9471_v40 = vsub.f32 %v9469_v13, %v9470_v59 }
 0x5bd   :  { %v9472_v29 = vand.u32 4294901760, %v9471_v40 }
 0x5bf   :  { %9473 = vmatmul.mubr.f32.vlgmr.msra.gmra.mrb[6].mxu0 %v9472_v29  ;;  %9938 = vmatmul.mubr.f32.vlgmr.msra.gmra.mrb[6].mxu1 %v9472_v29 }
 0x5c0   :  { %v21144_v27 = vpop.eup %21143  ;;  %9490 = vmatpush1.msra.mxu0 %v22249_v63  ;;  %9553 = vmatprep.mubr.f32.mxu0 %v21347_v1 }
 0x5c1   :  { %v21146_v22 = vpop.eup %21145  ;;  %v9369_v43 = vadd.f32 1.0, %v21144_v27  ;;  %9563 = vmatprep.subr.mxu0 %v22138_v62  ;;  %9955 = vmatpush1.msra.mxu1 %v22251_v42 }
 0x5c2   :  { %v9375_v0 = vadd.f32 1.0, %v21146_v22  ;;  %10018 = vmatprep.mubr.f32.mxu1 %v21347_v1  ;;  %10028 = vmatprep.subr.mxu1 %v22141_v3  ;;  %v21148_v38 = vpop.eup %21147 }
 0x5c3   :  { %21151 = vrcp.f32 %v9369_v43  ;;  %v21150_v10 = vpop.eup %21149  ;;  %v9382_v52 = vadd.f32 1.0, %v21148_v38 }
 0x5c4   :  { %21153 = vrcp.f32 %v9375_v0 }
 0x5c5   :  { %21155 = vrcp.f32 %v9382_v52 }
 0x5c7   :  { %9555 = vmatmul.mubr.f32.vlgmr.msra.gmra.mrb[6].mxu0 %v22645_v18  ;;  %10020 = vmatmul.mubr.f32.vlgmr.msra.gmra.mrb[6].mxu1 %v22645_v18 }
 0x5c8   :  { %9566 = vmatpush1.msra.mxu0 %v22216_v11  ;;  %9629 = vmatprep.mubr.f32.mxu0 %v21347_v1 }
 0x5c9   :  { %9639 = vmatprep.subr.mxu0 %v22099_v46  ;;  %10031 = vmatpush1.msra.mxu1 %v22219_v12 }
 0x5ca   :  { %10094 = vmatprep.mubr.f32.mxu1 %v21347_v1  ;;  %10104 = vmatprep.subr.mxu1 %v22101_v61 }
 0x5cd   :  { %v21152_v25 = vpop.eup %21151 }
 0x5ce   :  { %v21154_v49 = vpop.eup %21153  ;;  %v9386_v50 = vmul.f32 %v21152_v25, %v21150_v10 }
 0x5cf   :  { %v9385_v54 = vmul.f32 %v21154_v49, %v22568_v6  ;;  %9632 = vmatmul.mubr.f32.vlgmr.msra.gmra.mrb[6].mxu0 %v9469_v13  ;;  %10097 = vmatmul.mubr.f32.vlgmr.msra.gmra.mrb[6].mxu1 %v9469_v13  ;;  %v21156_v6 = vpop.eup %21155 }
 0x5d0   :  { %9641 = vmatpush1.msra.mxu0 %v22173_v56  ;;  %9704 = vmatprep.mubr.f32.mxu0 %v21347_v1 }
 0x5d1   :  { %v22667_v34 = vadd.f32 %v9386_v50, %v9385_v54  ;;  %9717 = vmatprep.subr.mxu0 %v22150_v8  ;;  %10106 = vmatpush1.msra.mxu1 %v22175_v57 }
 0x5d2   :  { %10169 = vmatprep.mubr.f32.mxu1 %v21347_v1  ;;  %10182 = vmatprep.subr.mxu1 %v22153_v14 }
 0x5d3   :  { %21157 = vtanh.f32 %v22667_v34 }
 0x5d7   :  { %9708 = vmatmul.mubr.f32.vlgmr.msra.gmra.mrb[6].mxu0 %v9470_v59  ;;  %10173 = vmatmul.mubr.f32.vlgmr.msra.gmra.mrb[6].mxu1 %v9470_v59 }
 0x5d8   :  { %9721 = vmatpush1.msra.mxu0 %v22228_v19  ;;  %9784 = vmatprep.mubr.f32.mxu0 %v21347_v1 }
 0x5d9   :  { %9793 = vmatprep.subr.mxu0 %v22099_v46  ;;  %10186 = vmatpush1.msra.mxu1 %v22231_v20 }
 0x5da   :  { %10249 = vmatprep.mubr.f32.mxu1 %v21347_v1  ;;  %10258 = vmatprep.subr.mxu1 %v22101_v61 }
 0x5dd   :  { %v21158_v7 = vpop.eup %21157 }
 0x5de   :  { %v9389_v13 = vmul.f32 %v21158_v7, %v21156_v6 }
 0x5df   :  { %9786 = vmatmul.mubr.f32.vlgmr.msra.gmra.mrb[6].mxu0 %v22645_v18  ;;  %10251 = vmatmul.mubr.f32.vlgmr.msra.gmra.mrb[6].mxu1 %v22645_v18 }
 0x5e0   :  { %9795 = vmatpush1.msra.mxu0 %v22173_v56  ;;  %9858 = vmatprep.mubr.f32.mxu0 %v21347_v1  ;;  %v10360_v44 = vsel %vm3585_vm10, %v9389_v13, 0 }
 0x5e1   :  { %10260 = vmatpush1.msra.mxu1 %v22175_v57  ;;  %10323 = vmatprep.mubr.f32.mxu1 %v21347_v1  ;;  %v10429_v59 = vand.u32 4294901760, %v10360_v44 }
 0x5e2   :  { %10363 = vmatprep.subr.mxu0 %v22279_v53  ;;  %10828 = vmatprep.subr.mxu1 %v22282_v55 }
 0x5e3   :  { %v10430_v40 = vsub.f32 %v10360_v44, %v10429_v59 }
 0x5e5   :  { %v10431_v45 = vand.u32 4294901760, %v10430_v40 }
 0x5e7   :  { %9860 = vmatmul.mubr.f32.vlgmr.msra.gmra.mrb[6].mxu0 %v22645_v18  ;;  %10325 = vmatmul.mubr.f32.vlgmr.msra.gmra.mrb[6].mxu1 %v22645_v18  ;;  %v10432_v29 = vsub.f32 %v10430_v40, %v10431_v45 }
 0x5e8   :  { %10365 = vmatpush1.msra.mxu0 %v22289_v35  ;;  %10428 = vmatprep.mubr.f32.mxu0 %v21347_v1 }
 0x5e9   :  { %10445 = vmatprep.subr.mxu0 %v22335_v26  ;;  %10830 = vmatpush1.msra.mxu1 %v22296_v30  ;;  %v10433_v31 = vand.u32 4294901760, %v10432_v29 }
 0x5ea   :  { %10893 = vmatprep.mubr.f32.mxu1 %v21347_v1  ;;  %10910 = vmatprep.subr.mxu1 %v22339_v28 }
 0x5eb   :  { %10434 = vmatmul.mubr.f32.vlgmr.msra.gmra.mrb[24].mxu0 %v10433_v31  ;;  %10899 = vmatmul.mubr.f32.vlgmr.msra.gmra.mrb[24].mxu1 %v10433_v31 }
 0x5ec   :  { %10451 = vmatpush1.msra.mxu0 %v22345_v36  ;;  %10514 = vmatprep.mubr.f32.mxu0 %v21347_v1 }
 0x5ed   :  { %10524 = vmatprep.subr.mxu0 %v22294_v16  ;;  %10916 = vmatpush1.msra.mxu1 %v22349_v37 }
 0x5ee   :  { %10979 = vmatprep.mubr.f32.mxu1 %v21347_v1  ;;  %10989 = vmatprep.subr.mxu1 %v22301_v47 }
 0x5f3   :  { %10516 = vmatmul.mubr.f32.vlgmr.msra.gmra.mrb[24].mxu0 %v10429_v59  ;;  %10981 = vmatmul.mubr.f32.vlgmr.msra.gmra.mrb[24].mxu1 %v10429_v59 }
 0x5f4   :  { %10527 = vmatpush1.msra.mxu0 %v22304_v58  ;;  %10590 = vmatprep.mubr.f32.mxu0 %v21347_v1 }
 0x5f5   :  { %10600 = vmatprep.subr.mxu0 %v22279_v53  ;;  %10992 = vmatpush1.msra.mxu1 %v22310_v2 }
 0x5f6   :  { %11055 = vmatprep.mubr.f32.mxu1 %v21347_v1  ;;  %11065 = vmatprep.subr.mxu1 %v22282_v55 }
 0x5fb   :  { %10593 = vmatmul.mubr.f32.vlgmr.msra.gmra.mrb[24].mxu0 %v10430_v40  ;;  %11058 = vmatmul.mubr.f32.vlgmr.msra.gmra.mrb[24].mxu1 %v10430_v40 }
 0x5fc   :  { %10602 = vmatpush1.msra.mxu0 %v22289_v35  ;;  %10665 = vmatprep.mubr.f32.mxu0 %v21347_v1 }
 0x5fd   :  { %10678 = vmatprep.subr.mxu0 %v22307_v51  ;;  %11067 = vmatpush1.msra.mxu1 %v22296_v30 }
 0x5fe   :  { %11130 = vmatprep.mubr.f32.mxu1 %v21347_v1  ;;  %11143 = vmatprep.subr.mxu1 %v22313_v4 }
 0x603   :  { %10669 = vmatmul.mubr.f32.vlgmr.msra.gmra.mrb[24].mxu0 %v10431_v45  ;;  %11134 = vmatmul.mubr.f32.vlgmr.msra.gmra.mrb[24].mxu1 %v10431_v45 }
 0x604   :  { %10682 = vmatpush1.msra.mxu0 %v22320_v9  ;;  %10745 = vmatprep.mubr.f32.mxu0 %v21347_v1 }
 0x605   :  { %10754 = vmatprep.subr.mxu0 %v22279_v53  ;;  %11147 = vmatpush1.msra.mxu1 %v22327_v23 }
 0x606   :  { %11210 = vmatprep.mubr.f32.mxu1 %v21347_v1  ;;  %11219 = vmatprep.subr.mxu1 %v22282_v55 }
 0x60b   :  { %10747 = vmatmul.mubr.f32.vlgmr.msra.gmra.mrb[24].mxu0 %v10429_v59  ;;  %11212 = vmatmul.mubr.f32.vlgmr.msra.gmra.mrb[24].mxu1 %v10429_v59 }
 0x60c   :  { %10756 = vmatpush1.msra.mxu0 %v22289_v35  ;;  %10819 = vmatprep.mubr.f32.mxu0 %v21347_v1 }
 0x60d   :  { %11221 = vmatpush1.msra.mxu1 %v22296_v30  ;;  %11284 = vmatprep.mubr.f32.mxu1 %v21347_v1 }
 0x60e   :  { %11332 = vmatprep.subr.mxu0 %v22099_v46  ;;  %11797 = vmatprep.subr.mxu1 %v22101_v61 }
 0x613   :  { %10821 = vmatmul.mubr.f32.vlgmr.msra.gmra.mrb[24].mxu0 %v10429_v59  ;;  %11286 = vmatmul.mubr.f32.vlgmr.msra.gmra.mrb[24].mxu1 %v10429_v59 }
 0x614   :  { %11334 = vmatpush1.msra.mxu0 %v22173_v56  ;;  %11397 = vmatprep.mubr.f32.mxu0 %v21347_v1 }
 0x615   :  { %11414 = vmatprep.subr.mxu0 %v22177_v60  ;;  %11799 = vmatpush1.msra.mxu1 %v22175_v57 }
 0x616   :  { %11862 = vmatprep.mubr.f32.mxu1 %v21347_v1  ;;  %11879 = vmatprep.subr.mxu1 %v22179_v41 }
 0x6ba   :  { %v9861_v18 = vpop.f32.mrb[6].mxu0  ;;  %v10326_v27 = vpop.f32.mrb[6].mxu1 }
 0x6bb   :  { %v20293_v22 = vadd.f32 %v9861_v18, %v22409_v21  ;;  %v9863_v43 = vpop.f32.mrb[7].mxu0  ;;  %v10328_v0 = vpop.f32.mrb[7].mxu1  ;;  %v20309_v52 = vadd.f32 %v10326_v27, %v22423_v33 }
 0x6bc   :  { %v20294_v38 = vadd.f32 %v9863_v43, %v22412_v39  ;;  %v20310_v49 = vadd.f32 %v10328_v0, %v22418_v48 }
 0x6bd   :  { %v20077_v10 = vmul.f32 -1.442695, %v20293_v22 }
 0x6be   :  { %v20078_v25 = vmul.f32 -1.442695, %v20294_v38  ;;  %v20079_v50 = vmul.f32 -1.442695, %v20310_v49 }
 0x6bf   :  { %21159 = vpow2.f32 %v20077_v10 }
 0x6c0   :  { %21161 = vpow2.f32 %v20078_v25 }
 0x6c1   :  { %21163 = vpow2.f32 %v20079_v50 }
 0x6c2   :  { %21165 = vtanh.f32 %v20309_v52 }
 0x6c9   :  { %v21160_v54 = vpop.eup %21159 }
 0x6ca   :  { %v21162_v6 = vpop.eup %21161  ;;  %v10338_v7 = vadd.f32 1.0, %v21160_v54 }
 0x6cb   :  { %v10344_v13 = vadd.f32 1.0, %v21162_v6  ;;  %v21164_v44 = vpop.eup %21163 }
 0x6cc   :  { %21167 = vrcp.f32 %v10338_v7  ;;  %v21166_v59 = vpop.eup %21165  ;;  %v10351_v31 = vadd.f32 1.0, %v21164_v44 }
 0x6cd   :  { %21169 = vrcp.f32 %v10344_v13 }
 0x6ce   :  { %21171 = vrcp.f32 %v10351_v31 }
 0x6d6   :  { %v21168_v40 = vpop.eup %21167 }
 0x6d7   :  { %v21170_v45 = vpop.eup %21169  ;;  %v10355_v29 = vmul.f32 %v21168_v40, %v21166_v59 }
 0x6d8   :  { %v10354_v18 = vmul.f32 %v21170_v45, %v22639_v32  ;;  %v21172_v27 = vpop.eup %21171 }
 0x6da   :  { %v22738_v22 = vadd.f32 %v10355_v29, %v10354_v18 }
 0x6dc   :  { %21173 = vtanh.f32 %v22738_v22 }
 0x6e6   :  { %v21174_v43 = vpop.eup %21173  ;;  %v10822_v0 = vpop.f32.mrb[24].mxu0 }
 0x6e7   :  { %v11287_v38 = vpop.f32.mrb[24].mxu1  ;;  %v10358_v10 = vmul.f32 %v21174_v43, %v21172_v27  ;;  %v20327_v25 = vadd.f32 %v10822_v0, %v22432_v5  ;;  %v10824_v49 = vpop.f32.mrb[25].mxu0 }
 0x6e8   :  { %v11289_v50 = vpop.f32.mrb[25].mxu1  ;;  %v20328_v52 = vadd.f32 %v10824_v49, %v22435_v15  ;;  %v20343_v31 = vadd.f32 %v11287_v38, %v22450_v17 }
 0x6e9   :  { %v20080_v54 = vmul.f32 -1.442695, %v20327_v25  ;;  %v11329_v6 = vsel %vm3585_vm10, %v10358_v10, 0  ;;  %v20344_v44 = vadd.f32 %v11289_v50, %v22442_v24 }
 0x6ea   :  { %v20081_v32 = vmul.f32 -1.442695, %v20328_v52  ;;  %v22744_v7 = vand.u32 4294901760, %v11329_v6 }
 0x6eb   :  { %21175 = vpow2.f32 %v20080_v54  ;;  %v20082_v45 = vmul.f32 -1.442695, %v20344_v44 }
 0x6ec   :  { %21177 = vpow2.f32 %v20081_v32  ;;  %v11399_v13 = vsub.f32 %v11329_v6, %v22744_v7 }
 0x6ed   :  { %21179 = vpow2.f32 %v20082_v45 }
 0x6ee   :  { %v11400_v59 = vand.u32 4294901760, %v11399_v13  ;;  %21181 = vtanh.f32 %v20343_v31 }
 0x6f0   :  { %v11401_v40 = vsub.f32 %v11399_v13, %v11400_v59 }
 0x6f2   :  { %v11402_v29 = vand.u32 4294901760, %v11401_v40 }
 0x6f4   :  { %11403 = vmatmul.mubr.f32.vlgmr.msra.gmra.mrb[8].mxu0 %v11402_v29  ;;  %11868 = vmatmul.mubr.f32.vlgmr.msra.gmra.mrb[8].mxu1 %v11402_v29 }
 0x6f5   :  { %v21176_v18 = vpop.eup %21175  ;;  %11420 = vmatpush1.msra.mxu0 %v22249_v63  ;;  %11483 = vmatprep.mubr.f32.mxu0 %v21347_v1 }
 0x6f6   :  { %v21178_v27 = vpop.eup %21177  ;;  %v11299_v43 = vadd.f32 1.0, %v21176_v18  ;;  %11493 = vmatprep.subr.mxu0 %v22138_v62  ;;  %11885 = vmatpush1.msra.mxu1 %v22251_v42 }
 0x6f7   :  { %v11305_v0 = vadd.f32 1.0, %v21178_v27  ;;  %11948 = vmatprep.mubr.f32.mxu1 %v21347_v1  ;;  %11958 = vmatprep.subr.mxu1 %v22141_v3  ;;  %v21180_v38 = vpop.eup %21179 }
 0x6f8   :  { %21183 = vrcp.f32 %v11299_v43  ;;  %v21182_v10 = vpop.eup %21181  ;;  %v11312_v52 = vadd.f32 1.0, %v21180_v38 }
 0x6f9   :  { %21185 = vrcp.f32 %v11305_v0 }
 0x6fa   :  { %21187 = vrcp.f32 %v11312_v52 }
 0x6fc   :  { %11485 = vmatmul.mubr.f32.vlgmr.msra.gmra.mrb[8].mxu0 %v22744_v7  ;;  %11950 = vmatmul.mubr.f32.vlgmr.msra.gmra.mrb[8].mxu1 %v22744_v7 }
 0x6fd   :  { %11496 = vmatpush1.msra.mxu0 %v22216_v11  ;;  %11559 = vmatprep.mubr.f32.mxu0 %v21347_v1 }
 0x6fe   :  { %11569 = vmatprep.subr.mxu0 %v22099_v46  ;;  %11961 = vmatpush1.msra.mxu1 %v22219_v12 }
 0x6ff   :  { %12024 = vmatprep.mubr.f32.mxu1 %v21347_v1  ;;  %12034 = vmatprep.subr.mxu1 %v22101_v61 }
 0x702   :  { %v21184_v25 = vpop.eup %21183 }
 0x703   :  { %v21186_v49 = vpop.eup %21185  ;;  %v11316_v50 = vmul.f32 %v21184_v25, %v21182_v10 }
 0x704   :  { %v11315_v54 = vmul.f32 %v21186_v49, %v22667_v34  ;;  %11562 = vmatmul.mubr.f32.vlgmr.msra.gmra.mrb[8].mxu0 %v11399_v13  ;;  %12027 = vmatmul.mubr.f32.vlgmr.msra.gmra.mrb[8].mxu1 %v11399_v13  ;;  %v21188_v34 = vpop.eup %21187 }
 0x705   :  { %11571 = vmatpush1.msra.mxu0 %v22173_v56  ;;  %11634 = vmatprep.mubr.f32.mxu0 %v21347_v1 }
 0x706   :  { %v22766_v6 = vadd.f32 %v11316_v50, %v11315_v54  ;;  %11647 = vmatprep.subr.mxu0 %v22150_v8  ;;  %12036 = vmatpush1.msra.mxu1 %v22175_v57 }
 0x707   :  { %12099 = vmatprep.mubr.f32.mxu1 %v21347_v1  ;;  %12112 = vmatprep.subr.mxu1 %v22153_v14 }
 0x708   :  { %21189 = vtanh.f32 %v22766_v6 }
 0x70c   :  { %11638 = vmatmul.mubr.f32.vlgmr.msra.gmra.mrb[8].mxu0 %v11400_v59  ;;  %12103 = vmatmul.mubr.f32.vlgmr.msra.gmra.mrb[8].mxu1 %v11400_v59 }
 0x70d   :  { %11651 = vmatpush1.msra.mxu0 %v22228_v19  ;;  %11714 = vmatprep.mubr.f32.mxu0 %v21347_v1 }
 0x70e   :  { %11723 = vmatprep.subr.mxu0 %v22099_v46  ;;  %12116 = vmatpush1.msra.mxu1 %v22231_v20 }
 0x70f   :  { %12179 = vmatprep.mubr.f32.mxu1 %v21347_v1  ;;  %12188 = vmatprep.subr.mxu1 %v22101_v61 }
 0x712   :  { %v21190_v32 = vpop.eup %21189 }
 0x713   :  { %v11319_v13 = vmul.f32 %v21190_v32, %v21188_v34 }
 0x714   :  { %11716 = vmatmul.mubr.f32.vlgmr.msra.gmra.mrb[8].mxu0 %v22744_v7  ;;  %12181 = vmatmul.mubr.f32.vlgmr.msra.gmra.mrb[8].mxu1 %v22744_v7 }
 0x715   :  { %11725 = vmatpush1.msra.mxu0 %v22173_v56  ;;  %11788 = vmatprep.mubr.f32.mxu0 %v21347_v1  ;;  %v12290_v44 = vsel %vm3585_vm10, %v11319_v13, 0 }
 0x716   :  { %12190 = vmatpush1.msra.mxu1 %v22175_v57  ;;  %12253 = vmatprep.mubr.f32.mxu1 %v21347_v1  ;;  %v12359_v59 = vand.u32 4294901760, %v12290_v44 }
 0x717   :  { %12293 = vmatprep.subr.mxu0 %v22279_v53  ;;  %12758 = vmatprep.subr.mxu1 %v22282_v55 }
 0x718   :  { %v12360_v40 = vsub.f32 %v12290_v44, %v12359_v59 }
 0x71a   :  { %v12361_v45 = vand.u32 4294901760, %v12360_v40 }
 0x71c   :  { %11790 = vmatmul.mubr.f32.vlgmr.msra.gmra.mrb[8].mxu0 %v22744_v7  ;;  %12255 = vmatmul.mubr.f32.vlgmr.msra.gmra.mrb[8].mxu1 %v22744_v7  ;;  %v12362_v29 = vsub.f32 %v12360_v40, %v12361_v45 }
 0x71d   :  { %12295 = vmatpush1.msra.mxu0 %v22289_v35  ;;  %12358 = vmatprep.mubr.f32.mxu0 %v21347_v1 }
 0x71e   :  { %12375 = vmatprep.subr.mxu0 %v22335_v26  ;;  %12760 = vmatpush1.msra.mxu1 %v22296_v30  ;;  %v12363_v31 = vand.u32 4294901760, %v12362_v29 }
 0x71f   :  { %12823 = vmatprep.mubr.f32.mxu1 %v21347_v1  ;;  %12840 = vmatprep.subr.mxu1 %v22339_v28 }
 0x720   :  { %12364 = vmatmul.mubr.f32.vlgmr.msra.gmra.mrb[22].mxu0 %v12363_v31  ;;  %12829 = vmatmul.mubr.f32.vlgmr.msra.gmra.mrb[22].mxu1 %v12363_v31 }
 0x721   :  { %12381 = vmatpush1.msra.mxu0 %v22345_v36  ;;  %12444 = vmatprep.mubr.f32.mxu0 %v21347_v1 }
 0x722   :  { %12454 = vmatprep.subr.mxu0 %v22294_v16  ;;  %12846 = vmatpush1.msra.mxu1 %v22349_v37 }
 0x723   :  { %12909 = vmatprep.mubr.f32.mxu1 %v21347_v1  ;;  %12919 = vmatprep.subr.mxu1 %v22301_v47 }
 0x728   :  { %12446 = vmatmul.mubr.f32.vlgmr.msra.gmra.mrb[22].mxu0 %v12359_v59  ;;  %12911 = vmatmul.mubr.f32.vlgmr.msra.gmra.mrb[22].mxu1 %v12359_v59 }
 0x729   :  { %12457 = vmatpush1.msra.mxu0 %v22304_v58  ;;  %12520 = vmatprep.mubr.f32.mxu0 %v21347_v1 }
 0x72a   :  { %12530 = vmatprep.subr.mxu0 %v22279_v53  ;;  %12922 = vmatpush1.msra.mxu1 %v22310_v2 }
 0x72b   :  { %12985 = vmatprep.mubr.f32.mxu1 %v21347_v1  ;;  %12995 = vmatprep.subr.mxu1 %v22282_v55 }
 0x730   :  { %12523 = vmatmul.mubr.f32.vlgmr.msra.gmra.mrb[22].mxu0 %v12360_v40  ;;  %12988 = vmatmul.mubr.f32.vlgmr.msra.gmra.mrb[22].mxu1 %v12360_v40 }
 0x731   :  { %12532 = vmatpush1.msra.mxu0 %v22289_v35  ;;  %12595 = vmatprep.mubr.f32.mxu0 %v21347_v1 }
 0x732   :  { %12608 = vmatprep.subr.mxu0 %v22307_v51  ;;  %12997 = vmatpush1.msra.mxu1 %v22296_v30 }
 0x733   :  { %13060 = vmatprep.mubr.f32.mxu1 %v21347_v1  ;;  %13073 = vmatprep.subr.mxu1 %v22313_v4 }
 0x738   :  { %12599 = vmatmul.mubr.f32.vlgmr.msra.gmra.mrb[22].mxu0 %v12361_v45  ;;  %13064 = vmatmul.mubr.f32.vlgmr.msra.gmra.mrb[22].mxu1 %v12361_v45 }
 0x739   :  { %12612 = vmatpush1.msra.mxu0 %v22320_v9  ;;  %12675 = vmatprep.mubr.f32.mxu0 %v21347_v1 }
 0x73a   :  { %12684 = vmatprep.subr.mxu0 %v22279_v53  ;;  %13077 = vmatpush1.msra.mxu1 %v22327_v23 }
 0x73b   :  { %13140 = vmatprep.mubr.f32.mxu1 %v21347_v1  ;;  %13149 = vmatprep.subr.mxu1 %v22282_v55 }
 0x740   :  { %12677 = vmatmul.mubr.f32.vlgmr.msra.gmra.mrb[22].mxu0 %v12359_v59  ;;  %13142 = vmatmul.mubr.f32.vlgmr.msra.gmra.mrb[22].mxu1 %v12359_v59 }
 0x741   :  { %12686 = vmatpush1.msra.mxu0 %v22289_v35  ;;  %12749 = vmatprep.mubr.f32.mxu0 %v21347_v1 }
 0x742   :  { %13151 = vmatpush1.msra.mxu1 %v22296_v30  ;;  %13214 = vmatprep.mubr.f32.mxu1 %v21347_v1 }
 0x743   :  { %13262 = vmatprep.subr.mxu0 %v22099_v46  ;;  %13727 = vmatprep.subr.mxu1 %v22101_v61 }
 0x748   :  { %12751 = vmatmul.mubr.f32.vlgmr.msra.gmra.mrb[22].mxu0 %v12359_v59  ;;  %13216 = vmatmul.mubr.f32.vlgmr.msra.gmra.mrb[22].mxu1 %v12359_v59 }
 0x749   :  { %13264 = vmatpush1.msra.mxu0 %v22173_v56  ;;  %13327 = vmatprep.mubr.f32.mxu0 %v21347_v1 }
 0x74a   :  { %13344 = vmatprep.subr.mxu0 %v22177_v60  ;;  %13729 = vmatpush1.msra.mxu1 %v22175_v57 }
 0x74b   :  { %13792 = vmatprep.mubr.f32.mxu1 %v21347_v1  ;;  %13809 = vmatprep.subr.mxu1 %v22179_v41 }
 0x7ef   :  { %v11791_v7 = vpop.f32.mrb[8].mxu0  ;;  %v12256_v18 = vpop.f32.mrb[8].mxu1 }
 0x7f0   :  { %v20295_v27 = vadd.f32 %v11791_v7, %v22409_v21  ;;  %v11793_v43 = vpop.f32.mrb[9].mxu0  ;;  %v12258_v0 = vpop.f32.mrb[9].mxu1  ;;  %v20311_v52 = vadd.f32 %v12256_v18, %v22423_v33 }
 0x7f1   :  { %v20296_v38 = vadd.f32 %v11793_v43, %v22412_v39  ;;  %v20312_v49 = vadd.f32 %v12258_v0, %v22418_v48 }
 0x7f2   :  { %v20083_v10 = vmul.f32 -1.442695, %v20295_v27 }
 0x7f3   :  { %v20084_v25 = vmul.f32 -1.442695, %v20296_v38  ;;  %v20085_v50 = vmul.f32 -1.442695, %v20312_v49 }
 0x7f4   :  { %21191 = vpow2.f32 %v20083_v10 }
 0x7f5   :  { %21193 = vpow2.f32 %v20084_v25 }
 0x7f6   :  { %21195 = vpow2.f32 %v20085_v50 }
 0x7f7   :  { %21197 = vtanh.f32 %v20311_v52 }
 0x7fe   :  { %v21192_v54 = vpop.eup %21191 }
 0x7ff   :  { %v21194_v34 = vpop.eup %21193  ;;  %v12268_v32 = vadd.f32 1.0, %v21192_v54 }
 0x800   :  { %v12274_v13 = vadd.f32 1.0, %v21194_v34  ;;  %v21196_v44 = vpop.eup %21195 }
 0x801   :  { %21199 = vrcp.f32 %v12268_v32  ;;  %v21198_v59 = vpop.eup %21197  ;;  %v12281_v31 = vadd.f32 1.0, %v21196_v44 }
 0x802   :  { %21201 = vrcp.f32 %v12274_v13 }
 0x803   :  { %21203 = vrcp.f32 %v12281_v31 }
 0x80b   :  { %v21200_v40 = vpop.eup %21199 }
 0x80c   :  { %v21202_v45 = vpop.eup %21201  ;;  %v12285_v29 = vmul.f32 %v21200_v40, %v21198_v59 }
 0x80d   :  { %v12284_v7 = vmul.f32 %v21202_v45, %v22738_v22  ;;  %v21204_v18 = vpop.eup %21203 }
 0x80f   :  { %v22837_v27 = vadd.f32 %v12285_v29, %v12284_v7 }
 0x811   :  { %21205 = vtanh.f32 %v22837_v27 }
 0x81b   :  { %v21206_v43 = vpop.eup %21205  ;;  %v12752_v0 = vpop.f32.mrb[22].mxu0 }
 0x81c   :  { %v13217_v38 = vpop.f32.mrb[22].mxu1  ;;  %v12288_v10 = vmul.f32 %v21206_v43, %v21204_v18  ;;  %v20325_v25 = vadd.f32 %v12752_v0, %v22432_v5  ;;  %v12754_v49 = vpop.f32.mrb[23].mxu0 }
 0x81d   :  { %v13219_v50 = vpop.f32.mrb[23].mxu1  ;;  %v20326_v52 = vadd.f32 %v12754_v49, %v22435_v15  ;;  %v20341_v31 = vadd.f32 %v13217_v38, %v22450_v17 }
 0x81e   :  { %v20086_v54 = vmul.f32 -1.442695, %v20325_v25  ;;  %v13259_v34 = vsel %vm3585_vm10, %v12288_v10, 0  ;;  %v20342_v44 = vadd.f32 %v13219_v50, %v22442_v24 }
 0x81f   :  { %v20087_v22 = vmul.f32 -1.442695, %v20326_v52  ;;  %v22843_v32 = vand.u32 4294901760, %v13259_v34 }
 0x820   :  { %21207 = vpow2.f32 %v20086_v54  ;;  %v20088_v45 = vmul.f32 -1.442695, %v20342_v44 }
 0x821   :  { %21209 = vpow2.f32 %v20087_v22  ;;  %v13329_v13 = vsub.f32 %v13259_v34, %v22843_v32 }
 0x822   :  { %21211 = vpow2.f32 %v20088_v45 }
 0x823   :  { %v13330_v59 = vand.u32 4294901760, %v13329_v13  ;;  %21213 = vtanh.f32 %v20341_v31 }
 0x825   :  { %v13331_v40 = vsub.f32 %v13329_v13, %v13330_v59 }
 0x827   :  { %v13332_v29 = vand.u32 4294901760, %v13331_v40 }
 0x829   :  { %13333 = vmatmul.mubr.f32.vlgmr.msra.gmra.mrb[10].mxu0 %v13332_v29  ;;  %13798 = vmatmul.mubr.f32.vlgmr.msra.gmra.mrb[10].mxu1 %v13332_v29 }
 0x82a   :  { %v21208_v7 = vpop.eup %21207  ;;  %13350 = vmatpush1.msra.mxu0 %v22249_v63  ;;  %13413 = vmatprep.mubr.f32.mxu0 %v21347_v1 }
 0x82b   :  { %v21210_v18 = vpop.eup %21209  ;;  %v13229_v43 = vadd.f32 1.0, %v21208_v7  ;;  %13423 = vmatprep.subr.mxu0 %v22138_v62  ;;  %13815 = vmatpush1.msra.mxu1 %v22251_v42 }
 0x82c   :  { %v13235_v0 = vadd.f32 1.0, %v21210_v18  ;;  %13878 = vmatprep.mubr.f32.mxu1 %v21347_v1  ;;  %13888 = vmatprep.subr.mxu1 %v22141_v3  ;;  %v21212_v38 = vpop.eup %21211 }
 0x82d   :  { %21215 = vrcp.f32 %v13229_v43  ;;  %v21214_v10 = vpop.eup %21213  ;;  %v13242_v52 = vadd.f32 1.0, %v21212_v38 }
 0x82e   :  { %21217 = vrcp.f32 %v13235_v0 }
 0x82f   :  { %21219 = vrcp.f32 %v13242_v52 }
 0x831   :  { %13415 = vmatmul.mubr.f32.vlgmr.msra.gmra.mrb[10].mxu0 %v22843_v32  ;;  %13880 = vmatmul.mubr.f32.vlgmr.msra.gmra.mrb[10].mxu1 %v22843_v32 }
 0x832   :  { %13426 = vmatpush1.msra.mxu0 %v22216_v11  ;;  %13489 = vmatprep.mubr.f32.mxu0 %v21347_v1 }
 0x833   :  { %13499 = vmatprep.subr.mxu0 %v22099_v46  ;;  %13891 = vmatpush1.msra.mxu1 %v22219_v12 }
 0x834   :  { %13954 = vmatprep.mubr.f32.mxu1 %v21347_v1  ;;  %13964 = vmatprep.subr.mxu1 %v22101_v61 }
 0x837   :  { %v21216_v25 = vpop.eup %21215 }
 0x838   :  { %v21218_v49 = vpop.eup %21217  ;;  %v13246_v50 = vmul.f32 %v21216_v25, %v21214_v10 }
 0x839   :  { %v13245_v54 = vmul.f32 %v21218_v49, %v22766_v6  ;;  %13492 = vmatmul.mubr.f32.vlgmr.msra.gmra.mrb[10].mxu0 %v13329_v13  ;;  %13957 = vmatmul.mubr.f32.vlgmr.msra.gmra.mrb[10].mxu1 %v13329_v13  ;;  %v21220_v6 = vpop.eup %21219 }
 0x83a   :  { %13501 = vmatpush1.msra.mxu0 %v22173_v56  ;;  %13564 = vmatprep.mubr.f32.mxu0 %v21347_v1 }
 0x83b   :  { %v22865_v34 = vadd.f32 %v13246_v50, %v13245_v54  ;;  %13577 = vmatprep.subr.mxu0 %v22150_v8  ;;  %13966 = vmatpush1.msra.mxu1 %v22175_v57 }
 0x83c   :  { %14029 = vmatprep.mubr.f32.mxu1 %v21347_v1  ;;  %14042 = vmatprep.subr.mxu1 %v22153_v14 }
 0x83d   :  { %21221 = vtanh.f32 %v22865_v34 }
 0x841   :  { %13568 = vmatmul.mubr.f32.vlgmr.msra.gmra.mrb[10].mxu0 %v13330_v59  ;;  %14033 = vmatmul.mubr.f32.vlgmr.msra.gmra.mrb[10].mxu1 %v13330_v59 }
 0x842   :  { %13581 = vmatpush1.msra.mxu0 %v22228_v19  ;;  %13644 = vmatprep.mubr.f32.mxu0 %v21347_v1 }
 0x843   :  { %13653 = vmatprep.subr.mxu0 %v22099_v46  ;;  %14046 = vmatpush1.msra.mxu1 %v22231_v20 }
 0x844   :  { %14109 = vmatprep.mubr.f32.mxu1 %v21347_v1  ;;  %14118 = vmatprep.subr.mxu1 %v22101_v61 }
 0x847   :  { %v21222_v22 = vpop.eup %21221 }
 0x848   :  { %v13249_v13 = vmul.f32 %v21222_v22, %v21220_v6 }
 0x849   :  { %13646 = vmatmul.mubr.f32.vlgmr.msra.gmra.mrb[10].mxu0 %v22843_v32  ;;  %14111 = vmatmul.mubr.f32.vlgmr.msra.gmra.mrb[10].mxu1 %v22843_v32 }
 0x84a   :  { %13655 = vmatpush1.msra.mxu0 %v22173_v56  ;;  %13718 = vmatprep.mubr.f32.mxu0 %v21347_v1  ;;  %v14220_v44 = vsel %vm3585_vm10, %v13249_v13, 0 }
 0x84b   :  { %14120 = vmatpush1.msra.mxu1 %v22175_v57  ;;  %14183 = vmatprep.mubr.f32.mxu1 %v21347_v1  ;;  %v14289_v59 = vand.u32 4294901760, %v14220_v44 }
 0x84c   :  { %14223 = vmatprep.subr.mxu0 %v22279_v53  ;;  %14688 = vmatprep.subr.mxu1 %v22282_v55 }
 0x84d   :  { %v14290_v40 = vsub.f32 %v14220_v44, %v14289_v59 }
 0x84f   :  { %v14291_v45 = vand.u32 4294901760, %v14290_v40 }
 0x851   :  { %13720 = vmatmul.mubr.f32.vlgmr.msra.gmra.mrb[10].mxu0 %v22843_v32  ;;  %14185 = vmatmul.mubr.f32.vlgmr.msra.gmra.mrb[10].mxu1 %v22843_v32  ;;  %v14292_v29 = vsub.f32 %v14290_v40, %v14291_v45 }
 0x852   :  { %14225 = vmatpush1.msra.mxu0 %v22289_v35  ;;  %14288 = vmatprep.mubr.f32.mxu0 %v21347_v1 }
 0x853   :  { %14305 = vmatprep.subr.mxu0 %v22335_v26  ;;  %14690 = vmatpush1.msra.mxu1 %v22296_v30  ;;  %v14293_v31 = vand.u32 4294901760, %v14292_v29 }
 0x854   :  { %14753 = vmatprep.mubr.f32.mxu1 %v21347_v1  ;;  %14770 = vmatprep.subr.mxu1 %v22339_v28 }
 0x855   :  { %14294 = vmatmul.mubr.f32.vlgmr.msra.gmra.mrb[20].mxu0 %v14293_v31  ;;  %14759 = vmatmul.mubr.f32.vlgmr.msra.gmra.mrb[20].mxu1 %v14293_v31 }
 0x856   :  { %14311 = vmatpush1.msra.mxu0 %v22345_v36  ;;  %14374 = vmatprep.mubr.f32.mxu0 %v21347_v1 }
 0x857   :  { %14384 = vmatprep.subr.mxu0 %v22294_v16  ;;  %14776 = vmatpush1.msra.mxu1 %v22349_v37 }
 0x858   :  { %14839 = vmatprep.mubr.f32.mxu1 %v21347_v1  ;;  %14849 = vmatprep.subr.mxu1 %v22301_v47 }
 0x85d   :  { %14376 = vmatmul.mubr.f32.vlgmr.msra.gmra.mrb[20].mxu0 %v14289_v59  ;;  %14841 = vmatmul.mubr.f32.vlgmr.msra.gmra.mrb[20].mxu1 %v14289_v59 }
 0x85e   :  { %14387 = vmatpush1.msra.mxu0 %v22304_v58  ;;  %14450 = vmatprep.mubr.f32.mxu0 %v21347_v1 }
 0x85f   :  { %14460 = vmatprep.subr.mxu0 %v22279_v53  ;;  %14852 = vmatpush1.msra.mxu1 %v22310_v2 }
 0x860   :  { %14915 = vmatprep.mubr.f32.mxu1 %v21347_v1  ;;  %14925 = vmatprep.subr.mxu1 %v22282_v55 }
 0x865   :  { %14453 = vmatmul.mubr.f32.vlgmr.msra.gmra.mrb[20].mxu0 %v14290_v40  ;;  %14918 = vmatmul.mubr.f32.vlgmr.msra.gmra.mrb[20].mxu1 %v14290_v40 }
 0x866   :  { %14462 = vmatpush1.msra.mxu0 %v22289_v35  ;;  %14525 = vmatprep.mubr.f32.mxu0 %v21347_v1 }
 0x867   :  { %14538 = vmatprep.subr.mxu0 %v22307_v51  ;;  %14927 = vmatpush1.msra.mxu1 %v22296_v30 }
 0x868   :  { %14990 = vmatprep.mubr.f32.mxu1 %v21347_v1  ;;  %15003 = vmatprep.subr.mxu1 %v22313_v4 }
 0x86d   :  { %14529 = vmatmul.mubr.f32.vlgmr.msra.gmra.mrb[20].mxu0 %v14291_v45  ;;  %14994 = vmatmul.mubr.f32.vlgmr.msra.gmra.mrb[20].mxu1 %v14291_v45 }
 0x86e   :  { %14542 = vmatpush1.msra.mxu0 %v22320_v9  ;;  %14605 = vmatprep.mubr.f32.mxu0 %v21347_v1 }
 0x86f   :  { %14614 = vmatprep.subr.mxu0 %v22279_v53  ;;  %15007 = vmatpush1.msra.mxu1 %v22327_v23 }
 0x870   :  { %15070 = vmatprep.mubr.f32.mxu1 %v21347_v1  ;;  %15079 = vmatprep.subr.mxu1 %v22282_v55 }
 0x875   :  { %14607 = vmatmul.mubr.f32.vlgmr.msra.gmra.mrb[20].mxu0 %v14289_v59  ;;  %15072 = vmatmul.mubr.f32.vlgmr.msra.gmra.mrb[20].mxu1 %v14289_v59 }
 0x876   :  { %14616 = vmatpush1.msra.mxu0 %v22289_v35  ;;  %14679 = vmatprep.mubr.f32.mxu0 %v21347_v1 }
 0x877   :  { %15081 = vmatpush1.msra.mxu1 %v22296_v30  ;;  %15144 = vmatprep.mubr.f32.mxu1 %v21347_v1 }
 0x878   :  { %15192 = vmatprep.subr.mxu0 %v22099_v46  ;;  %15657 = vmatprep.subr.mxu1 %v22101_v61 }
 0x87d   :  { %14681 = vmatmul.mubr.f32.vlgmr.msra.gmra.mrb[20].mxu0 %v14289_v59  ;;  %15146 = vmatmul.mubr.f32.vlgmr.msra.gmra.mrb[20].mxu1 %v14289_v59 }
 0x87e   :  { %15194 = vmatpush1.msra.mxu0 %v22173_v56  ;;  %15257 = vmatprep.mubr.f32.mxu0 %v21347_v1 }
 0x87f   :  { %15274 = vmatprep.subr.mxu0 %v22177_v60  ;;  %15659 = vmatpush1.msra.mxu1 %v22175_v57 }
 0x880   :  { %15722 = vmatprep.mubr.f32.mxu1 %v21347_v1  ;;  %15739 = vmatprep.subr.mxu1 %v22179_v41 }
 0x924   :  { %v13721_v32 = vpop.f32.mrb[10].mxu0  ;;  %v14186_v7 = vpop.f32.mrb[10].mxu1 }
 0x925   :  { %v20297_v18 = vadd.f32 %v13721_v32, %v22409_v21  ;;  %v13723_v43 = vpop.f32.mrb[11].mxu0  ;;  %v14188_v0 = vpop.f32.mrb[11].mxu1  ;;  %v20313_v52 = vadd.f32 %v14186_v7, %v22423_v33 }
 0x926   :  { %v20298_v38 = vadd.f32 %v13723_v43, %v22412_v39  ;;  %v20314_v49 = vadd.f32 %v14188_v0, %v22418_v48 }
 0x927   :  { %v20089_v10 = vmul.f32 -1.442695, %v20297_v18 }
 0x928   :  { %v20090_v25 = vmul.f32 -1.442695, %v20298_v38  ;;  %v20091_v50 = vmul.f32 -1.442695, %v20314_v49 }
 0x929   :  { %21223 = vpow2.f32 %v20089_v10 }
 0x92a   :  { %21225 = vpow2.f32 %v20090_v25 }
 0x92b   :  { %21227 = vpow2.f32 %v20091_v50 }
 0x92c   :  { %21229 = vtanh.f32 %v20313_v52 }
 0x933   :  { %v21224_v54 = vpop.eup %21223 }
 0x934   :  { %v21226_v6 = vpop.eup %21225  ;;  %v14198_v22 = vadd.f32 1.0, %v21224_v54 }
 0x935   :  { %v14204_v13 = vadd.f32 1.0, %v21226_v6  ;;  %v21228_v44 = vpop.eup %21227 }
 0x936   :  { %21231 = vrcp.f32 %v14198_v22  ;;  %v21230_v59 = vpop.eup %21229  ;;  %v14211_v31 = vadd.f32 1.0, %v21228_v44 }
 0x937   :  { %21233 = vrcp.f32 %v14204_v13 }
 0x938   :  { %21235 = vrcp.f32 %v14211_v31 }
 0x940   :  { %v21232_v40 = vpop.eup %21231 }
 0x941   :  { %v21234_v45 = vpop.eup %21233  ;;  %v14215_v29 = vmul.f32 %v21232_v40, %v21230_v59 }
 0x942   :  { %v14214_v32 = vmul.f32 %v21234_v45, %v22837_v27  ;;  %v21236_v7 = vpop.eup %21235 }
 0x944   :  { %v22936_v18 = vadd.f32 %v14215_v29, %v14214_v32 }
 0x946   :  { %21237 = vtanh.f32 %v22936_v18 }
 0x950   :  { %v21238_v43 = vpop.eup %21237  ;;  %v14682_v0 = vpop.f32.mrb[20].mxu0 }
 0x951   :  { %v15147_v38 = vpop.f32.mrb[20].mxu1  ;;  %v14218_v10 = vmul.f32 %v21238_v43, %v21236_v7  ;;  %v20323_v25 = vadd.f32 %v14682_v0, %v22432_v5  ;;  %v14684_v49 = vpop.f32.mrb[21].mxu0 }
 0x952   :  { %v15149_v50 = vpop.f32.mrb[21].mxu1  ;;  %v20324_v52 = vadd.f32 %v14684_v49, %v22435_v15  ;;  %v20339_v31 = vadd.f32 %v15147_v38, %v22450_v17 }
 0x953   :  { %v20092_v54 = vmul.f32 -1.442695, %v20323_v25  ;;  %v15189_v6 = vsel %vm3585_vm10, %v14218_v10, 0  ;;  %v20340_v44 = vadd.f32 %v15149_v50, %v22442_v24 }
 0x954   :  { %v20093_v27 = vmul.f32 -1.442695, %v20324_v52  ;;  %v22942_v22 = vand.u32 4294901760, %v15189_v6 }
 0x955   :  { %21239 = vpow2.f32 %v20092_v54  ;;  %v20094_v45 = vmul.f32 -1.442695, %v20340_v44 }
 0x956   :  { %21241 = vpow2.f32 %v20093_v27  ;;  %v15259_v13 = vsub.f32 %v15189_v6, %v22942_v22 }
 0x957   :  { %21243 = vpow2.f32 %v20094_v45 }
 0x958   :  { %v15260_v59 = vand.u32 4294901760, %v15259_v13  ;;  %21245 = vtanh.f32 %v20339_v31 }
 0x95a   :  { %v15261_v40 = vsub.f32 %v15259_v13, %v15260_v59 }
 0x95c   :  { %v15262_v29 = vand.u32 4294901760, %v15261_v40 }
 0x95e   :  { %15263 = vmatmul.mubr.f32.vlgmr.msra.gmra.mrb[12].mxu0 %v15262_v29  ;;  %15728 = vmatmul.mubr.f32.vlgmr.msra.gmra.mrb[12].mxu1 %v15262_v29 }
 0x95f   :  { %v21240_v32 = vpop.eup %21239  ;;  %15280 = vmatpush1.msra.mxu0 %v22249_v63  ;;  %15343 = vmatprep.mubr.f32.mxu0 %v21347_v1 }
 0x960   :  { %v21242_v7 = vpop.eup %21241  ;;  %v15159_v43 = vadd.f32 1.0, %v21240_v32  ;;  %15353 = vmatprep.subr.mxu0 %v22138_v62  ;;  %15745 = vmatpush1.msra.mxu1 %v22251_v42 }
 0x961   :  { %v15165_v0 = vadd.f32 1.0, %v21242_v7  ;;  %15808 = vmatprep.mubr.f32.mxu1 %v21347_v1  ;;  %15818 = vmatprep.subr.mxu1 %v22141_v3  ;;  %v21244_v38 = vpop.eup %21243 }
 0x962   :  { %21247 = vrcp.f32 %v15159_v43  ;;  %v21246_v10 = vpop.eup %21245  ;;  %v15172_v52 = vadd.f32 1.0, %v21244_v38 }
 0x963   :  { %21249 = vrcp.f32 %v15165_v0 }
 0x964   :  { %21251 = vrcp.f32 %v15172_v52 }
 0x966   :  { %15345 = vmatmul.mubr.f32.vlgmr.msra.gmra.mrb[12].mxu0 %v22942_v22  ;;  %15810 = vmatmul.mubr.f32.vlgmr.msra.gmra.mrb[12].mxu1 %v22942_v22 }
 0x967   :  { %15356 = vmatpush1.msra.mxu0 %v22216_v11  ;;  %15419 = vmatprep.mubr.f32.mxu0 %v21347_v1 }
 0x968   :  { %15429 = vmatprep.subr.mxu0 %v22099_v46  ;;  %15821 = vmatpush1.msra.mxu1 %v22219_v12 }
 0x969   :  { %15884 = vmatprep.mubr.f32.mxu1 %v21347_v1  ;;  %15894 = vmatprep.subr.mxu1 %v22101_v61 }
 0x96c   :  { %v21248_v25 = vpop.eup %21247 }
 0x96d   :  { %v21250_v49 = vpop.eup %21249  ;;  %v15176_v50 = vmul.f32 %v21248_v25, %v21246_v10 }
 0x96e   :  { %v15175_v54 = vmul.f32 %v21250_v49, %v22865_v34  ;;  %15422 = vmatmul.mubr.f32.vlgmr.msra.gmra.mrb[12].mxu0 %v15259_v13  ;;  %15887 = vmatmul.mubr.f32.vlgmr.msra.gmra.mrb[12].mxu1 %v15259_v13  ;;  %v21252_v34 = vpop.eup %21251 }
 0x96f   :  { %15431 = vmatpush1.msra.mxu0 %v22173_v56  ;;  %15494 = vmatprep.mubr.f32.mxu0 %v21347_v1 }
 0x970   :  { %v22964_v6 = vadd.f32 %v15176_v50, %v15175_v54  ;;  %15507 = vmatprep.subr.mxu0 %v22150_v8  ;;  %15896 = vmatpush1.msra.mxu1 %v22175_v57 }
 0x971   :  { %15959 = vmatprep.mubr.f32.mxu1 %v21347_v1  ;;  %15972 = vmatprep.subr.mxu1 %v22153_v14 }
 0x972   :  { %21253 = vtanh.f32 %v22964_v6 }
 0x976   :  { %15498 = vmatmul.mubr.f32.vlgmr.msra.gmra.mrb[12].mxu0 %v15260_v59  ;;  %15963 = vmatmul.mubr.f32.vlgmr.msra.gmra.mrb[12].mxu1 %v15260_v59 }
 0x977   :  { %15511 = vmatpush1.msra.mxu0 %v22228_v19  ;;  %15574 = vmatprep.mubr.f32.mxu0 %v21347_v1 }
 0x978   :  { %15583 = vmatprep.subr.mxu0 %v22099_v46  ;;  %15976 = vmatpush1.msra.mxu1 %v22231_v20 }
 0x979   :  { %16039 = vmatprep.mubr.f32.mxu1 %v21347_v1  ;;  %16048 = vmatprep.subr.mxu1 %v22101_v61 }
 0x97c   :  { %v21254_v27 = vpop.eup %21253 }
 0x97d   :  { %v15179_v13 = vmul.f32 %v21254_v27, %v21252_v34 }
 0x97e   :  { %15576 = vmatmul.mubr.f32.vlgmr.msra.gmra.mrb[12].mxu0 %v22942_v22  ;;  %16041 = vmatmul.mubr.f32.vlgmr.msra.gmra.mrb[12].mxu1 %v22942_v22 }
 0x97f   :  { %15585 = vmatpush1.msra.mxu0 %v22173_v56  ;;  %15648 = vmatprep.mubr.f32.mxu0 %v21347_v1  ;;  %v16150_v44 = vsel %vm3585_vm10, %v15179_v13, 0 }
 0x980   :  { %16050 = vmatpush1.msra.mxu1 %v22175_v57  ;;  %16113 = vmatprep.mubr.f32.mxu1 %v21347_v1  ;;  %v16219_v59 = vand.u32 4294901760, %v16150_v44 }
 0x981   :  { %16153 = vmatprep.subr.mxu0 %v22279_v53  ;;  %16618 = vmatprep.subr.mxu1 %v22282_v55 }
 0x982   :  { %v16220_v40 = vsub.f32 %v16150_v44, %v16219_v59 }
 0x984   :  { %v16221_v45 = vand.u32 4294901760, %v16220_v40 }
 0x986   :  { %15650 = vmatmul.mubr.f32.vlgmr.msra.gmra.mrb[12].mxu0 %v22942_v22  ;;  %16115 = vmatmul.mubr.f32.vlgmr.msra.gmra.mrb[12].mxu1 %v22942_v22  ;;  %v16222_v29 = vsub.f32 %v16220_v40, %v16221_v45 }
 0x987   :  { %16155 = vmatpush1.msra.mxu0 %v22289_v35  ;;  %16218 = vmatprep.mubr.f32.mxu0 %v21347_v1 }
 0x988   :  { %16235 = vmatprep.subr.mxu0 %v22335_v26  ;;  %16620 = vmatpush1.msra.mxu1 %v22296_v30  ;;  %v16223_v31 = vand.u32 4294901760, %v16222_v29 }
 0x989   :  { %16683 = vmatprep.mubr.f32.mxu1 %v21347_v1  ;;  %16700 = vmatprep.subr.mxu1 %v22339_v28 }
 0x98a   :  { %16224 = vmatmul.mubr.f32.vlgmr.msra.gmra.mrb[18].mxu0 %v16223_v31  ;;  %16689 = vmatmul.mubr.f32.vlgmr.msra.gmra.mrb[18].mxu1 %v16223_v31 }
 0x98b   :  { %16241 = vmatpush1.msra.mxu0 %v22345_v36  ;;  %16304 = vmatprep.mubr.f32.mxu0 %v21347_v1 }
 0x98c   :  { %16314 = vmatprep.subr.mxu0 %v22294_v16  ;;  %16706 = vmatpush1.msra.mxu1 %v22349_v37 }
 0x98d   :  { %16769 = vmatprep.mubr.f32.mxu1 %v21347_v1  ;;  %16779 = vmatprep.subr.mxu1 %v22301_v47 }
 0x992   :  { %16306 = vmatmul.mubr.f32.vlgmr.msra.gmra.mrb[18].mxu0 %v16219_v59  ;;  %16771 = vmatmul.mubr.f32.vlgmr.msra.gmra.mrb[18].mxu1 %v16219_v59 }
 0x993   :  { %16317 = vmatpush1.msra.mxu0 %v22304_v58  ;;  %16380 = vmatprep.mubr.f32.mxu0 %v21347_v1 }
 0x994   :  { %16390 = vmatprep.subr.mxu0 %v22279_v53  ;;  %16782 = vmatpush1.msra.mxu1 %v22310_v2 }
 0x995   :  { %16845 = vmatprep.mubr.f32.mxu1 %v21347_v1  ;;  %16855 = vmatprep.subr.mxu1 %v22282_v55 }
 0x99a   :  { %16383 = vmatmul.mubr.f32.vlgmr.msra.gmra.mrb[18].mxu0 %v16220_v40  ;;  %16848 = vmatmul.mubr.f32.vlgmr.msra.gmra.mrb[18].mxu1 %v16220_v40 }
 0x99b   :  { %16392 = vmatpush1.msra.mxu0 %v22289_v35  ;;  %16455 = vmatprep.mubr.f32.mxu0 %v21347_v1 }
 0x99c   :  { %16468 = vmatprep.subr.mxu0 %v22307_v51  ;;  %16857 = vmatpush1.msra.mxu1 %v22296_v30 }
 0x99d   :  { %16920 = vmatprep.mubr.f32.mxu1 %v21347_v1  ;;  %16933 = vmatprep.subr.mxu1 %v22313_v4 }
 0x9a2   :  { %16459 = vmatmul.mubr.f32.vlgmr.msra.gmra.mrb[18].mxu0 %v16221_v45  ;;  %16924 = vmatmul.mubr.f32.vlgmr.msra.gmra.mrb[18].mxu1 %v16221_v45 }
 0x9a3   :  { %16472 = vmatpush1.msra.mxu0 %v22320_v9  ;;  %16535 = vmatprep.mubr.f32.mxu0 %v21347_v1 }
 0x9a4   :  { %16544 = vmatprep.subr.mxu0 %v22279_v53  ;;  %16937 = vmatpush1.msra.mxu1 %v22327_v23 }
 0x9a5   :  { %17000 = vmatprep.mubr.f32.mxu1 %v21347_v1  ;;  %17009 = vmatprep.subr.mxu1 %v22282_v55 }
 0x9aa   :  { %16537 = vmatmul.mubr.f32.vlgmr.msra.gmra.mrb[18].mxu0 %v16219_v59  ;;  %17002 = vmatmul.mubr.f32.vlgmr.msra.gmra.mrb[18].mxu1 %v16219_v59 }
 0x9ab   :  { %16546 = vmatpush1.msra.mxu0 %v22289_v35  ;;  %16609 = vmatprep.mubr.f32.mxu0 %v21347_v1 }
 0x9ac   :  { %17011 = vmatpush1.msra.mxu1 %v22296_v30  ;;  %17074 = vmatprep.mubr.f32.mxu1 %v21347_v1 }
 0x9ad   :  { %17122 = vmatprep.subr.mxu0 %v22099_v46  ;;  %17587 = vmatprep.subr.mxu1 %v22101_v61 }
 0x9b2   :  { %16611 = vmatmul.mubr.f32.vlgmr.msra.gmra.mrb[18].mxu0 %v16219_v59  ;;  %17076 = vmatmul.mubr.f32.vlgmr.msra.gmra.mrb[18].mxu1 %v16219_v59 }
 0x9b3   :  { %17124 = vmatpush1.msra.mxu0 %v22173_v56  ;;  %17187 = vmatprep.mubr.f32.mxu0 %v21347_v1 }
 0x9b4   :  { %17204 = vmatprep.subr.mxu0 %v22177_v60  ;;  %17589 = vmatpush1.msra.mxu1 %v22175_v57 }
 0x9b5   :  { %17652 = vmatprep.mubr.f32.mxu1 %v21347_v1  ;;  %17669 = vmatprep.subr.mxu1 %v22179_v41 }
 0xa59   :  { %v15651_v22 = vpop.f32.mrb[12].mxu0  ;;  %v16116_v32 = vpop.f32.mrb[12].mxu1 }
 0xa5a   :  { %v20299_v7 = vadd.f32 %v15651_v22, %v22409_v21  ;;  %v15653_v43 = vpop.f32.mrb[13].mxu0  ;;  %v16118_v0 = vpop.f32.mrb[13].mxu1  ;;  %v20315_v50 = vadd.f32 %v16116_v32, %v22423_v33 }
 0xa5b   :  { %v20300_v38 = vadd.f32 %v15653_v43, %v22412_v39  ;;  %v20316_v60 = vadd.f32 %v16118_v0, %v22418_v48 }
 0xa5c   :  { %v20095_v10 = vmul.f32 -1.442695, %v20299_v7 }
 0xa5d   :  { %v20096_v25 = vmul.f32 -1.442695, %v20300_v38  ;;  %v20097_v49 = vmul.f32 -1.442695, %v20316_v60 }
 0xa5e   :  { %21255 = vpow2.f32 %v20095_v10 }
 0xa5f   :  { %21257 = vpow2.f32 %v20096_v25 }
 0xa60   :  { %21259 = vpow2.f32 %v20097_v49 }
 0xa61   :  { %21261 = vtanh.f32 %v20315_v50 }
 0xa68   :  { %v21256_v52 = vpop.eup %21255 }
 0xa69   :  { %v21258_v54 = vpop.eup %21257  ;;  %v16128_v41 = vadd.f32 1.0, %v21256_v52 }
 0xa6a   :  { %v16134_v34 = vadd.f32 1.0, %v21258_v54  ;;  %v21260_v27 = vpop.eup %21259 }
 0xa6b   :  { %21263 = vrcp.f32 %v16128_v41  ;;  %v21262_v13 = vpop.eup %21261  ;;  %v16141_v45 = vadd.f32 1.0, %v21260_v27 }
 0xa6c   :  { %21265 = vrcp.f32 %v16134_v34 }
 0xa6d   :  { %21267 = vrcp.f32 %v16141_v45 }
 0xa75   :  { %v21264_v44 = vpop.eup %21263 }
 0xa76   :  { %v21266_v59 = vpop.eup %21265  ;;  %v16145_v40 = vmul.f32 %v21264_v44, %v21262_v13 }
 0xa77   :  { %v16144_v29 = vmul.f32 %v21266_v59, %v22936_v18  ;;  %v21268_v22 = vpop.eup %21267 }
 0xa79   :  { %v23035_v31 = vadd.f32 %v16145_v40, %v16144_v29 }
 0xa7b   :  { %21269 = vtanh.f32 %v23035_v31 }
 0xa85   :  { %v21270_v32 = vpop.eup %21269  ;;  %v16612_v7 = vpop.f32.mrb[18].mxu0 }
 0xa86   :  { %v17077_v43 = vpop.f32.mrb[18].mxu1  ;;  %v16148_v0 = vmul.f32 %v21270_v32, %v21268_v22  ;;  %v20321_v38 = vadd.f32 %v16612_v7, %v22432_v5  ;;  %v16614_v10 = vpop.f32.mrb[19].mxu0 }
 0xa87   :  { %v17079_v25 = vpop.f32.mrb[19].mxu1  ;;  %v20322_v60 = vadd.f32 %v16614_v10, %v22435_v15  ;;  %v20337_v59 = vadd.f32 %v17077_v43, %v22450_v17 }
 0xa88   :  { %v20098_v49 = vmul.f32 -1.442695, %v20321_v38  ;;  %v17119_v50 = vsel %vm3585_vm10, %v16148_v0, 0  ;;  %v20338_v41 = vadd.f32 %v17079_v25, %v22442_v24 }
 0xa89   :  { %v20099_v18 = vmul.f32 -1.442695, %v20322_v60  ;;  %v23041_v52 = vand.u32 4294901760, %v17119_v50 }
 0xa8a   :  { %21271 = vpow2.f32 %v20098_v49  ;;  %v20100_v13 = vmul.f32 -1.442695, %v20338_v41 }
 0xa8b   :  { %21273 = vpow2.f32 %v20099_v18  ;;  %v17189_v54 = vsub.f32 %v17119_v50, %v23041_v52 }
 0xa8c   :  { %21275 = vpow2.f32 %v20100_v13 }
 0xa8d   :  { %v17190_v34 = vand.u32 4294901760, %v17189_v54  ;;  %21277 = vtanh.f32 %v20337_v59 }
 0xa8f   :  { %v17191_v27 = vsub.f32 %v17189_v54, %v17190_v34 }
 0xa91   :  { %v17192_v44 = vand.u32 4294901760, %v17191_v27 }
 0xa93   :  { %17193 = vmatmul.mubr.f32.vlgmr.msra.gmra.mrb[14].mxu0 %v17192_v44  ;;  %17658 = vmatmul.mubr.f32.vlgmr.msra.gmra.mrb[14].mxu1 %v17192_v44 }
 0xa94   :  { %v21272_v40 = vpop.eup %21271  ;;  %17210 = vmatpush1.msra.mxu0 %v22249_v63  ;;  %17273 = vmatprep.mubr.f32.mxu0 %v21347_v1 }
 0xa95   :  { %v21274_v45 = vpop.eup %21273  ;;  %v17089_v29 = vadd.f32 1.0, %v21272_v40  ;;  %17283 = vmatprep.subr.mxu0 %v22138_v62  ;;  %17675 = vmatpush1.msra.mxu1 %v22251_v42 }
 0xa96   :  { %v17095_v22 = vadd.f32 1.0, %v21274_v45  ;;  %17738 = vmatprep.mubr.f32.mxu1 %v21347_v1  ;;  %17748 = vmatprep.subr.mxu1 %v22141_v3  ;;  %v21276_v62 = vpop.eup %21275 }
 0xa97   :  { %21279 = vrcp.f32 %v17089_v29  ;;  %v21278_v3 = vpop.eup %21277  ;;  %v17102_v7 = vadd.f32 1.0, %v21276_v62 }
 0xa98   :  { %21281 = vrcp.f32 %v17095_v22 }
 0xa99   :  { %21283 = vrcp.f32 %v17102_v7 }
 0xa9b   :  { %17275 = vmatmul.mubr.f32.vlgmr.msra.gmra.mrb[14].mxu0 %v23041_v52  ;;  %17740 = vmatmul.mubr.f32.vlgmr.msra.gmra.mrb[14].mxu1 %v23041_v52 }
 0xa9c   :  { %17286 = vmatpush1.msra.mxu0 %v22216_v11  ;;  %17349 = vmatprep.mubr.f32.mxu0 %v21347_v1 }
 0xa9d   :  { %17359 = vmatprep.subr.mxu0 %v22099_v46  ;;  %17751 = vmatpush1.msra.mxu1 %v22219_v12 }
 0xa9e   :  { %17814 = vmatprep.mubr.f32.mxu1 %v21347_v1  ;;  %17824 = vmatprep.subr.mxu1 %v22101_v61 }
 0xaa1   :  { %v21280_v63 = vpop.eup %21279 }
 0xaa2   :  { %v21282_v42 = vpop.eup %21281  ;;  %v17106_v32 = vmul.f32 %v21280_v63, %v21278_v3 }
 0xaa3   :  { %v17105_v43 = vmul.f32 %v21282_v42, %v22964_v6  ;;  %17352 = vmatmul.mubr.f32.vlgmr.msra.gmra.mrb[14].mxu0 %v17189_v54  ;;  %17817 = vmatmul.mubr.f32.vlgmr.msra.gmra.mrb[14].mxu1 %v17189_v54 }
 0xaa4   :  { %17361 = vmatpush1.msra.mxu0 %v22173_v56  ;;  %17424 = vmatprep.mubr.f32.mxu0 %v21347_v1 }
 0xaa5   :  { %v23063_v11 = vadd.f32 %v17106_v32, %v17105_v43  ;;  %17437 = vmatprep.subr.mxu0 %v22150_v8  ;;  %17826 = vmatpush1.msra.mxu1 %v22175_v57  ;;  %v21284_v8 = vpop.eup %21283 }
 0xaa6   :  { %17889 = vmatprep.mubr.f32.mxu1 %v21347_v1  ;;  %17902 = vmatprep.subr.mxu1 %v22153_v14 }
 0xaa7   :  { %21285 = vtanh.f32 %v23063_v11 }
 0xaab   :  { %17428 = vmatmul.mubr.f32.vlgmr.msra.gmra.mrb[14].mxu0 %v17190_v34  ;;  %17893 = vmatmul.mubr.f32.vlgmr.msra.gmra.mrb[14].mxu1 %v17190_v34 }
 0xaac   :  { %17441 = vmatpush1.msra.mxu0 %v22228_v19  ;;  %17504 = vmatprep.mubr.f32.mxu0 %v21347_v1 }
 0xaad   :  { %17513 = vmatprep.subr.mxu0 %v22099_v46  ;;  %17906 = vmatpush1.msra.mxu1 %v22231_v20  ;;  %v19041_v20 = vld [vmem:[#allocation3 + $0x108] sm:$0x1f] }
 0xaae   :  { %17969 = vmatprep.mubr.f32.mxu1 %v21347_v1  ;;  %17978 = vmatprep.subr.mxu1 %v22101_v61 }
 0xab1   :  { %v21286_v12 = vpop.eup %21285 }
 0xab2   :  { %v17109_v6 = vmul.f32 %v21286_v12, %v21284_v8 }
 0xab3   :  { %17506 = vmatmul.mubr.f32.vlgmr.msra.gmra.mrb[14].mxu0 %v23041_v52  ;;  %17971 = vmatmul.mubr.f32.vlgmr.msra.gmra.mrb[14].mxu1 %v23041_v52 }
 0xab4   :  { %17515 = vmatpush1.msra.mxu0 %v22173_v56  ;;  %17578 = vmatprep.mubr.f32.mxu0 %v21347_v1  ;;  %v18080_v14 = vsel %vm3585_vm10, %v17109_v6, 0 }
 0xab5   :  { %17980 = vmatpush1.msra.mxu1 %v22175_v57  ;;  %18043 = vmatprep.mubr.f32.mxu1 %v21347_v1  ;;  %v18149_v46 = vand.u32 4294901760, %v18080_v14 }
 0xab6   :  { %18083 = vmatprep.subr.mxu0 %v22279_v53  ;;  %18548 = vmatprep.subr.mxu1 %v22282_v55 }
 0xab7   :  { %v18150_v61 = vsub.f32 %v18080_v14, %v18149_v46 }
 0xab9   :  { %v18151_v19 = vand.u32 4294901760, %v18150_v61 }
 0xabb   :  { %17580 = vmatmul.mubr.f32.vlgmr.msra.gmra.mrb[14].mxu0 %v23041_v52  ;;  %18045 = vmatmul.mubr.f32.vlgmr.msra.gmra.mrb[14].mxu1 %v23041_v52  ;;  %v18152_v56 = vsub.f32 %v18150_v61, %v18151_v19 }
 0xabc   :  { %18085 = vmatpush1.msra.mxu0 %v22289_v35  ;;  %18148 = vmatprep.mubr.f32.mxu0 %v21347_v1 }
 0xabd   :  { %18165 = vmatprep.subr.mxu0 %v22335_v26  ;;  %18550 = vmatpush1.msra.mxu1 %v22296_v30  ;;  %v18153_v57 = vand.u32 4294901760, %v18152_v56 }
 0xabe   :  { %18613 = vmatprep.mubr.f32.mxu1 %v21347_v1  ;;  %18630 = vmatprep.subr.mxu1 %v22339_v28 }
 0xabf   :  { %18154 = vmatmul.mubr.f32.vlgmr.msra.gmra.mrb[16].mxu0 %v18153_v57  ;;  %18619 = vmatmul.mubr.f32.vlgmr.msra.gmra.mrb[16].mxu1 %v18153_v57 }
 0xac0   :  { %18171 = vmatpush1.msra.mxu0 %v22345_v36  ;;  %18234 = vmatprep.mubr.f32.mxu0 %v21347_v1 }
 0xac1   :  { %18244 = vmatprep.subr.mxu0 %v22294_v16  ;;  %18636 = vmatpush1.msra.mxu1 %v22349_v37 }
 0xac2   :  { %18699 = vmatprep.mubr.f32.mxu1 %v21347_v1  ;;  %18709 = vmatprep.subr.mxu1 %v22301_v47 }
 0xac7   :  { %18236 = vmatmul.mubr.f32.vlgmr.msra.gmra.mrb[16].mxu0 %v18149_v46  ;;  %18701 = vmatmul.mubr.f32.vlgmr.msra.gmra.mrb[16].mxu1 %v18149_v46 }
 0xac8   :  { %18247 = vmatpush1.msra.mxu0 %v22304_v58  ;;  %18310 = vmatprep.mubr.f32.mxu0 %v21347_v1 }
 0xac9   :  { %18320 = vmatprep.subr.mxu0 %v22279_v53  ;;  %18712 = vmatpush1.msra.mxu1 %v22310_v2 }
 0xaca   :  { %18775 = vmatprep.mubr.f32.mxu1 %v21347_v1  ;;  %18785 = vmatprep.subr.mxu1 %v22282_v55 }
 0xacf   :  { %18313 = vmatmul.mubr.f32.vlgmr.msra.gmra.mrb[16].mxu0 %v18150_v61  ;;  %18778 = vmatmul.mubr.f32.vlgmr.msra.gmra.mrb[16].mxu1 %v18150_v61 }
 0xad0   :  { %18322 = vmatpush1.msra.mxu0 %v22289_v35  ;;  %18385 = vmatprep.mubr.f32.mxu0 %v21347_v1 }
 0xad1   :  { %18398 = vmatprep.subr.mxu0 %v22307_v51  ;;  %18787 = vmatpush1.msra.mxu1 %v22296_v30 }
 0xad2   :  { %18850 = vmatprep.mubr.f32.mxu1 %v21347_v1  ;;  %18863 = vmatprep.subr.mxu1 %v22313_v4 }
 0xad7   :  { %18389 = vmatmul.mubr.f32.vlgmr.msra.gmra.mrb[16].mxu0 %v18151_v19  ;;  %18854 = vmatmul.mubr.f32.vlgmr.msra.gmra.mrb[16].mxu1 %v18151_v19 }
 0xad8   :  { %18402 = vmatpush1.msra.mxu0 %v22320_v9  ;;  %18465 = vmatprep.mubr.f32.mxu0 %v21347_v1 }
 0xad9   :  { %18474 = vmatprep.subr.mxu0 %v22279_v53  ;;  %18867 = vmatpush1.msra.mxu1 %v22327_v23  ;;  %v19046_v53 = vsel %vm3589_vm9, %v19041_v20, 0 }
 0xada   :  { %18930 = vmatprep.mubr.f32.mxu1 %v21347_v1  ;;  %18939 = vmatprep.subr.mxu1 %v22282_v55  ;;  %v23128_v55 = vand.u32 4294901760, %v19046_v53 }
 0xadf   :  { %18467 = vmatmul.mubr.f32.vlgmr.msra.gmra.mrb[16].mxu0 %v18149_v46  ;;  %18932 = vmatmul.mubr.f32.vlgmr.msra.gmra.mrb[16].mxu1 %v18149_v46 }
 0xae0   :  { %18476 = vmatpush1.msra.mxu0 %v22289_v35  ;;  %18539 = vmatprep.mubr.f32.mxu0 %v21347_v1  ;;  %v23131_v35 = vsub.f32 %v19046_v53, %v23128_v55 }
 0xae1   :  { %18941 = vmatpush1.msra.mxu1 %v22296_v30  ;;  %19004 = vmatprep.mubr.f32.mxu1 %v21347_v1 }
 0xae2   :  { %20136 = vmatprep.subr.mxu1 %v21347_v1  ;;  %20131 = vmatprep.subr.mxu0 %v21347_v1  ;;  %v19127_v16 = vand.u32 4294901760, %v23131_v35 }
 0xae4   :  { %v19128_v30 = vsub.f32 %v23131_v35, %v19127_v16 }
 0xae6   :  { %v19129_v47 = vand.u32 4294901760, %v19128_v30 }
 0xae7   :  { %18541 = vmatmul.mubr.f32.vlgmr.msra.gmra.mrb[16].mxu0 %v18149_v46  ;;  %19006 = vmatmul.mubr.f32.vlgmr.msra.gmra.mrb[16].mxu1 %v18149_v46 }
 0xae8   :  { %20138 = vmatprep.mubr.msk.f32.mxu1 %vm21348_vm11, %v21347_v1  ;;  %20133 = vmatprep.mubr.msk.f32.mxu0 %vm21348_vm11, %v21347_v1 }
 0xae9   :  { %20132 = vmatpush3.msra.mxu0 %v23128_v55  ;;  %20137 = vmatpush3.msra.mxu1 %v19129_v47 }
 0xaea   :  { %20141 = vmatprep.subr.mxu0 %v21347_v1  ;;  %20146 = vmatprep.subr.mxu1 %v21347_v1 }
 0xb8e   :  { %v17581_v58 = vpop.f32.mrb[14].mxu0  ;;  %v18046_v51 = vpop.f32.mrb[14].mxu1 }
 0xb8f   :  { %v20301_v2 = vadd.f32 %v17581_v58, %v22409_v21  ;;  %v17583_v4 = vpop.f32.mrb[15].mxu0  ;;  %v18048_v9 = vpop.f32.mrb[15].mxu1  ;;  %v20317_v0 = vadd.f32 %v18046_v51, %v22423_v33 }
 0xb90   :  { %v20302_v23 = vadd.f32 %v17583_v4, %v22412_v39  ;;  %v20318_v36 = vadd.f32 %v18048_v9, %v22418_v48 }
 0xb91   :  { %v20101_v26 = vmul.f32 -1.442695, %v20301_v2 }
 0xb92   :  { %v20102_v28 = vmul.f32 -1.442695, %v20302_v23  ;;  %v20103_v37 = vmul.f32 -1.442695, %v20318_v36 }
 0xb93   :  { %21287 = vpow2.f32 %v20101_v26 }
 0xb94   :  { %21289 = vpow2.f32 %v20102_v28 }
 0xb95   :  { %21291 = vpow2.f32 %v20103_v37 }
 0xb96   :  { %21293 = vtanh.f32 %v20317_v0 }
 0xb9d   :  { %v21288_v38 = vpop.eup %21287 }
 0xb9e   :  { %v21290_v10 = vpop.eup %21289  ;;  %v18058_v25 = vadd.f32 1.0, %v21288_v38 }
 0xb9f   :  { %v18064_v60 = vadd.f32 1.0, %v21290_v10  ;;  %v21292_v21 = vpop.eup %21291 }
 0xba0   :  { %21295 = vrcp.f32 %v18058_v25  ;;  %v21294_v49 = vpop.eup %21293  ;;  %v18071_v52 = vadd.f32 1.0, %v21292_v21 }
 0xba1   :  { %21297 = vrcp.f32 %v18064_v60 }
 0xba2   :  { %21299 = vrcp.f32 %v18071_v52 }
 0xbaa   :  { %v21296_v39 = vpop.eup %21295 }
 0xbab   :  { %v21298_v50 = vpop.eup %21297  ;;  %v18075_v18 = vmul.f32 %v21296_v39, %v21294_v49 }
 0xbac   :  { %v18074_v54 = vmul.f32 %v21298_v50, %v23035_v31  ;;  %v21300_v33 = vpop.eup %21299 }
 0xbae   :  { %v18076_v48 = vadd.f32 %v18075_v18, %v18074_v54 }
 0xbb0   :  { %21301 = vtanh.f32 %v18076_v48 }
 0xbba   :  { %v21302_v41 = vpop.eup %21301  ;;  %v18542_v34 = vpop.f32.mrb[16].mxu0 }
 0xbbb   :  { %v19007_v27 = vpop.f32.mrb[16].mxu1  ;;  %v20319_v13 = vadd.f32 %v18542_v34, %v22432_v5  ;;  %v18544_v44 = vpop.f32.mrb[17].mxu0  ;;  %v18078_v40 = vmul.f32 %v21302_v41, %v21300_v33 }
 0xbbc   :  { %v19009_v59 = vpop.f32.mrb[17].mxu1  ;;  %v20320_v45 = vadd.f32 %v18544_v44, %v22435_v15  ;;  %v20335_v3 = vadd.f32 %v19007_v27, %v22450_v17  ;;  %v19040_v17 = vld [vmem:[#allocation3 + $0x100] sm:$0x1f] }
 0xbbd   :  { %v20104_v29 = vmul.f32 -1.442695, %v20319_v13  ;;  %v20336_v31 = vadd.f32 %v19009_v59, %v22442_v24  ;;  %v19498_v46 = vsel %vm3589_vm9, %v19040_v17, 0  ;;  %v19495_v58 = vsel %vm3585_vm10, %v18078_v40, 0 }
 0xbbe   :  { %v20105_v22 = vmul.f32 -1.442695, %v20320_v45  ;;  %v19501_v61 = vand.u32 4294901760, %v19498_v46  ;;  %v19566_v4 = vand.u32 4294901760, %v19495_v58 }
 0xbbf   :  { %21303 = vpow2.f32 %v20104_v29  ;;  %v20106_v62 = vmul.f32 -1.442695, %v20336_v31 }
 0xbc0   :  { %21305 = vpow2.f32 %v20105_v22  ;;  %v19578_v57 = vsub.f32 %v19498_v46, %v19501_v61  ;;  %v19567_v28 = vsub.f32 %v19495_v58, %v19566_v4 }
 0xbc1   :  { %21307 = vpow2.f32 %v20106_v62 }
 0xbc2   :  { %21309 = vtanh.f32 %v20335_v3  ;;  %v19579_v47 = vand.u32 4294901760, %v19578_v57  ;;  %v19568_v36 = vand.u32 4294901760, %v19567_v28 }
 0xbc4   :  { %v19580_v2 = vsub.f32 %v19578_v57, %v19579_v47 }
 0xbc6   :  { %v19581_v26 = vand.u32 4294901760, %v19580_v2 }
 0xbc9   :  { %v21304_v63 = vpop.eup %21303 }
 0xbca   :  { %v21306_v42 = vpop.eup %21305  ;;  %v19019_v32 = vadd.f32 1.0, %v21304_v63 }
 0xbcb   :  { %v19025_v5 = vadd.f32 1.0, %v21306_v42  ;;  %v21308_v7 = vpop.eup %21307 }
 0xbcc   :  { %21311 = vrcp.f32 %v19019_v32  ;;  %v21310_v43 = vpop.eup %21309  ;;  %v19032_v6 = vadd.f32 1.0, %v21308_v7  ;;  %v19946_v7 = vld [vmem:[#allocation3 + $0x81] ss:$0 sm:$0xff] }
 0xbcd   :  { %21313 = vrcp.f32 %v19025_v5 }
 0xbce   :  { %21315 = vrcp.f32 %v19032_v6 }
 0xbd6   :  { %v21312_v15 = vpop.eup %21311 }
 0xbd7   :  { %v21314_v8 = vpop.eup %21313  ;;  %v19036_v12 = vmul.f32 %v21312_v15, %v21310_v43 }
 0xbd8   :  { %v19035_v14 = vmul.f32 %v21314_v8, %v23063_v11  ;;  %v21316_v19 = vpop.eup %21315 }
 0xbda   :  { %v19037_v24 = vadd.f32 %v19036_v12, %v19035_v14 }
 0xbdc   :  { %21317 = vtanh.f32 %v19037_v24 }
 0xbe6   :  { %v21318_v56 = vpop.eup %21317 }
 0xbe7   :  { %v19039_v20 = vmul.f32 %v21318_v56, %v21316_v19 }
 0xbe9   :  { %v19043_v53 = vsel %vm3585_vm10, %v19039_v20, 0 }
 0xbea   :  { %v19114_v30 = vand.u32 4294901760, %v19043_v53 }
 0xbec   :  { %v19115_v51 = vsub.f32 %v19043_v53, %v19114_v30  ;;  %20139 = vmatmul.mubr.f32.vlgmr.msra.gmra.mrb[32].mxu1 %v19114_v30 }
 0xbed   :  { %20147 = vmatpush3.msra.mxu1 %v23128_v55  ;;  %20148 = vmatprep.mubr.msk.f32.mxu1 %vm21348_vm11, %v21347_v1 }
 0xbee   :  { %v19116_v11 = vand.u32 4294901760, %v19115_v51  ;;  %20156 = vmatprep.subr.mxu1 %v21347_v1 }
 0xbf0   :  { %20149 = vmatmul.mubr.f32.vlgmr.msra.gmra.mrb[34].mxu1 %v19116_v11  ;;  %v19117_v9 = vsub.f32 %v19115_v51, %v19116_v11 }
 0xbf1   :  { %20157 = vmatpush3.msra.mxu1 %v23128_v55  ;;  %20158 = vmatprep.mubr.msk.f32.mxu1 %vm21348_vm11, %v21347_v1  ;;  %v19569_v55 = vsub.f32 %v19567_v28, %v19568_v36 }
 0xbf2   :  { %v19118_v23 = vand.u32 4294901760, %v19117_v9  ;;  %20166 = vmatprep.subr.mxu1 %v21347_v1 }
 0xbf4   :  { %20134 = vmatmul.mubr.f32.vlgmr.msra.gmra.mrb[32].mxu0 %v19118_v23  ;;  %20159 = vmatmul.mubr.f32.vlgmr.msra.gmra.mrb[36].mxu1 %v19114_v30 }
 0xbf5   :  { %20142 = vmatpush3.msra.mxu0 %v23131_v35  ;;  %20143 = vmatprep.mubr.msk.f32.mxu0 %vm21348_vm11, %v21347_v1  ;;  %v19570_v35 = vand.u32 4294901760, %v19569_v55 }
 0xbf6   :  { %20151 = vmatprep.subr.mxu0 %v21347_v1  ;;  %20167 = vmatpush3.msra.mxu1 %v19581_v26 }
 0xbf7   :  { %20168 = vmatprep.mubr.msk.f32.mxu1 %vm21348_vm11, %v21347_v1  ;;  %20176 = vmatprep.subr.mxu1 %v21347_v1 }
 0xbf8   :  { %20144 = vmatmul.mubr.f32.vlgmr.msra.gmra.mrb[34].mxu0 %v19115_v51  ;;  %20169 = vmatmul.mubr.f32.vlgmr.msra.gmra.mrb[38].mxu1 %v19566_v4 }
 0xbf9   :  { %20152 = vmatpush3.msra.mxu0 %v19127_v16  ;;  %20153 = vmatprep.mubr.msk.f32.mxu0 %vm21348_vm11, %v21347_v1 }
 0xbfa   :  { %20161 = vmatprep.subr.mxu0 %v21347_v1  ;;  %20177 = vmatpush3.msra.mxu1 %v19501_v61 }
 0xbfb   :  { %20178 = vmatprep.mubr.msk.f32.mxu1 %vm21348_vm11, %v21347_v1  ;;  %20186 = vmatprep.subr.mxu1 %v21347_v1 }
 0xbfc   :  { %20154 = vmatmul.mubr.f32.vlgmr.msra.gmra.mrb[36].mxu0 %v19114_v30  ;;  %20179 = vmatmul.mubr.f32.vlgmr.msra.gmra.mrb[40].mxu1 %v19568_v36 }
 0xbfd   :  { %20162 = vmatpush3.msra.mxu0 %v19501_v61  ;;  %20163 = vmatprep.mubr.msk.f32.mxu0 %vm21348_vm11, %v21347_v1 }
 0xbfe   :  { %20171 = vmatprep.subr.mxu0 %v21347_v1  ;;  %20187 = vmatpush3.msra.mxu1 %v19501_v61 }
 0xbff   :  { %20188 = vmatprep.mubr.msk.f32.mxu1 %vm21348_vm11, %v21347_v1 }
 0xc00   :  { %20164 = vmatmul.mubr.f32.vlgmr.msra.gmra.mrb[38].mxu0 %v19570_v35  ;;  %20189 = vmatmul.mubr.f32.vlgmr.msra.gmra.mrb[42].mxu1 %v19566_v4 }
 0xc01   :  { %20172 = vmatpush3.msra.mxu0 %v19578_v57  ;;  %20173 = vmatprep.mubr.msk.f32.mxu0 %vm21348_vm11, %v21347_v1 }
 0xc02   :  { %20181 = vmatprep.subr.mxu0 %v21347_v1 }
 0xc04   :  { %20174 = vmatmul.mubr.f32.vlgmr.msra.gmra.mrb[40].mxu0 %v19567_v28 }
 0xc05   :  { %20182 = vmatpush3.msra.mxu0 %v19579_v47  ;;  %20183 = vmatprep.mubr.msk.f32.mxu0 %vm21348_vm11, %v21347_v1 }
 0xc08   :  { %20184 = vmatmul.mubr.f32.vlgmr.msra.gmra.mrb[42].mxu0 %v19566_v4 }
 0xcbf   :  { %v19196_v16 = vpop.f32.mrb[32].mxu1 }
 0xcc0   :  { %v20140_v37 = vpop.f32.mrb[33].mxu1 }
 0xcc3   :  { %v19344_v0 = vpop.f32.mrb[34].mxu1 }
 0xcc4   :  { %v20150_v38 = vpop.f32.mrb[35].mxu1 }
 0xcc7   :  { %v19120_v10 = vpop.f32.mrb[32].mxu0  ;;  %v19490_v25 = vpop.f32.mrb[36].mxu1 }
 0xcc8   :  { %v19197_v60 = vadd.f32 %v19196_v16, %v19120_v10  ;;  %v20135_v21 = vpop.f32.mrb[33].mxu0  ;;  %v20160_v49 = vpop.f32.mrb[37].mxu1 }
 0xccb   :  { %v19270_v39 = vpop.f32.mrb[34].mxu0  ;;  %v19648_v50 = vpop.f32.mrb[38].mxu1 }
 0xccc   :  { %v19271_v18 = vadd.f32 %v19270_v39, %v19197_v60  ;;  %v20145_v52 = vpop.f32.mrb[35].mxu0  ;;  %v20170_v54 = vpop.f32.mrb[39].mxu1 }
 0xcce   :  { %v19345_v48 = vadd.f32 %v19344_v0, %v19271_v18 }
 0xccf   :  { %v19418_v33 = vpop.f32.mrb[36].mxu0  ;;  %v19796_v41 = vpop.f32.mrb[40].mxu1 }
 0xcd0   :  { %v19419_v34 = vadd.f32 %v19418_v33, %v19345_v48  ;;  %v20155_v1 = vpop.f32.mrb[37].mxu0  ;;  %v20180_v27 = vpop.f32.mrb[41].mxu1 }
 0xcd2   :  { %v19491_v13 = vadd.f32 %v19490_v25, %v19419_v34 }
 0xcd3   :  { %v19572_v44 = vpop.f32.mrb[38].mxu0  ;;  %v19942_v59 = vpop.f32.mrb[42].mxu1 }
 0xcd4   :  { %v19573_v40 = vadd.f32 %v19572_v44, %v19491_v13  ;;  %v20165_v45 = vpop.f32.mrb[39].mxu0  ;;  %v20190_v29 = vpop.f32.mrb[43].mxu1 }
 0xcd6   :  { %v19649_v22 = vadd.f32 %v19648_v50, %v19573_v40 }
 0xcd7   :  { %v19722_v31 = vpop.f32.mrb[40].mxu0 }
 0xcd8   :  { %v19723_v62 = vadd.f32 %v19722_v31, %v19649_v22  ;;  %v20175_v3 = vpop.f32.mrb[41].mxu0 }
 0xcda   :  { %v19797_v63 = vadd.f32 %v19796_v41, %v19723_v62 }
 0xcdb   :  { %v19870_v42 = vpop.f32.mrb[42].mxu0 }
 0xcdc   :  { %v19871_v32 = vadd.f32 %v19870_v42, %v19797_v63  ;;  %v20185_v5 = vpop.f32.mrb[43].mxu0 }
 0xcde   :  { %v19943_v43 = vadd.f32 %v19942_v59, %v19871_v32 }
 0xce0   :  { %v19947_v15 = vadd.f32 %v19946_v7, %v19943_v43 }
 0xce2   :  { %19949 = vst.msk [vmem:[%s23191_s2] sm:$0xff] %vm19948_vm12, %v19947_v15 }
 0xce3   :  { %19954 = vsyncpa [#allocation4], 1 }

</bundles_post_ra>
